<compile_context>
chip_gen: v6e
topology: v6e:2x2x1
jax: 0.10.0
libtpu: 0.0.40
codegen_flags: <defaults>
</compile_context>

<pallas_src>
import functools

import jax
import jax.numpy as jnp
from jax.experimental import pallas as pl
from jax.experimental.pallas import tpu as pltpu


_STRIDES = (2, 2, 2, 1, 1)
_LRELU_SLOPE = 0.2
_IN_EPS = 1e-5
_VMEM_LIMIT = 48 * 1024 * 1024   # <= v7x's 64 MiB/TC; v5e/v6e have 128 MiB.
_ACC_ELEMS = 16384               # f32 accumulator capped at 64 KiB (16 vregs)


def _round_up(x, m):
    return (x + m - 1) // m * m


def _tile_m(m_ext, cout):
    """M-tile (multiple of 16) such that the f32 accumulator stays <= 64 KiB."""
    tm_cap = max(16, min(512, (_ACC_ELEMS // max(cout, 1)) // 16 * 16))
    mt = pl.cdiv(m_ext, tm_cap)
    tm = _round_up(pl.cdiv(m_ext, mt), 16)
    mt = pl.cdiv(m_ext, tm)
    return tm, mt, mt * tm


def _compiler_params():
    return pltpu.CompilerParams(
        dimension_semantics=("parallel", "parallel"),
        vmem_limit_bytes=_VMEM_LIMIT)


# ----------------------------------------------------------------------------
# Pallas kernel
# ----------------------------------------------------------------------------
def _conv_kernel(*refs, taps, tiled_x, negative_slope, emit_stats):
    """One (batch, M-tile) step of Conv2d(k=4).

    tiled_x=True : x block is [1, 1, TM, K]     (K-packed taps / tap-major) and
                   the conv is ONE MXU matmul against w_ref[0] ([K, Cout]).
    tiled_x=False: x block is [1, P, L, Cin] f32 resident tap planes; the conv
                   is 16 accumulated [TM, Cin] x [Cin, Cout] matmuls.
    emit_stats   : additionally writes masked per-tile sum / sum-of-squares of
                   the pre-activation output (for the fused InstanceNorm).
    """
    if emit_stats:
        x_ref, w_ref, b_ref, mask_ref, o_ref, sum_ref, sq_ref = refs
    else:
        x_ref, w_ref, b_ref, o_ref = refs
    tm, cout = o_ref.shape[1], o_ref.shape[2]

    if tiled_x:
        acc = jnp.dot(x_ref[0, 0], w_ref[0],
                      preferred_element_type=jnp.float32)
    else:
        m0 = pl.multiple_of(pl.program_id(1) * tm, 16)
        acc = jnp.zeros((tm, cout), jnp.float32)
        for t, (p, off) in enumerate(taps):
            a = x_ref[0, p, pl.ds(m0 + off, tm), :].astype(jnp.bfloat16)
            acc = acc + jnp.dot(a, w_ref[t],
                                preferred_element_type=jnp.float32)

    acc = acc + b_ref[...]

    if emit_stats:
        mf = mask_ref[0]                                   # [TM, 1] in {0, 1}
        ym = acc * mf
        s = jnp.sum(ym, axis=0, keepdims=True)             # [1, Cout]
        q = jnp.sum(ym * acc, axis=0, keepdims=True)       # mask * acc^2
        sum_ref[0, 0] = jnp.broadcast_to(s, (8, cout))
        sq_ref[0, 0] = jnp.broadcast_to(q, (8, cout))

    if negative_slope is not None:
        acc = jnp.where(acc >= 0, acc, negative_slope * acc)
    o_ref[0] = acc.astype(o_ref.dtype)


def _launch_conv(planes, w_slab, bias2, mask, out_dtype, tm, mt, m_pad, cout,
                 taps, tiled_x, negative_slope, emit_stats):
    N, P, L, K = planes.shape
    if tiled_x:
        x_spec = pl.BlockSpec((1, 1, tm, K), lambda n, t: (n, 0, t, 0))
    else:
        x_spec = pl.BlockSpec((1, P, L, K), lambda n, t: (n, 0, 0, 0))
    in_specs = [x_spec,
                pl.BlockSpec(w_slab.shape, lambda n, t: (0, 0, 0)),
                pl.BlockSpec(bias2.shape, lambda n, t: (0, 0))]
    operands = [planes, w_slab, bias2]
    out_shapes = [jax.ShapeDtypeStruct((N, m_pad, cout), out_dtype)]
    out_specs = [pl.BlockSpec((1, tm, cout), lambda n, t: (n, t, 0))]
    if emit_stats:
        in_specs.append(pl.BlockSpec((1, tm, 1), lambda n, t: (t, 0, 0)))
        operands.append(mask)
        for _ in range(2):
            out_shapes.append(
                jax.ShapeDtypeStruct((N, mt, 8, cout), jnp.float32))
            out_specs.append(
                pl.BlockSpec((1, 1, 8, cout), lambda n, t: (n, t, 0, 0)))

    kernel = functools.partial(_conv_kernel, taps=tuple(taps), tiled_x=tiled_x,
                               negative_slope=negative_slope,
                               emit_stats=emit_stats)
    return pl.pallas_call(
        kernel,
        out_shape=tuple(out_shapes),
        grid=(N, mt),
        in_specs=in_specs,
        out_specs=tuple(out_specs),
        compiler_params=_compiler_params(),
    )(*operands)


# ----------------------------------------------------------------------------
# Conv wrappers
# ----------------------------------------------------------------------------
def _conv2d_std_pallas(x_nhwc, p, stride, negative_slope, emit_stats,
                       out_dtype=jnp.bfloat16):
    """Conv2d(k=4, pad=1, stride in {1,2}) on an NHWC (bf16) input.

    Returns y (NHWC, out_dtype) and, when emit_stats, the per-(n, c) mean and
    biased variance of the pre-activation output for the fused InstanceNorm.
    """
    N, H, W, Cin = x_nhwc.shape
    Cout = p["w_taps"].shape[-1]
    OH = (H - 2) // stride + 1
    OW = (W - 2) // stride + 1

    use_packed = (stride == 2) and (16 * Cin <= 128)
    if use_packed:
        # Taps folded into lanes: one K=16*Cin MXU pass per tile, lane-dense
        # bf16 tiles, no resident plane / no dynamic slices in the kernel.
        M_ext = OH * OW
        TM, MT, M_pad = _tile_m(M_ext, Cout)
        xp = jnp.pad(x_nhwc, ((0, 0), (1, 1), (1, 1), (0, 0)))
        cols = []
        for ki in range(4):
            for kj in range(4):
                cols.append(
                    xp[:, ki:ki + 2 * OH - 1:2, kj:kj + 2 * OW - 1:2, :])
        im = jnp.stack(cols, axis=3).reshape(N, M_ext, 16 * Cin)
        im = jnp.pad(im, ((0, 0), (0, M_pad - M_ext), (0, 0)))
        planes = im.reshape(N, 1, M_pad, 16 * Cin).astype(jnp.bfloat16)
        w_slab = p["w_flat"]
        taps, tiled_x = ((0, 0),), True
        valid = jnp.arange(M_pad) < M_ext
    else:
        # Resident padded tap planes (f32): 16 shifted unit-stride slices.
        if stride == 2:
            assert H % 2 == 0 and W % 2 == 0, "stride-2 conv expects even H, W"
            PH0, PW, P, DR, DC = (H + 2) // 2, (W + 2) // 2, 4, 1, 1
        else:
            PH0, PW, P, DR, DC = H + 2, W + 2, 1, 3, 3
        M_ext = OH * PW
        TM, MT, M_pad = _tile_m(M_ext, Cout)
        L_needed = M_pad + DR * PW + DC
        deficit = L_needed - PH0 * PW
        extra_p = (deficit + PW - 1) // PW if deficit > 0 else 0
        PH = PH0 + extra_p
        extra_h = extra_p * stride
        xp = jnp.pad(x_nhwc.astype(jnp.float32),
                     ((0, 0), (1, 1 + extra_h), (1, 1), (0, 0)))
        if stride == 2:
            planes = xp.reshape(N, PH, 2, PW, 2, Cin)
            planes = planes.transpose(0, 2, 4, 1, 3, 5).reshape(
                N, 4, PH, PW, Cin)
        else:
            planes = xp.reshape(N, 1, PH, PW, Cin)
        planes = planes.reshape(N, P, PH * PW, Cin)
        taps = []
        for ki in range(4):
            for kj in range(4):
                if stride == 2:
                    taps.append(((ki % 2) * 2 + (kj % 2),
                                 (ki // 2) * PW + (kj // 2)))
                else:
                    taps.append((0, ki * PW + kj))
        w_slab = p["w_taps"]
        tiled_x = False
        rows = jnp.arange(M_pad)
        valid = (rows < M_ext) & (rows % PW < OW)

    mask = None
    if emit_stats:
        mask = valid.astype(jnp.float32).reshape(MT, TM, 1)

    outs = _launch_conv(planes, w_slab, p["b2"], mask, out_dtype,
                        TM, MT, M_pad, Cout, taps, tiled_x,
                        negative_slope, emit_stats)
    y_ext = outs[0]
    if use_packed:
        y = y_ext[:, :M_ext, :].reshape(N, OH, OW, Cout)
    else:
        y = y_ext[:, :M_ext, :].reshape(N, OH, PW, Cout)[:, :, :OW, :]
    if not emit_stats:
        return y
    cnt = float(OH * OW)
    s = jnp.sum(outs[1][:, :, 0, :], axis=1)
    q = jnp.sum(outs[2][:, :, 0, :], axis=1)
    mean = s / cnt
    var = jnp.maximum(q / cnt - mean * mean, 0.0)
    return y, mean, var


def _conv2d_final_pallas(x_nhwc, p):
    """Conv2d(k=4, pad=1, stride=1, Cout=1), tap-major.

    One [TM, Cin] x [Cin, 16] MXU matmul per tile produces per-tap partial
    sums; the 16 shifted adds + bias run as tiny (fused) XLA ops.
    """
    N, H, W, Cin = x_nhwc.shape
    OH, OW = H - 1, W - 1
    PW = W + 2
    ME = OH * PW                           # extended (with garbage cols) rows
    R = ME + 3 * PW + 3                    # rows of partial sums needed
    TM, MT, M_pad = _tile_m(R, 16)
    xp = jnp.pad(x_nhwc, ((0, 0), (1, 1), (1, 1), (0, 0)))
    xp = xp.reshape(N, (H + 2) * PW, Cin)
    xp = jnp.pad(xp, ((0, 0), (0, M_pad - (H + 2) * PW), (0, 0)))
    planes = xp.reshape(N, 1, M_pad, Cin).astype(jnp.bfloat16)

    zeros_b = jnp.zeros((1, 16), jnp.float32)
    outs = _launch_conv(planes, p["w_part"], zeros_b, None, jnp.float32,
                        TM, MT, M_pad, 16, ((0, 0),), True, None, False)
    part = outs[0]                                         # [N, M_pad, 16] f32

    out_ext = jnp.zeros((N, ME), jnp.float32)
    for ki in range(4):
        for kj in range(4):
            t = ki * 4 + kj
            off = ki * PW + kj
            out_ext = out_ext + part[:, off:off + ME, t]
    out_ext = out_ext + p["b"][0]
    return out_ext.reshape(N, OH, PW, 1)[:, :, :OW, :]


def _apply_instnorm_lrelu(x_bf16, mean, var):
    """InstanceNorm (stats from the producing conv kernel) + LeakyReLU.

    Pure XLA elementwise; fuses with the next conv's input relayout.
    """
    rstd = jax.lax.rsqrt(var + _IN_EPS)
    y = (x_bf16.astype(jnp.float32) - mean[:, None, None, :]) \
        * rstd[:, None, None, :]
    y = jnp.where(y >= 0, y, _LRELU_SLOPE * y)
    return y.astype(jnp.bfloat16)


# ----------------------------------------------------------------------------
# Discriminator: parameter init + forward
# ----------------------------------------------------------------------------
def init_discriminator_params(key, in_channels, conv_dim):
    """All weight layouts prepared ONCE (bf16), bias kept in f32."""
    chans = [
        (in_channels, conv_dim),
        (conv_dim, 2 * conv_dim),
        (2 * conv_dim, 4 * conv_dim),
        (4 * conv_dim, 8 * conv_dim),
        (8 * conv_dim, 1),
    ]
    params = []
    for i, (cin, cout) in enumerate(chans):
        kw, kb = jax.random.split(jax.random.fold_in(key, i))
        w4 = 0.02 * jax.random.normal(kw, (4, 4, cin, cout), jnp.float32)
        b = 0.02 * jax.random.normal(kb, (cout,), jnp.float32)
        params.append(dict(
            w4=w4,                                             # reference only
            b=b,
            b2=b.reshape(1, cout),
            # per-tap slabs [16, Cin, Cout] (tap-plane layers)
            w_taps=w4.reshape(16, cin, cout).astype(jnp.bfloat16),
            # lane-packed slab [1, 16*Cin, Cout] (K-packed layers)
            w_flat=w4.reshape(1, 16 * cin, cout).astype(jnp.bfloat16),
            # tap-major slab [1, Cin, 16] (Cout == 1 final layer)
            w_part=jnp.transpose(w4.reshape(16, cin, cout)[:, :, 0],
                                 (1, 0)).reshape(1, cin, 16)
                       .astype(jnp.bfloat16),
        ))
    return params


@jax.jit
def discriminator_forward(x_nchw, params):
    x = jnp.transpose(x_nchw, (0, 2, 3, 1)).astype(jnp.bfloat16)     # -> NHWC
    # conv1 (stride 2) + LeakyReLU fused; taps K-packed into the lane dim.
    x = _conv2d_std_pallas(x, params[0], stride=2,
                           negative_slope=_LRELU_SLOPE, emit_stats=False)
    # conv2..conv4: conv emits per-channel stats; IN + LeakyReLU applied as
    # XLA elementwise fused into the next layer's input relayout.
    for i in (1, 2, 3):
        x, mean, var = _conv2d_std_pallas(x, params[i], stride=_STRIDES[i],
                                          negative_slope=None, emit_stats=True)
        x = _apply_instnorm_lrelu(x, mean, var)
    # conv5: Cout=1, tap-major.
    x = _conv2d_final_pallas(x, params[4])
    return jnp.transpose(x, (0, 3, 1, 2))                            # -> NCHW


# ----------------------------------------------------------------------------
# Pure-JAX reference (same rounding points: bf16 operands / activations,
# f32 accumulation, stats from the f32 pre-activation conv output).
# ----------------------------------------------------------------------------
def _ref_forward(x_nchw, params):
    def conv(x, p, stride):
        w = jnp.transpose(p["w4"], (3, 2, 0, 1)).astype(jnp.bfloat16)  # OIHW
        y = jax.lax.conv_general_dilated(
            x.astype(jnp.bfloat16), w, (stride, stride), ((1, 1), (1, 1)),
            dimension_numbers=("NCHW", "OIHW", "NCHW"),
            preferred_element_type=jnp.float32)
        return y + p["b"][None, :, None, None]

    def lrelu(v):
        return jnp.where(v >= 0, v, _LRELU_SLOPE * v)

    def q16(v):  # bf16 storage round-trip
        return v.astype(jnp.bfloat16).astype(jnp.float32)

    y = conv(x_nchw, params[0], _STRIDES[0])
    x = q16(lrelu(y))
    for i in (1, 2, 3):
        y = conv(x, params[i], _STRIDES[i])
        m = jnp.mean(y, axis=(2, 3), keepdims=True)
        v = jnp.mean((y - m) ** 2, axis=(2, 3), keepdims=True)
        z = (q16(y) - m) * jax.lax.rsqrt(v + _IN_EPS)
        x = q16(lrelu(z))
    return conv(x, params[4], _STRIDES[4])


# ----------------------------------------------------------------------------
if __name__ == "__main__":
    key = jax.random.PRNGKey(0)
    in_channels, conv_dim = 3, 8
    x = jax.random.normal(jax.random.fold_in(key, 100),
                          (2, in_channels, 32, 32), jnp.float32)   # NCHW

    params = init_discriminator_params(key, in_channels, conv_dim)

    out = jax.block_until_ready(discriminator_forward(x, params))
    ref = jax.block_until_ready(_ref_forward(x, params))

    assert out.shape == ref.shape, (out.shape, ref.shape)
    err = float(jnp.max(jnp.abs(out - ref)))
    assert err < 1e-2, err
    print("KERNEL_OK")
</pallas_src>

<mosaic_0001>
module attributes {stable_mosaic.version = 11 : i64} {
  func.func @_conv_kernel(%arg0: i32, %arg1: i32, %arg2: memref<1x1x256x48xbf16, #tpu.memory_space<vmem>>, %arg3: memref<1x48x8xbf16, #tpu.memory_space<vmem>>, %arg4: memref<1x8xf32, #tpu.memory_space<vmem>>, %arg5: memref<1x256x8xbf16, #tpu.memory_space<vmem>>) attributes {dimension_semantics = [#tpu.dimension_semantics<parallel>, #tpu.dimension_semantics<parallel>], iteration_bounds = array<i64: 2, 1>, scalar_prefetch = 0 : i64, scratch_operands = 0 : i64, tpu.core_type = #tpu.core_type<tc>, window_params = [{transform_indices = @transform_0, window_bounds = array<i64: 1, 1, 256, 48>}, {pipeline_mode = #tpu.pipeline_mode<synchronous>, transform_indices = @transform_1, window_bounds = array<i64: 1, 48, 8>}, {pipeline_mode = #tpu.pipeline_mode<synchronous>, transform_indices = @transform_2, window_bounds = array<i64: 1, 8>}, {transform_indices = @transform_3, window_bounds = array<i64: 1, 256, 8>}]} {
    %c0 = arith.constant 0 : index
    %c0_0 = arith.constant 0 : index
    %c0_1 = arith.constant 0 : index
    %c0_2 = arith.constant 0 : index
    %0 = vector.load %arg2[%c0, %c0_0, %c0_1, %c0_2] : memref<1x1x256x48xbf16, #tpu.memory_space<vmem>>, vector<1x1x256x48xbf16>
    %1 = vector.shape_cast %0 : vector<1x1x256x48xbf16> to vector<256x48xbf16>
    %c0_3 = arith.constant 0 : index
    %c0_4 = arith.constant 0 : index
    %c0_5 = arith.constant 0 : index
    %2 = vector.load %arg3[%c0_3, %c0_4, %c0_5] : memref<1x48x8xbf16, #tpu.memory_space<vmem>>, vector<1x48x8xbf16>
    %3 = vector.shape_cast %2 : vector<1x48x8xbf16> to vector<48x8xbf16>
    %cst = arith.constant dense<0.000000e+00> : vector<256x8xf32>
    %4 = tpu.matmul %1, %3, %cst {dimension_numbers = #tpu.dot_dimension_numbers<[1], [0], [0], [1], [0, 0, 1, 1], [], []>} : vector<256x48xbf16>, vector<48x8xbf16>, vector<256x8xf32> -> vector<256x8xf32>
    %c0_6 = arith.constant 0 : index
    %c0_7 = arith.constant 0 : index
    %5 = vector.load %arg4[%c0_6, %c0_7] : memref<1x8xf32, #tpu.memory_space<vmem>>, vector<1x8xf32>
    %6 = vector.broadcast %5 : vector<1x8xf32> to vector<256x8xf32>
    %7 = arith.addf %4, %6 : vector<256x8xf32>
    %cst_8 = arith.constant 0.000000e+00 : f32
    %8 = vector.broadcast %cst_8 : f32 to vector<256x8xf32>
    %9 = arith.cmpf oge, %7, %8 : vector<256x8xf32>
    %cst_9 = arith.constant 2.000000e-01 : f32
    %10 = vector.broadcast %cst_9 : f32 to vector<256x8xf32>
    %11 = arith.mulf %10, %7 : vector<256x8xf32>
    %12 = arith.select %9, %7, %11 : vector<256x8xi1>, vector<256x8xf32>
    %13 = arith.truncf %12 : vector<256x8xf32> to vector<256x8xbf16>
    %c0_10 = arith.constant 0 : index
    %c0_11 = arith.constant 0 : index
    %c0_12 = arith.constant 0 : index
    %14 = vector.load %arg5[%c0_10, %c0_11, %c0_12] : memref<1x256x8xbf16, #tpu.memory_space<vmem>>, vector<1x256x8xbf16>
    %15 = vector.shape_cast %14 : vector<1x256x8xbf16> to vector<256x8xbf16>
    %16 = vector.shape_cast %13 : vector<256x8xbf16> to vector<1x256x8xbf16>
    tpu.vector_store %arg5[%c0_10, %c0_11, %c0_12], %16 {strides = array<i32>} : memref<1x256x8xbf16, #tpu.memory_space<vmem>>, vector<1x256x8xbf16>,
    return
  }
  func.func @transform_0(%arg0: i32, %arg1: i32) -> (i32, i32, i32, i32) {
    %c0_i32 = arith.constant 0 : i32
    %c0_i32_0 = arith.constant 0 : i32
    %c0_i32_1 = arith.constant 0 : i32
    return %arg0, %c0_i32, %arg1, %c0_i32_0 : i32, i32, i32, i32
  }
  func.func @transform_1(%arg0: i32, %arg1: i32) -> (i32, i32, i32) {
    %c0_i32 = arith.constant 0 : i32
    %c0_i32_0 = arith.constant 0 : i32
    %c0_i32_1 = arith.constant 0 : i32
    %c0_i32_2 = arith.constant 0 : i32
    return %c0_i32, %c0_i32_0, %c0_i32_1 : i32, i32, i32
  }
  func.func @transform_2(%arg0: i32, %arg1: i32) -> (i32, i32) {
    %c0_i32 = arith.constant 0 : i32
    %c0_i32_0 = arith.constant 0 : i32
    %c0_i32_1 = arith.constant 0 : i32
    return %c0_i32, %c0_i32_0 : i32, i32
  }
  func.func @transform_3(%arg0: i32, %arg1: i32) -> (i32, i32, i32) {
    %c0_i32 = arith.constant 0 : i32
    %c0_i32_0 = arith.constant 0 : i32
    return %arg0, %arg1, %c0_i32 : i32, i32, i32
  }
}

module attributes {stable_mosaic.version = 11 : i64} {
  func.func @_conv_kernel(%arg0: i32, %arg1: i32, %arg2: memref<1x1x64x128xbf16, #tpu.memory_space<vmem>>, %arg3: memref<1x128x16xbf16, #tpu.memory_space<vmem>>, %arg4: memref<1x16xf32, #tpu.memory_space<vmem>>, %arg5: memref<1x64x1xf32, #tpu.memory_space<vmem>>, %arg6: memref<1x64x16xbf16, #tpu.memory_space<vmem>>, %arg7: memref<1x1x8x16xf32, #tpu.memory_space<vmem>>, %arg8: memref<1x1x8x16xf32, #tpu.memory_space<vmem>>) attributes {dimension_semantics = [#tpu.dimension_semantics<parallel>, #tpu.dimension_semantics<parallel>], iteration_bounds = array<i64: 2, 1>, scalar_prefetch = 0 : i64, scratch_operands = 0 : i64, tpu.core_type = #tpu.core_type<tc>, window_params = [{transform_indices = @transform_0, window_bounds = array<i64: 1, 1, 64, 128>}, {pipeline_mode = #tpu.pipeline_mode<synchronous>, transform_indices = @transform_1, window_bounds = array<i64: 1, 128, 16>}, {pipeline_mode = #tpu.pipeline_mode<synchronous>, transform_indices = @transform_2, window_bounds = array<i64: 1, 16>}, {transform_indices = @transform_3, window_bounds = array<i64: 1, 64, 1>}, {transform_indices = @transform_4, window_bounds = array<i64: 1, 64, 16>}, {transform_indices = @transform_5, window_bounds = array<i64: 1, 1, 8, 16>}, {transform_indices = @transform_6, window_bounds = array<i64: 1, 1, 8, 16>}]} {
    %c0 = arith.constant 0 : index
    %c0_0 = arith.constant 0 : index
    %c0_1 = arith.constant 0 : index
    %c0_2 = arith.constant 0 : index
    %0 = vector.load %arg2[%c0, %c0_0, %c0_1, %c0_2] : memref<1x1x64x128xbf16, #tpu.memory_space<vmem>>, vector<1x1x64x128xbf16>
    %1 = vector.shape_cast %0 : vector<1x1x64x128xbf16> to vector<64x128xbf16>
    %c0_3 = arith.constant 0 : index
    %c0_4 = arith.constant 0 : index
    %c0_5 = arith.constant 0 : index
    %2 = vector.load %arg3[%c0_3, %c0_4, %c0_5] : memref<1x128x16xbf16, #tpu.memory_space<vmem>>, vector<1x128x16xbf16>
    %3 = vector.shape_cast %2 : vector<1x128x16xbf16> to vector<128x16xbf16>
    %cst = arith.constant dense<0.000000e+00> : vector<64x16xf32>
    %4 = tpu.matmul %1, %3, %cst {dimension_numbers = #tpu.dot_dimension_numbers<[1], [0], [0], [1], [0, 0, 1, 1], [], []>} : vector<64x128xbf16>, vector<128x16xbf16>, vector<64x16xf32> -> vector<64x16xf32>
    %c0_6 = arith.constant 0 : index
    %c0_7 = arith.constant 0 : index
    %5 = vector.load %arg4[%c0_6, %c0_7] : memref<1x16xf32, #tpu.memory_space<vmem>>, vector<1x16xf32>
    %6 = vector.broadcast %5 : vector<1x16xf32> to vector<64x16xf32>
    %7 = arith.addf %4, %6 : vector<64x16xf32>
    %c0_8 = arith.constant 0 : index
    %c0_9 = arith.constant 0 : index
    %c0_10 = arith.constant 0 : index
    %8 = vector.load %arg5[%c0_8, %c0_9, %c0_10] : memref<1x64x1xf32, #tpu.memory_space<vmem>>, vector<1x64x1xf32>
    %9 = vector.shape_cast %8 : vector<1x64x1xf32> to vector<64x1xf32>
    %10 = vector.broadcast %9 : vector<64x1xf32> to vector<64x16xf32>
    %11 = arith.mulf %7, %10 : vector<64x16xf32>
    %cst_11 = arith.constant dense<0.000000e+00> : vector<16xf32>
    %12 = vector.multi_reduction <add>, %11, %cst_11 [0] : vector<64x16xf32> to vector<16xf32>
    %13 = vector.shape_cast %12 : vector<16xf32> to vector<1x16xf32>
    %14 = arith.mulf %11, %7 : vector<64x16xf32>
    %cst_12 = arith.constant dense<0.000000e+00> : vector<16xf32>
    %15 = vector.multi_reduction <add>, %14, %cst_12 [0] : vector<64x16xf32> to vector<16xf32>
    %16 = vector.shape_cast %15 : vector<16xf32> to vector<1x16xf32>
    %17 = vector.shape_cast %13 : vector<1x16xf32> to vector<1x16xf32>
    %18 = vector.broadcast %17 : vector<1x16xf32> to vector<8x16xf32>
    %c0_13 = arith.constant 0 : index
    %c0_14 = arith.constant 0 : index
    %c0_15 = arith.constant 0 : index
    %c0_16 = arith.constant 0 : index
    %19 = vector.load %arg7[%c0_13, %c0_14, %c0_15, %c0_16] : memref<1x1x8x16xf32, #tpu.memory_space<vmem>>, vector<1x1x8x16xf32>
    %20 = vector.shape_cast %19 : vector<1x1x8x16xf32> to vector<8x16xf32>
    %21 = vector.shape_cast %18 : vector<8x16xf32> to vector<1x1x8x16xf32>
    tpu.vector_store %arg7[%c0_13, %c0_14, %c0_15, %c0_16], %21 {strides = array<i32>} : memref<1x1x8x16xf32, #tpu.memory_space<vmem>>, vector<1x1x8x16xf32>,
    %22 = vector.shape_cast %16 : vector<1x16xf32> to vector<1x16xf32>
    %23 = vector.broadcast %22 : vector<1x16xf32> to vector<8x16xf32>
    %c0_17 = arith.constant 0 : index
    %c0_18 = arith.constant 0 : index
    %c0_19 = arith.constant 0 : index
    %c0_20 = arith.constant 0 : index
    %24 = vector.load %arg8[%c0_17, %c0_18, %c0_19, %c0_20] : memref<1x1x8x16xf32, #tpu.memory_space<vmem>>, vector<1x1x8x16xf32>
    %25 = vector.shape_cast %24 : vector<1x1x8x16xf32> to vector<8x16xf32>
    %26 = vector.shape_cast %23 : vector<8x16xf32> to vector<1x1x8x16xf32>
    tpu.vector_store %arg8[%c0_17, %c0_18, %c0_19, %c0_20], %26 {strides = array<i32>} : memref<1x1x8x16xf32, #tpu.memory_space<vmem>>, vector<1x1x8x16xf32>,
    %27 = arith.truncf %7 : vector<64x16xf32> to vector<64x16xbf16>
    %c0_21 = arith.constant 0 : index
    %c0_22 = arith.constant 0 : index
    %c0_23 = arith.constant 0 : index
    %28 = vector.load %arg6[%c0_21, %c0_22, %c0_23] : memref<1x64x16xbf16, #tpu.memory_space<vmem>>, vector<1x64x16xbf16>
    %29 = vector.shape_cast %28 : vector<1x64x16xbf16> to vector<64x16xbf16>
    %30 = vector.shape_cast %27 : vector<64x16xbf16> to vector<1x64x16xbf16>
    tpu.vector_store %arg6[%c0_21, %c0_22, %c0_23], %30 {strides = array<i32>} : memref<1x64x16xbf16, #tpu.memory_space<vmem>>, vector<1x64x16xbf16>,
    return
  }
  func.func @transform_0(%arg0: i32, %arg1: i32) -> (i32, i32, i32, i32) {
    %c0_i32 = arith.constant 0 : i32
    %c0_i32_0 = arith.constant 0 : i32
    %c0_i32_1 = arith.constant 0 : i32
    return %arg0, %c0_i32, %arg1, %c0_i32_0 : i32, i32, i32, i32
  }
  func.func @transform_1(%arg0: i32, %arg1: i32) -> (i32, i32, i32) {
    %c0_i32 = arith.constant 0 : i32
    %c0_i32_0 = arith.constant 0 : i32
    %c0_i32_1 = arith.constant 0 : i32
    %c0_i32_2 = arith.constant 0 : i32
    return %c0_i32, %c0_i32_0, %c0_i32_1 : i32, i32, i32
  }
  func.func @transform_2(%arg0: i32, %arg1: i32) -> (i32, i32) {
    %c0_i32 = arith.constant 0 : i32
    %c0_i32_0 = arith.constant 0 : i32
    %c0_i32_1 = arith.constant 0 : i32
    return %c0_i32, %c0_i32_0 : i32, i32
  }
  func.func @transform_3(%arg0: i32, %arg1: i32) -> (i32, i32, i32) {
    %c0_i32 = arith.constant 0 : i32
    %c0_i32_0 = arith.constant 0 : i32
    %c0_i32_1 = arith.constant 0 : i32
    return %arg1, %c0_i32, %c0_i32_0 : i32, i32, i32
  }
  func.func @transform_4(%arg0: i32, %arg1: i32) -> (i32, i32, i32) {
    %c0_i32 = arith.constant 0 : i32
    %c0_i32_0 = arith.constant 0 : i32
    return %arg0, %arg1, %c0_i32 : i32, i32, i32
  }
  func.func @transform_5(%arg0: i32, %arg1: i32) -> (i32, i32, i32, i32) {
    %c0_i32 = arith.constant 0 : i32
    %c0_i32_0 = arith.constant 0 : i32
    %c0_i32_1 = arith.constant 0 : i32
    return %arg0, %arg1, %c0_i32, %c0_i32_0 : i32, i32, i32, i32
  }
  func.func @transform_6(%arg0: i32, %arg1: i32) -> (i32, i32, i32, i32) {
    %c0_i32 = arith.constant 0 : i32
    %c0_i32_0 = arith.constant 0 : i32
    %c0_i32_1 = arith.constant 0 : i32
    return %arg0, %arg1, %c0_i32, %c0_i32_0 : i32, i32, i32, i32
  }
}

module attributes {stable_mosaic.version = 11 : i64} {
  func.func @_conv_kernel(%arg0: i32, %arg1: i32, %arg2: memref<1x4x40x16xf32, #tpu.memory_space<vmem>>, %arg3: memref<16x16x32xbf16, #tpu.memory_space<vmem>>, %arg4: memref<1x32xf32, #tpu.memory_space<vmem>>, %arg5: memref<1x32x1xf32, #tpu.memory_space<vmem>>, %arg6: memref<1x32x32xbf16, #tpu.memory_space<vmem>>, %arg7: memref<1x1x8x32xf32, #tpu.memory_space<vmem>>, %arg8: memref<1x1x8x32xf32, #tpu.memory_space<vmem>>) attributes {dimension_semantics = [#tpu.dimension_semantics<parallel>, #tpu.dimension_semantics<parallel>], iteration_bounds = array<i64: 2, 1>, scalar_prefetch = 0 : i64, scratch_operands = 0 : i64, tpu.core_type = #tpu.core_type<tc>, window_params = [{transform_indices = @transform_0, window_bounds = array<i64: 1, 4, 40, 16>}, {pipeline_mode = #tpu.pipeline_mode<synchronous>, transform_indices = @transform_1, window_bounds = array<i64: 16, 16, 32>}, {pipeline_mode = #tpu.pipeline_mode<synchronous>, transform_indices = @transform_2, window_bounds = array<i64: 1, 32>}, {transform_indices = @transform_3, window_bounds = array<i64: 1, 32, 1>}, {transform_indices = @transform_4, window_bounds = array<i64: 1, 32, 32>}, {transform_indices = @transform_5, window_bounds = array<i64: 1, 1, 8, 32>}, {transform_indices = @transform_6, window_bounds = array<i64: 1, 1, 8, 32>}]} {
    %c32_i32 = arith.constant 32 : i32
    %0 = arith.muli %arg1, %c32_i32 : i32
    %1 = tpu.assume_multiple %0, 16 : i32
    %cst = arith.constant 0.000000e+00 : f32
    %2 = vector.broadcast %cst : f32 to vector<32x32xf32>
    %c0_i32 = arith.constant 0 : i32
    %3 = arith.addi %1, %c0_i32 : i32
    %c0 = arith.constant 0 : index
    %c0_0 = arith.constant 0 : index
    %4 = arith.index_cast %3 : i32 to index
    %c0_1 = arith.constant 0 : index
    %5 = vector.load %arg2[%c0, %c0_0, %4, %c0_1] : memref<1x4x40x16xf32, #tpu.memory_space<vmem>>, vector<1x1x32x16xf32>
    %6 = vector.shape_cast %5 : vector<1x1x32x16xf32> to vector<32x16xf32>
    %7 = arith.truncf %6 : vector<32x16xf32> to vector<32x16xbf16>
    %c0_2 = arith.constant 0 : index
    %c0_3 = arith.constant 0 : index
    %c0_4 = arith.constant 0 : index
    %8 = vector.load %arg3[%c0_2, %c0_3, %c0_4] : memref<16x16x32xbf16, #tpu.memory_space<vmem>>, vector<1x16x32xbf16>
    %9 = vector.shape_cast %8 : vector<1x16x32xbf16> to vector<16x32xbf16>
    %cst_5 = arith.constant dense<0.000000e+00> : vector<32x32xf32>
    %10 = tpu.matmul %7, %9, %cst_5 {dimension_numbers = #tpu.dot_dimension_numbers<[1], [0], [0], [1], [0, 0, 1, 1], [], []>} : vector<32x16xbf16>, vector<16x32xbf16>, vector<32x32xf32> -> vector<32x32xf32>
    %11 = arith.addf %2, %10 : vector<32x32xf32>
    %c0_i32_6 = arith.constant 0 : i32
    %12 = arith.addi %1, %c0_i32_6 : i32
    %c0_7 = arith.constant 0 : index
    %c1 = arith.constant 1 : index
    %13 = arith.index_cast %12 : i32 to index
    %c0_8 = arith.constant 0 : index
    %14 = vector.load %arg2[%c0_7, %c1, %13, %c0_8] : memref<1x4x40x16xf32, #tpu.memory_space<vmem>>, vector<1x1x32x16xf32>
    %15 = vector.shape_cast %14 : vector<1x1x32x16xf32> to vector<32x16xf32>
    %16 = arith.truncf %15 : vector<32x16xf32> to vector<32x16xbf16>
    %c1_9 = arith.constant 1 : index
    %c0_10 = arith.constant 0 : index
    %c0_11 = arith.constant 0 : index
    %17 = vector.load %arg3[%c1_9, %c0_10, %c0_11] : memref<16x16x32xbf16, #tpu.memory_space<vmem>>, vector<1x16x32xbf16>
    %18 = vector.shape_cast %17 : vector<1x16x32xbf16> to vector<16x32xbf16>
    %cst_12 = arith.constant dense<0.000000e+00> : vector<32x32xf32>
    %19 = tpu.matmul %16, %18, %cst_12 {dimension_numbers = #tpu.dot_dimension_numbers<[1], [0], [0], [1], [0, 0, 1, 1], [], []>} : vector<32x16xbf16>, vector<16x32xbf16>, vector<32x32xf32> -> vector<32x32xf32>
    %20 = arith.addf %11, %19 : vector<32x32xf32>
    %c1_i32 = arith.constant 1 : i32
    %21 = arith.addi %1, %c1_i32 : i32
    %c0_13 = arith.constant 0 : index
    %c0_14 = arith.constant 0 : index
    %22 = arith.index_cast %21 : i32 to index
    %c0_15 = arith.constant 0 : index
    %23 = vector.load %arg2[%c0_13, %c0_14, %22, %c0_15] : memref<1x4x40x16xf32, #tpu.memory_space<vmem>>, vector<1x1x32x16xf32>
    %24 = vector.shape_cast %23 : vector<1x1x32x16xf32> to vector<32x16xf32>
    %25 = arith.truncf %24 : vector<32x16xf32> to vector<32x16xbf16>
    %c2 = arith.constant 2 : index
    %c0_16 = arith.constant 0 : index
    %c0_17 = arith.constant 0 : index
    %26 = vector.load %arg3[%c2, %c0_16, %c0_17] : memref<16x16x32xbf16, #tpu.memory_space<vmem>>, vector<1x16x32xbf16>
    %27 = vector.shape_cast %26 : vector<1x16x32xbf16> to vector<16x32xbf16>
    %cst_18 = arith.constant dense<0.000000e+00> : vector<32x32xf32>
    %28 = tpu.matmul %25, %27, %cst_18 {dimension_numbers = #tpu.dot_dimension_numbers<[1], [0], [0], [1], [0, 0, 1, 1], [], []>} : vector<32x16xbf16>, vector<16x32xbf16>, vector<32x32xf32> -> vector<32x32xf32>
    %29 = arith.addf %20, %28 : vector<32x32xf32>
    %c1_i32_19 = arith.constant 1 : i32
    %30 = arith.addi %1, %c1_i32_19 : i32
    %c0_20 = arith.constant 0 : index
    %c1_21 = arith.constant 1 : index
    %31 = arith.index_cast %30 : i32 to index
    %c0_22 = arith.constant 0 : index
    %32 = vector.load %arg2[%c0_20, %c1_21, %31, %c0_22] : memref<1x4x40x16xf32, #tpu.memory_space<vmem>>, vector<1x1x32x16xf32>
    %33 = vector.shape_cast %32 : vector<1x1x32x16xf32> to vector<32x16xf32>
    %34 = arith.truncf %33 : vector<32x16xf32> to vector<32x16xbf16>
    %c3 = arith.constant 3 : index
    %c0_23 = arith.constant 0 : index
    %c0_24 = arith.constant 0 : index
    %35 = vector.load %arg3[%c3, %c0_23, %c0_24] : memref<16x16x32xbf16, #tpu.memory_space<vmem>>, vector<1x16x32xbf16>
    %36 = vector.shape_cast %35 : vector<1x16x32xbf16> to vector<16x32xbf16>
    %cst_25 = arith.constant dense<0.000000e+00> : vector<32x32xf32>
    %37 = tpu.matmul %34, %36, %cst_25 {dimension_numbers = #tpu.dot_dimension_numbers<[1], [0], [0], [1], [0, 0, 1, 1], [], []>} : vector<32x16xbf16>, vector<16x32xbf16>, vector<32x32xf32> -> vector<32x32xf32>
    %38 = arith.addf %29, %37 : vector<32x32xf32>
    %c0_i32_26 = arith.constant 0 : i32
    %39 = arith.addi %1, %c0_i32_26 : i32
    %c0_27 = arith.constant 0 : index
    %c2_28 = arith.constant 2 : index
    %40 = arith.index_cast %39 : i32 to index
    %c0_29 = arith.constant 0 : index
    %41 = vector.load %arg2[%c0_27, %c2_28, %40, %c0_29] : memref<1x4x40x16xf32, #tpu.memory_space<vmem>>, vector<1x1x32x16xf32>
    %42 = vector.shape_cast %41 : vector<1x1x32x16xf32> to vector<32x16xf32>
    %43 = arith.truncf %42 : vector<32x16xf32> to vector<32x16xbf16>
    %c4 = arith.constant 4 : index
    %c0_30 = arith.constant 0 : index
    %c0_31 = arith.constant 0 : index
    %44 = vector.load %arg3[%c4, %c0_30, %c0_31] : memref<16x16x32xbf16, #tpu.memory_space<vmem>>, vector<1x16x32xbf16>
    %45 = vector.shape_cast %44 : vector<1x16x32xbf16> to vector<16x32xbf16>
    %cst_32 = arith.constant dense<0.000000e+00> : vector<32x32xf32>
    %46 = tpu.matmul %43, %45, %cst_32 {dimension_numbers = #tpu.dot_dimension_numbers<[1], [0], [0], [1], [0, 0, 1, 1], [], []>} : vector<32x16xbf16>, vector<16x32xbf16>, vector<32x32xf32> -> vector<32x32xf32>
    %47 = arith.addf %38, %46 : vector<32x32xf32>
    %c0_i32_33 = arith.constant 0 : i32
    %48 = arith.addi %1, %c0_i32_33 : i32
    %c0_34 = arith.constant 0 : index
    %c3_35 = arith.constant 3 : index
    %49 = arith.index_cast %48 : i32 to index
    %c0_36 = arith.constant 0 : index
    %50 = vector.load %arg2[%c0_34, %c3_35, %49, %c0_36] : memref<1x4x40x16xf32, #tpu.memory_space<vmem>>, vector<1x1x32x16xf32>
    %51 = vector.shape_cast %50 : vector<1x1x32x16xf32> to vector<32x16xf32>
    %52 = arith.truncf %51 : vector<32x16xf32> to vector<32x16xbf16>
    %c5 = arith.constant 5 : index
    %c0_37 = arith.constant 0 : index
    %c0_38 = arith.constant 0 : index
    %53 = vector.load %arg3[%c5, %c0_37, %c0_38] : memref<16x16x32xbf16, #tpu.memory_space<vmem>>, vector<1x16x32xbf16>
    %54 = vector.shape_cast %53 : vector<1x16x32xbf16> to vector<16x32xbf16>
    %cst_39 = arith.constant dense<0.000000e+00> : vector<32x32xf32>
    %55 = tpu.matmul %52, %54, %cst_39 {dimension_numbers = #tpu.dot_dimension_numbers<[1], [0], [0], [1], [0, 0, 1, 1], [], []>} : vector<32x16xbf16>, vector<16x32xbf16>, vector<32x32xf32> -> vector<32x32xf32>
    %56 = arith.addf %47, %55 : vector<32x32xf32>
    %c1_i32_40 = arith.constant 1 : i32
    %57 = arith.addi %1, %c1_i32_40 : i32
    %c0_41 = arith.constant 0 : index
    %c2_42 = arith.constant 2 : index
    %58 = arith.index_cast %57 : i32 to index
    %c0_43 = arith.constant 0 : index
    %59 = vector.load %arg2[%c0_41, %c2_42, %58, %c0_43] : memref<1x4x40x16xf32, #tpu.memory_space<vmem>>, vector<1x1x32x16xf32>
    %60 = vector.shape_cast %59 : vector<1x1x32x16xf32> to vector<32x16xf32>
    %61 = arith.truncf %60 : vector<32x16xf32> to vector<32x16xbf16>
    %c6 = arith.constant 6 : index
    %c0_44 = arith.constant 0 : index
    %c0_45 = arith.constant 0 : index
    %62 = vector.load %arg3[%c6, %c0_44, %c0_45] : memref<16x16x32xbf16, #tpu.memory_space<vmem>>, vector<1x16x32xbf16>
    %63 = vector.shape_cast %62 : vector<1x16x32xbf16> to vector<16x32xbf16>
    %cst_46 = arith.constant dense<0.000000e+00> : vector<32x32xf32>
    %64 = tpu.matmul %61, %63, %cst_46 {dimension_numbers = #tpu.dot_dimension_numbers<[1], [0], [0], [1], [0, 0, 1, 1], [], []>} : vector<32x16xbf16>, vector<16x32xbf16>, vector<32x32xf32> -> vector<32x32xf32>
    %65 = arith.addf %56, %64 : vector<32x32xf32>
    %c1_i32_47 = arith.constant 1 : i32
    %66 = arith.addi %1, %c1_i32_47 : i32
    %c0_48 = arith.constant 0 : index
    %c3_49 = arith.constant 3 : index
    %67 = arith.index_cast %66 : i32 to index
    %c0_50 = arith.constant 0 : index
    %68 = vector.load %arg2[%c0_48, %c3_49, %67, %c0_50] : memref<1x4x40x16xf32, #tpu.memory_space<vmem>>, vector<1x1x32x16xf32>
    %69 = vector.shape_cast %68 : vector<1x1x32x16xf32> to vector<32x16xf32>
    %70 = arith.truncf %69 : vector<32x16xf32> to vector<32x16xbf16>
    %c7 = arith.constant 7 : index
    %c0_51 = arith.constant 0 : index
    %c0_52 = arith.constant 0 : index
    %71 = vector.load %arg3[%c7, %c0_51, %c0_52] : memref<16x16x32xbf16, #tpu.memory_space<vmem>>, vector<1x16x32xbf16>
    %72 = vector.shape_cast %71 : vector<1x16x32xbf16> to vector<16x32xbf16>
    %cst_53 = arith.constant dense<0.000000e+00> : vector<32x32xf32>
    %73 = tpu.matmul %70, %72, %cst_53 {dimension_numbers = #tpu.dot_dimension_numbers<[1], [0], [0], [1], [0, 0, 1, 1], [], []>} : vector<32x16xbf16>, vector<16x32xbf16>, vector<32x32xf32> -> vector<32x32xf32>
    %74 = arith.addf %65, %73 : vector<32x32xf32>
    %c5_i32 = arith.constant 5 : i32
    %75 = arith.addi %1, %c5_i32 : i32
    %c0_54 = arith.constant 0 : index
    %c0_55 = arith.constant 0 : index
    %76 = arith.index_cast %75 : i32 to index
    %c0_56 = arith.constant 0 : index
    %77 = vector.load %arg2[%c0_54, %c0_55, %76, %c0_56] : memref<1x4x40x16xf32, #tpu.memory_space<vmem>>, vector<1x1x32x16xf32>
    %78 = vector.shape_cast %77 : vector<1x1x32x16xf32> to vector<32x16xf32>
    %79 = arith.truncf %78 : vector<32x16xf32> to vector<32x16xbf16>
    %c8 = arith.constant 8 : index
    %c0_57 = arith.constant 0 : index
    %c0_58 = arith.constant 0 : index
    %80 = vector.load %arg3[%c8, %c0_57, %c0_58] : memref<16x16x32xbf16, #tpu.memory_space<vmem>>, vector<1x16x32xbf16>
    %81 = vector.shape_cast %80 : vector<1x16x32xbf16> to vector<16x32xbf16>
    %cst_59 = arith.constant dense<0.000000e+00> : vector<32x32xf32>
    %82 = tpu.matmul %79, %81, %cst_59 {dimension_numbers = #tpu.dot_dimension_numbers<[1], [0], [0], [1], [0, 0, 1, 1], [], []>} : vector<32x16xbf16>, vector<16x32xbf16>, vector<32x32xf32> -> vector<32x32xf32>
    %83 = arith.addf %74, %82 : vector<32x32xf32>
    %c5_i32_60 = arith.constant 5 : i32
    %84 = arith.addi %1, %c5_i32_60 : i32
    %c0_61 = arith.constant 0 : index
    %c1_62 = arith.constant 1 : index
    %85 = arith.index_cast %84 : i32 to index
    %c0_63 = arith.constant 0 : index
    %86 = vector.load %arg2[%c0_61, %c1_62, %85, %c0_63] : memref<1x4x40x16xf32, #tpu.memory_space<vmem>>, vector<1x1x32x16xf32>
    %87 = vector.shape_cast %86 : vector<1x1x32x16xf32> to vector<32x16xf32>
    %88 = arith.truncf %87 : vector<32x16xf32> to vector<32x16xbf16>
    %c9 = arith.constant 9 : index
    %c0_64 = arith.constant 0 : index
    %c0_65 = arith.constant 0 : index
    %89 = vector.load %arg3[%c9, %c0_64, %c0_65] : memref<16x16x32xbf16, #tpu.memory_space<vmem>>, vector<1x16x32xbf16>
    %90 = vector.shape_cast %89 : vector<1x16x32xbf16> to vector<16x32xbf16>
    %cst_66 = arith.constant dense<0.000000e+00> : vector<32x32xf32>
    %91 = tpu.matmul %88, %90, %cst_66 {dimension_numbers = #tpu.dot_dimension_numbers<[1], [0], [0], [1], [0, 0, 1, 1], [], []>} : vector<32x16xbf16>, vector<16x32xbf16>, vector<32x32xf32> -> vector<32x32xf32>
    %92 = arith.addf %83, %91 : vector<32x32xf32>
    %c6_i32 = arith.constant 6 : i32
    %93 = arith.addi %1, %c6_i32 : i32
    %c0_67 = arith.constant 0 : index
    %c0_68 = arith.constant 0 : index
    %94 = arith.index_cast %93 : i32 to index
    %c0_69 = arith.constant 0 : index
    %95 = vector.load %arg2[%c0_67, %c0_68, %94, %c0_69] : memref<1x4x40x16xf32, #tpu.memory_space<vmem>>, vector<1x1x32x16xf32>
    %96 = vector.shape_cast %95 : vector<1x1x32x16xf32> to vector<32x16xf32>
    %97 = arith.truncf %96 : vector<32x16xf32> to vector<32x16xbf16>
    %c10 = arith.constant 10 : index
    %c0_70 = arith.constant 0 : index
    %c0_71 = arith.constant 0 : index
    %98 = vector.load %arg3[%c10, %c0_70, %c0_71] : memref<16x16x32xbf16, #tpu.memory_space<vmem>>, vector<1x16x32xbf16>
    %99 = vector.shape_cast %98 : vector<1x16x32xbf16> to vector<16x32xbf16>
    %cst_72 = arith.constant dense<0.000000e+00> : vector<32x32xf32>
    %100 = tpu.matmul %97, %99, %cst_72 {dimension_numbers = #tpu.dot_dimension_numbers<[1], [0], [0], [1], [0, 0, 1, 1], [], []>} : vector<32x16xbf16>, vector<16x32xbf16>, vector<32x32xf32> -> vector<32x32xf32>
    %101 = arith.addf %92, %100 : vector<32x32xf32>
    %c6_i32_73 = arith.constant 6 : i32
    %102 = arith.addi %1, %c6_i32_73 : i32
    %c0_74 = arith.constant 0 : index
    %c1_75 = arith.constant 1 : index
    %103 = arith.index_cast %102 : i32 to index
    %c0_76 = arith.constant 0 : index
    %104 = vector.load %arg2[%c0_74, %c1_75, %103, %c0_76] : memref<1x4x40x16xf32, #tpu.memory_space<vmem>>, vector<1x1x32x16xf32>
    %105 = vector.shape_cast %104 : vector<1x1x32x16xf32> to vector<32x16xf32>
    %106 = arith.truncf %105 : vector<32x16xf32> to vector<32x16xbf16>
    %c11 = arith.constant 11 : index
    %c0_77 = arith.constant 0 : index
    %c0_78 = arith.constant 0 : index
    %107 = vector.load %arg3[%c11, %c0_77, %c0_78] : memref<16x16x32xbf16, #tpu.memory_space<vmem>>, vector<1x16x32xbf16>
    %108 = vector.shape_cast %107 : vector<1x16x32xbf16> to vector<16x32xbf16>
    %cst_79 = arith.constant dense<0.000000e+00> : vector<32x32xf32>
    %109 = tpu.matmul %106, %108, %cst_79 {dimension_numbers = #tpu.dot_dimension_numbers<[1], [0], [0], [1], [0, 0, 1, 1], [], []>} : vector<32x16xbf16>, vector<16x32xbf16>, vector<32x32xf32> -> vector<32x32xf32>
    %110 = arith.addf %101, %109 : vector<32x32xf32>
    %c5_i32_80 = arith.constant 5 : i32
    %111 = arith.addi %1, %c5_i32_80 : i32
    %c0_81 = arith.constant 0 : index
    %c2_82 = arith.constant 2 : index
    %112 = arith.index_cast %111 : i32 to index
    %c0_83 = arith.constant 0 : index
    %113 = vector.load %arg2[%c0_81, %c2_82, %112, %c0_83] : memref<1x4x40x16xf32, #tpu.memory_space<vmem>>, vector<1x1x32x16xf32>
    %114 = vector.shape_cast %113 : vector<1x1x32x16xf32> to vector<32x16xf32>
    %115 = arith.truncf %114 : vector<32x16xf32> to vector<32x16xbf16>
    %c12 = arith.constant 12 : index
    %c0_84 = arith.constant 0 : index
    %c0_85 = arith.constant 0 : index
    %116 = vector.load %arg3[%c12, %c0_84, %c0_85] : memref<16x16x32xbf16, #tpu.memory_space<vmem>>, vector<1x16x32xbf16>
    %117 = vector.shape_cast %116 : vector<1x16x32xbf16> to vector<16x32xbf16>
    %cst_86 = arith.constant dense<0.000000e+00> : vector<32x32xf32>
    %118 = tpu.matmul %115, %117, %cst_86 {dimension_numbers = #tpu.dot_dimension_numbers<[1], [0], [0], [1], [0, 0, 1, 1], [], []>} : vector<32x16xbf16>, vector<16x32xbf16>, vector<32x32xf32> -> vector<32x32xf32>
    %119 = arith.addf %110, %118 : vector<32x32xf32>
    %c5_i32_87 = arith.constant 5 : i32
    %120 = arith.addi %1, %c5_i32_87 : i32
    %c0_88 = arith.constant 0 : index
    %c3_89 = arith.constant 3 : index
    %121 = arith.index_cast %120 : i32 to index
    %c0_90 = arith.constant 0 : index
    %122 = vector.load %arg2[%c0_88, %c3_89, %121, %c0_90] : memref<1x4x40x16xf32, #tpu.memory_space<vmem>>, vector<1x1x32x16xf32>
    %123 = vector.shape_cast %122 : vector<1x1x32x16xf32> to vector<32x16xf32>
    %124 = arith.truncf %123 : vector<32x16xf32> to vector<32x16xbf16>
    %c13 = arith.constant 13 : index
    %c0_91 = arith.constant 0 : index
    %c0_92 = arith.constant 0 : index
    %125 = vector.load %arg3[%c13, %c0_91, %c0_92] : memref<16x16x32xbf16, #tpu.memory_space<vmem>>, vector<1x16x32xbf16>
    %126 = vector.shape_cast %125 : vector<1x16x32xbf16> to vector<16x32xbf16>
    %cst_93 = arith.constant dense<0.000000e+00> : vector<32x32xf32>
    %127 = tpu.matmul %124, %126, %cst_93 {dimension_numbers = #tpu.dot_dimension_numbers<[1], [0], [0], [1], [0, 0, 1, 1], [], []>} : vector<32x16xbf16>, vector<16x32xbf16>, vector<32x32xf32> -> vector<32x32xf32>
    %128 = arith.addf %119, %127 : vector<32x32xf32>
    %c6_i32_94 = arith.constant 6 : i32
    %129 = arith.addi %1, %c6_i32_94 : i32
    %c0_95 = arith.constant 0 : index
    %c2_96 = arith.constant 2 : index
    %130 = arith.index_cast %129 : i32 to index
    %c0_97 = arith.constant 0 : index
    %131 = vector.load %arg2[%c0_95, %c2_96, %130, %c0_97] : memref<1x4x40x16xf32, #tpu.memory_space<vmem>>, vector<1x1x32x16xf32>
    %132 = vector.shape_cast %131 : vector<1x1x32x16xf32> to vector<32x16xf32>
    %133 = arith.truncf %132 : vector<32x16xf32> to vector<32x16xbf16>
    %c14 = arith.constant 14 : index
    %c0_98 = arith.constant 0 : index
    %c0_99 = arith.constant 0 : index
    %134 = vector.load %arg3[%c14, %c0_98, %c0_99] : memref<16x16x32xbf16, #tpu.memory_space<vmem>>, vector<1x16x32xbf16>
    %135 = vector.shape_cast %134 : vector<1x16x32xbf16> to vector<16x32xbf16>
    %cst_100 = arith.constant dense<0.000000e+00> : vector<32x32xf32>
    %136 = tpu.matmul %133, %135, %cst_100 {dimension_numbers = #tpu.dot_dimension_numbers<[1], [0], [0], [1], [0, 0, 1, 1], [], []>} : vector<32x16xbf16>, vector<16x32xbf16>, vector<32x32xf32> -> vector<32x32xf32>
    %137 = arith.addf %128, %136 : vector<32x32xf32>
    %c6_i32_101 = arith.constant 6 : i32
    %138 = arith.addi %1, %c6_i32_101 : i32
    %c0_102 = arith.constant 0 : index
    %c3_103 = arith.constant 3 : index
    %139 = arith.index_cast %138 : i32 to index
    %c0_104 = arith.constant 0 : index
    %140 = vector.load %arg2[%c0_102, %c3_103, %139, %c0_104] : memref<1x4x40x16xf32, #tpu.memory_space<vmem>>, vector<1x1x32x16xf32>
    %141 = vector.shape_cast %140 : vector<1x1x32x16xf32> to vector<32x16xf32>
    %142 = arith.truncf %141 : vector<32x16xf32> to vector<32x16xbf16>
    %c15 = arith.constant 15 : index
    %c0_105 = arith.constant 0 : index
    %c0_106 = arith.constant 0 : index
    %143 = vector.load %arg3[%c15, %c0_105, %c0_106] : memref<16x16x32xbf16, #tpu.memory_space<vmem>>, vector<1x16x32xbf16>
    %144 = vector.shape_cast %143 : vector<1x16x32xbf16> to vector<16x32xbf16>
    %cst_107 = arith.constant dense<0.000000e+00> : vector<32x32xf32>
    %145 = tpu.matmul %142, %144, %cst_107 {dimension_numbers = #tpu.dot_dimension_numbers<[1], [0], [0], [1], [0, 0, 1, 1], [], []>} : vector<32x16xbf16>, vector<16x32xbf16>, vector<32x32xf32> -> vector<32x32xf32>
    %146 = arith.addf %137, %145 : vector<32x32xf32>
    %c0_108 = arith.constant 0 : index
    %c0_109 = arith.constant 0 : index
    %147 = vector.load %arg4[%c0_108, %c0_109] : memref<1x32xf32, #tpu.memory_space<vmem>>, vector<1x32xf32>
    %148 = vector.broadcast %147 : vector<1x32xf32> to vector<32x32xf32>
    %149 = arith.addf %146, %148 : vector<32x32xf32>
    %c0_110 = arith.constant 0 : index
    %c0_111 = arith.constant 0 : index
    %c0_112 = arith.constant 0 : index
    %150 = vector.load %arg5[%c0_110, %c0_111, %c0_112] : memref<1x32x1xf32, #tpu.memory_space<vmem>>, vector<1x32x1xf32>
    %151 = vector.shape_cast %150 : vector<1x32x1xf32> to vector<32x1xf32>
    %152 = vector.broadcast %151 : vector<32x1xf32> to vector<32x32xf32>
    %153 = arith.mulf %149, %152 : vector<32x32xf32>
    %cst_113 = arith.constant dense<0.000000e+00> : vector<32xf32>
    %154 = vector.multi_reduction <add>, %153, %cst_113 [0] : vector<32x32xf32> to vector<32xf32>
    %155 = vector.shape_cast %154 : vector<32xf32> to vector<1x32xf32>
    %156 = arith.mulf %153, %149 : vector<32x32xf32>
    %cst_114 = arith.constant dense<0.000000e+00> : vector<32xf32>
    %157 = vector.multi_reduction <add>, %156, %cst_114 [0] : vector<32x32xf32> to vector<32xf32>
    %158 = vector.shape_cast %157 : vector<32xf32> to vector<1x32xf32>
    %159 = vector.shape_cast %155 : vector<1x32xf32> to vector<1x32xf32>
    %160 = vector.broadcast %159 : vector<1x32xf32> to vector<8x32xf32>
    %c0_115 = arith.constant 0 : index
    %c0_116 = arith.constant 0 : index
    %c0_117 = arith.constant 0 : index
    %c0_118 = arith.constant 0 : index
    %161 = vector.load %arg7[%c0_115, %c0_116, %c0_117, %c0_118] : memref<1x1x8x32xf32, #tpu.memory_space<vmem>>, vector<1x1x8x32xf32>
    %162 = vector.shape_cast %161 : vector<1x1x8x32xf32> to vector<8x32xf32>
    %163 = vector.shape_cast %160 : vector<8x32xf32> to vector<1x1x8x32xf32>
    tpu.vector_store %arg7[%c0_115, %c0_116, %c0_117, %c0_118], %163 {strides = array<i32>} : memref<1x1x8x32xf32, #tpu.memory_space<vmem>>, vector<1x1x8x32xf32>,
    %164 = vector.shape_cast %158 : vector<1x32xf32> to vector<1x32xf32>
    %165 = vector.broadcast %164 : vector<1x32xf32> to vector<8x32xf32>
    %c0_119 = arith.constant 0 : index
    %c0_120 = arith.constant 0 : index
    %c0_121 = arith.constant 0 : index
    %c0_122 = arith.constant 0 : index
    %166 = vector.load %arg8[%c0_119, %c0_120, %c0_121, %c0_122] : memref<1x1x8x32xf32, #tpu.memory_space<vmem>>, vector<1x1x8x32xf32>
    %167 = vector.shape_cast %166 : vector<1x1x8x32xf32> to vector<8x32xf32>
    %168 = vector.shape_cast %165 : vector<8x32xf32> to vector<1x1x8x32xf32>
    tpu.vector_store %arg8[%c0_119, %c0_120, %c0_121, %c0_122], %168 {strides = array<i32>} : memref<1x1x8x32xf32, #tpu.memory_space<vmem>>, vector<1x1x8x32xf32>,
    %169 = arith.truncf %149 : vector<32x32xf32> to vector<32x32xbf16>
    %c0_123 = arith.constant 0 : index
    %c0_124 = arith.constant 0 : index
    %c0_125 = arith.constant 0 : index
    %170 = vector.load %arg6[%c0_123, %c0_124, %c0_125] : memref<1x32x32xbf16, #tpu.memory_space<vmem>>, vector<1x32x32xbf16>
    %171 = vector.shape_cast %170 : vector<1x32x32xbf16> to vector<32x32xbf16>
    %172 = vector.shape_cast %169 : vector<32x32xbf16> to vector<1x32x32xbf16>
    tpu.vector_store %arg6[%c0_123, %c0_124, %c0_125], %172 {strides = array<i32>} : memref<1x32x32xbf16, #tpu.memory_space<vmem>>, vector<1x32x32xbf16>,
    return
  }
  func.func @transform_0(%arg0: i32, %arg1: i32) -> (i32, i32, i32, i32) {
    %c0_i32 = arith.constant 0 : i32
    %c0_i32_0 = arith.constant 0 : i32
    %c0_i32_1 = arith.constant 0 : i32
    %c0_i32_2 = arith.constant 0 : i32
    return %arg0, %c0_i32, %c0_i32_0, %c0_i32_1 : i32, i32, i32, i32
  }
  func.func @transform_1(%arg0: i32, %arg1: i32) -> (i32, i32, i32) {
    %c0_i32 = arith.constant 0 : i32
    %c0_i32_0 = arith.constant 0 : i32
    %c0_i32_1 = arith.constant 0 : i32
    %c0_i32_2 = arith.constant 0 : i32
    return %c0_i32, %c0_i32_0, %c0_i32_1 : i32, i32, i32
  }
  func.func @transform_2(%arg0: i32, %arg1: i32) -> (i32, i32) {
    %c0_i32 = arith.constant 0 : i32
    %c0_i32_0 = arith.constant 0 : i32
    %c0_i32_1 = arith.constant 0 : i32
    return %c0_i32, %c0_i32_0 : i32, i32
  }
  func.func @transform_3(%arg0: i32, %arg1: i32) -> (i32, i32, i32) {
    %c0_i32 = arith.constant 0 : i32
    %c0_i32_0 = arith.constant 0 : i32
    %c0_i32_1 = arith.constant 0 : i32
    return %arg1, %c0_i32, %c0_i32_0 : i32, i32, i32
  }
  func.func @transform_4(%arg0: i32, %arg1: i32) -> (i32, i32, i32) {
    %c0_i32 = arith.constant 0 : i32
    %c0_i32_0 = arith.constant 0 : i32
    return %arg0, %arg1, %c0_i32 : i32, i32, i32
  }
  func.func @transform_5(%arg0: i32, %arg1: i32) -> (i32, i32, i32, i32) {
    %c0_i32 = arith.constant 0 : i32
    %c0_i32_0 = arith.constant 0 : i32
    %c0_i32_1 = arith.constant 0 : i32
    return %arg0, %arg1, %c0_i32, %c0_i32_0 : i32, i32, i32, i32
  }
  func.func @transform_6(%arg0: i32, %arg1: i32) -> (i32, i32, i32, i32) {
    %c0_i32 = arith.constant 0 : i32
    %c0_i32_0 = arith.constant 0 : i32
    %c0_i32_1 = arith.constant 0 : i32
    return %arg0, %arg1, %c0_i32, %c0_i32_0 : i32, i32, i32, i32
  }
}

module attributes {stable_mosaic.version = 11 : i64} {
  func.func @_conv_kernel(%arg0: i32, %arg1: i32, %arg2: memref<1x1x54x32xf32, #tpu.memory_space<vmem>>, %arg3: memref<16x32x64xbf16, #tpu.memory_space<vmem>>, %arg4: memref<1x64xf32, #tpu.memory_space<vmem>>, %arg5: memref<1x32x1xf32, #tpu.memory_space<vmem>>, %arg6: memref<1x32x64xbf16, #tpu.memory_space<vmem>>, %arg7: memref<1x1x8x64xf32, #tpu.memory_space<vmem>>, %arg8: memref<1x1x8x64xf32, #tpu.memory_space<vmem>>) attributes {dimension_semantics = [#tpu.dimension_semantics<parallel>, #tpu.dimension_semantics<parallel>], iteration_bounds = array<i64: 2, 1>, scalar_prefetch = 0 : i64, scratch_operands = 0 : i64, tpu.core_type = #tpu.core_type<tc>, window_params = [{transform_indices = @transform_0, window_bounds = array<i64: 1, 1, 54, 32>}, {pipeline_mode = #tpu.pipeline_mode<synchronous>, transform_indices = @transform_1, window_bounds = array<i64: 16, 32, 64>}, {pipeline_mode = #tpu.pipeline_mode<synchronous>, transform_indices = @transform_2, window_bounds = array<i64: 1, 64>}, {transform_indices = @transform_3, window_bounds = array<i64: 1, 32, 1>}, {transform_indices = @transform_4, window_bounds = array<i64: 1, 32, 64>}, {transform_indices = @transform_5, window_bounds = array<i64: 1, 1, 8, 64>}, {transform_indices = @transform_6, window_bounds = array<i64: 1, 1, 8, 64>}]} {
    %c32_i32 = arith.constant 32 : i32
    %0 = arith.muli %arg1, %c32_i32 : i32
    %1 = tpu.assume_multiple %0, 16 : i32
    %cst = arith.constant 0.000000e+00 : f32
    %2 = vector.broadcast %cst : f32 to vector<32x64xf32>
    %c0_i32 = arith.constant 0 : i32
    %3 = arith.addi %1, %c0_i32 : i32
    %c0 = arith.constant 0 : index
    %c0_0 = arith.constant 0 : index
    %4 = arith.index_cast %3 : i32 to index
    %c0_1 = arith.constant 0 : index
    %5 = vector.load %arg2[%c0, %c0_0, %4, %c0_1] : memref<1x1x54x32xf32, #tpu.memory_space<vmem>>, vector<1x1x32x32xf32>
    %6 = vector.shape_cast %5 : vector<1x1x32x32xf32> to vector<32x32xf32>
    %7 = arith.truncf %6 : vector<32x32xf32> to vector<32x32xbf16>
    %c0_2 = arith.constant 0 : index
    %c0_3 = arith.constant 0 : index
    %c0_4 = arith.constant 0 : index
    %8 = vector.load %arg3[%c0_2, %c0_3, %c0_4] : memref<16x32x64xbf16, #tpu.memory_space<vmem>>, vector<1x32x64xbf16>
    %9 = vector.shape_cast %8 : vector<1x32x64xbf16> to vector<32x64xbf16>
    %cst_5 = arith.constant dense<0.000000e+00> : vector<32x64xf32>
    %10 = tpu.matmul %7, %9, %cst_5 {dimension_numbers = #tpu.dot_dimension_numbers<[1], [0], [0], [1], [0, 0, 1, 1], [], []>} : vector<32x32xbf16>, vector<32x64xbf16>, vector<32x64xf32> -> vector<32x64xf32>
    %11 = arith.addf %2, %10 : vector<32x64xf32>
    %c1_i32 = arith.constant 1 : i32
    %12 = arith.addi %1, %c1_i32 : i32
    %c0_6 = arith.constant 0 : index
    %c0_7 = arith.constant 0 : index
    %13 = arith.index_cast %12 : i32 to index
    %c0_8 = arith.constant 0 : index
    %14 = vector.load %arg2[%c0_6, %c0_7, %13, %c0_8] : memref<1x1x54x32xf32, #tpu.memory_space<vmem>>, vector<1x1x32x32xf32>
    %15 = vector.shape_cast %14 : vector<1x1x32x32xf32> to vector<32x32xf32>
    %16 = arith.truncf %15 : vector<32x32xf32> to vector<32x32xbf16>
    %c1 = arith.constant 1 : index
    %c0_9 = arith.constant 0 : index
    %c0_10 = arith.constant 0 : index
    %17 = vector.load %arg3[%c1, %c0_9, %c0_10] : memref<16x32x64xbf16, #tpu.memory_space<vmem>>, vector<1x32x64xbf16>
    %18 = vector.shape_cast %17 : vector<1x32x64xbf16> to vector<32x64xbf16>
    %cst_11 = arith.constant dense<0.000000e+00> : vector<32x64xf32>
    %19 = tpu.matmul %16, %18, %cst_11 {dimension_numbers = #tpu.dot_dimension_numbers<[1], [0], [0], [1], [0, 0, 1, 1], [], []>} : vector<32x32xbf16>, vector<32x64xbf16>, vector<32x64xf32> -> vector<32x64xf32>
    %20 = arith.addf %11, %19 : vector<32x64xf32>
    %c2_i32 = arith.constant 2 : i32
    %21 = arith.addi %1, %c2_i32 : i32
    %c0_12 = arith.constant 0 : index
    %c0_13 = arith.constant 0 : index
    %22 = arith.index_cast %21 : i32 to index
    %c0_14 = arith.constant 0 : index
    %23 = vector.load %arg2[%c0_12, %c0_13, %22, %c0_14] : memref<1x1x54x32xf32, #tpu.memory_space<vmem>>, vector<1x1x32x32xf32>
    %24 = vector.shape_cast %23 : vector<1x1x32x32xf32> to vector<32x32xf32>
    %25 = arith.truncf %24 : vector<32x32xf32> to vector<32x32xbf16>
    %c2 = arith.constant 2 : index
    %c0_15 = arith.constant 0 : index
    %c0_16 = arith.constant 0 : index
    %26 = vector.load %arg3[%c2, %c0_15, %c0_16] : memref<16x32x64xbf16, #tpu.memory_space<vmem>>, vector<1x32x64xbf16>
    %27 = vector.shape_cast %26 : vector<1x32x64xbf16> to vector<32x64xbf16>
    %cst_17 = arith.constant dense<0.000000e+00> : vector<32x64xf32>
    %28 = tpu.matmul %25, %27, %cst_17 {dimension_numbers = #tpu.dot_dimension_numbers<[1], [0], [0], [1], [0, 0, 1, 1], [], []>} : vector<32x32xbf16>, vector<32x64xbf16>, vector<32x64xf32> -> vector<32x64xf32>
    %29 = arith.addf %20, %28 : vector<32x64xf32>
    %c3_i32 = arith.constant 3 : i32
    %30 = arith.addi %1, %c3_i32 : i32
    %c0_18 = arith.constant 0 : index
    %c0_19 = arith.constant 0 : index
    %31 = arith.index_cast %30 : i32 to index
    %c0_20 = arith.constant 0 : index
    %32 = vector.load %arg2[%c0_18, %c0_19, %31, %c0_20] : memref<1x1x54x32xf32, #tpu.memory_space<vmem>>, vector<1x1x32x32xf32>
    %33 = vector.shape_cast %32 : vector<1x1x32x32xf32> to vector<32x32xf32>
    %34 = arith.truncf %33 : vector<32x32xf32> to vector<32x32xbf16>
    %c3 = arith.constant 3 : index
    %c0_21 = arith.constant 0 : index
    %c0_22 = arith.constant 0 : index
    %35 = vector.load %arg3[%c3, %c0_21, %c0_22] : memref<16x32x64xbf16, #tpu.memory_space<vmem>>, vector<1x32x64xbf16>
    %36 = vector.shape_cast %35 : vector<1x32x64xbf16> to vector<32x64xbf16>
    %cst_23 = arith.constant dense<0.000000e+00> : vector<32x64xf32>
    %37 = tpu.matmul %34, %36, %cst_23 {dimension_numbers = #tpu.dot_dimension_numbers<[1], [0], [0], [1], [0, 0, 1, 1], [], []>} : vector<32x32xbf16>, vector<32x64xbf16>, vector<32x64xf32> -> vector<32x64xf32>
    %38 = arith.addf %29, %37 : vector<32x64xf32>
    %c6_i32 = arith.constant 6 : i32
    %39 = arith.addi %1, %c6_i32 : i32
    %c0_24 = arith.constant 0 : index
    %c0_25 = arith.constant 0 : index
    %40 = arith.index_cast %39 : i32 to index
    %c0_26 = arith.constant 0 : index
    %41 = vector.load %arg2[%c0_24, %c0_25, %40, %c0_26] : memref<1x1x54x32xf32, #tpu.memory_space<vmem>>, vector<1x1x32x32xf32>
    %42 = vector.shape_cast %41 : vector<1x1x32x32xf32> to vector<32x32xf32>
    %43 = arith.truncf %42 : vector<32x32xf32> to vector<32x32xbf16>
    %c4 = arith.constant 4 : index
    %c0_27 = arith.constant 0 : index
    %c0_28 = arith.constant 0 : index
    %44 = vector.load %arg3[%c4, %c0_27, %c0_28] : memref<16x32x64xbf16, #tpu.memory_space<vmem>>, vector<1x32x64xbf16>
    %45 = vector.shape_cast %44 : vector<1x32x64xbf16> to vector<32x64xbf16>
    %cst_29 = arith.constant dense<0.000000e+00> : vector<32x64xf32>
    %46 = tpu.matmul %43, %45, %cst_29 {dimension_numbers = #tpu.dot_dimension_numbers<[1], [0], [0], [1], [0, 0, 1, 1], [], []>} : vector<32x32xbf16>, vector<32x64xbf16>, vector<32x64xf32> -> vector<32x64xf32>
    %47 = arith.addf %38, %46 : vector<32x64xf32>
    %c7_i32 = arith.constant 7 : i32
    %48 = arith.addi %1, %c7_i32 : i32
    %c0_30 = arith.constant 0 : index
    %c0_31 = arith.constant 0 : index
    %49 = arith.index_cast %48 : i32 to index
    %c0_32 = arith.constant 0 : index
    %50 = vector.load %arg2[%c0_30, %c0_31, %49, %c0_32] : memref<1x1x54x32xf32, #tpu.memory_space<vmem>>, vector<1x1x32x32xf32>
    %51 = vector.shape_cast %50 : vector<1x1x32x32xf32> to vector<32x32xf32>
    %52 = arith.truncf %51 : vector<32x32xf32> to vector<32x32xbf16>
    %c5 = arith.constant 5 : index
    %c0_33 = arith.constant 0 : index
    %c0_34 = arith.constant 0 : index
    %53 = vector.load %arg3[%c5, %c0_33, %c0_34] : memref<16x32x64xbf16, #tpu.memory_space<vmem>>, vector<1x32x64xbf16>
    %54 = vector.shape_cast %53 : vector<1x32x64xbf16> to vector<32x64xbf16>
    %cst_35 = arith.constant dense<0.000000e+00> : vector<32x64xf32>
    %55 = tpu.matmul %52, %54, %cst_35 {dimension_numbers = #tpu.dot_dimension_numbers<[1], [0], [0], [1], [0, 0, 1, 1], [], []>} : vector<32x32xbf16>, vector<32x64xbf16>, vector<32x64xf32> -> vector<32x64xf32>
    %56 = arith.addf %47, %55 : vector<32x64xf32>
    %c8_i32 = arith.constant 8 : i32
    %57 = arith.addi %1, %c8_i32 : i32
    %c0_36 = arith.constant 0 : index
    %c0_37 = arith.constant 0 : index
    %58 = arith.index_cast %57 : i32 to index
    %c0_38 = arith.constant 0 : index
    %59 = vector.load %arg2[%c0_36, %c0_37, %58, %c0_38] : memref<1x1x54x32xf32, #tpu.memory_space<vmem>>, vector<1x1x32x32xf32>
    %60 = vector.shape_cast %59 : vector<1x1x32x32xf32> to vector<32x32xf32>
    %61 = arith.truncf %60 : vector<32x32xf32> to vector<32x32xbf16>
    %c6 = arith.constant 6 : index
    %c0_39 = arith.constant 0 : index
    %c0_40 = arith.constant 0 : index
    %62 = vector.load %arg3[%c6, %c0_39, %c0_40] : memref<16x32x64xbf16, #tpu.memory_space<vmem>>, vector<1x32x64xbf16>
    %63 = vector.shape_cast %62 : vector<1x32x64xbf16> to vector<32x64xbf16>
    %cst_41 = arith.constant dense<0.000000e+00> : vector<32x64xf32>
    %64 = tpu.matmul %61, %63, %cst_41 {dimension_numbers = #tpu.dot_dimension_numbers<[1], [0], [0], [1], [0, 0, 1, 1], [], []>} : vector<32x32xbf16>, vector<32x64xbf16>, vector<32x64xf32> -> vector<32x64xf32>
    %65 = arith.addf %56, %64 : vector<32x64xf32>
    %c9_i32 = arith.constant 9 : i32
    %66 = arith.addi %1, %c9_i32 : i32
    %c0_42 = arith.constant 0 : index
    %c0_43 = arith.constant 0 : index
    %67 = arith.index_cast %66 : i32 to index
    %c0_44 = arith.constant 0 : index
    %68 = vector.load %arg2[%c0_42, %c0_43, %67, %c0_44] : memref<1x1x54x32xf32, #tpu.memory_space<vmem>>, vector<1x1x32x32xf32>
    %69 = vector.shape_cast %68 : vector<1x1x32x32xf32> to vector<32x32xf32>
    %70 = arith.truncf %69 : vector<32x32xf32> to vector<32x32xbf16>
    %c7 = arith.constant 7 : index
    %c0_45 = arith.constant 0 : index
    %c0_46 = arith.constant 0 : index
    %71 = vector.load %arg3[%c7, %c0_45, %c0_46] : memref<16x32x64xbf16, #tpu.memory_space<vmem>>, vector<1x32x64xbf16>
    %72 = vector.shape_cast %71 : vector<1x32x64xbf16> to vector<32x64xbf16>
    %cst_47 = arith.constant dense<0.000000e+00> : vector<32x64xf32>
    %73 = tpu.matmul %70, %72, %cst_47 {dimension_numbers = #tpu.dot_dimension_numbers<[1], [0], [0], [1], [0, 0, 1, 1], [], []>} : vector<32x32xbf16>, vector<32x64xbf16>, vector<32x64xf32> -> vector<32x64xf32>
    %74 = arith.addf %65, %73 : vector<32x64xf32>
    %c12_i32 = arith.constant 12 : i32
    %75 = arith.addi %1, %c12_i32 : i32
    %c0_48 = arith.constant 0 : index
    %c0_49 = arith.constant 0 : index
    %76 = arith.index_cast %75 : i32 to index
    %c0_50 = arith.constant 0 : index
    %77 = vector.load %arg2[%c0_48, %c0_49, %76, %c0_50] : memref<1x1x54x32xf32, #tpu.memory_space<vmem>>, vector<1x1x32x32xf32>
    %78 = vector.shape_cast %77 : vector<1x1x32x32xf32> to vector<32x32xf32>
    %79 = arith.truncf %78 : vector<32x32xf32> to vector<32x32xbf16>
    %c8 = arith.constant 8 : index
    %c0_51 = arith.constant 0 : index
    %c0_52 = arith.constant 0 : index
    %80 = vector.load %arg3[%c8, %c0_51, %c0_52] : memref<16x32x64xbf16, #tpu.memory_space<vmem>>, vector<1x32x64xbf16>
    %81 = vector.shape_cast %80 : vector<1x32x64xbf16> to vector<32x64xbf16>
    %cst_53 = arith.constant dense<0.000000e+00> : vector<32x64xf32>
    %82 = tpu.matmul %79, %81, %cst_53 {dimension_numbers = #tpu.dot_dimension_numbers<[1], [0], [0], [1], [0, 0, 1, 1], [], []>} : vector<32x32xbf16>, vector<32x64xbf16>, vector<32x64xf32> -> vector<32x64xf32>
    %83 = arith.addf %74, %82 : vector<32x64xf32>
    %c13_i32 = arith.constant 13 : i32
    %84 = arith.addi %1, %c13_i32 : i32
    %c0_54 = arith.constant 0 : index
    %c0_55 = arith.constant 0 : index
    %85 = arith.index_cast %84 : i32 to index
    %c0_56 = arith.constant 0 : index
    %86 = vector.load %arg2[%c0_54, %c0_55, %85, %c0_56] : memref<1x1x54x32xf32, #tpu.memory_space<vmem>>, vector<1x1x32x32xf32>
    %87 = vector.shape_cast %86 : vector<1x1x32x32xf32> to vector<32x32xf32>
    %88 = arith.truncf %87 : vector<32x32xf32> to vector<32x32xbf16>
    %c9 = arith.constant 9 : index
    %c0_57 = arith.constant 0 : index
    %c0_58 = arith.constant 0 : index
    %89 = vector.load %arg3[%c9, %c0_57, %c0_58] : memref<16x32x64xbf16, #tpu.memory_space<vmem>>, vector<1x32x64xbf16>
    %90 = vector.shape_cast %89 : vector<1x32x64xbf16> to vector<32x64xbf16>
    %cst_59 = arith.constant dense<0.000000e+00> : vector<32x64xf32>
    %91 = tpu.matmul %88, %90, %cst_59 {dimension_numbers = #tpu.dot_dimension_numbers<[1], [0], [0], [1], [0, 0, 1, 1], [], []>} : vector<32x32xbf16>, vector<32x64xbf16>, vector<32x64xf32> -> vector<32x64xf32>
    %92 = arith.addf %83, %91 : vector<32x64xf32>
    %c14_i32 = arith.constant 14 : i32
    %93 = arith.addi %1, %c14_i32 : i32
    %c0_60 = arith.constant 0 : index
    %c0_61 = arith.constant 0 : index
    %94 = arith.index_cast %93 : i32 to index
    %c0_62 = arith.constant 0 : index
    %95 = vector.load %arg2[%c0_60, %c0_61, %94, %c0_62] : memref<1x1x54x32xf32, #tpu.memory_space<vmem>>, vector<1x1x32x32xf32>
    %96 = vector.shape_cast %95 : vector<1x1x32x32xf32> to vector<32x32xf32>
    %97 = arith.truncf %96 : vector<32x32xf32> to vector<32x32xbf16>
    %c10 = arith.constant 10 : index
    %c0_63 = arith.constant 0 : index
    %c0_64 = arith.constant 0 : index
    %98 = vector.load %arg3[%c10, %c0_63, %c0_64] : memref<16x32x64xbf16, #tpu.memory_space<vmem>>, vector<1x32x64xbf16>
    %99 = vector.shape_cast %98 : vector<1x32x64xbf16> to vector<32x64xbf16>
    %cst_65 = arith.constant dense<0.000000e+00> : vector<32x64xf32>
    %100 = tpu.matmul %97, %99, %cst_65 {dimension_numbers = #tpu.dot_dimension_numbers<[1], [0], [0], [1], [0, 0, 1, 1], [], []>} : vector<32x32xbf16>, vector<32x64xbf16>, vector<32x64xf32> -> vector<32x64xf32>
    %101 = arith.addf %92, %100 : vector<32x64xf32>
    %c15_i32 = arith.constant 15 : i32
    %102 = arith.addi %1, %c15_i32 : i32
    %c0_66 = arith.constant 0 : index
    %c0_67 = arith.constant 0 : index
    %103 = arith.index_cast %102 : i32 to index
    %c0_68 = arith.constant 0 : index
    %104 = vector.load %arg2[%c0_66, %c0_67, %103, %c0_68] : memref<1x1x54x32xf32, #tpu.memory_space<vmem>>, vector<1x1x32x32xf32>
    %105 = vector.shape_cast %104 : vector<1x1x32x32xf32> to vector<32x32xf32>
    %106 = arith.truncf %105 : vector<32x32xf32> to vector<32x32xbf16>
    %c11 = arith.constant 11 : index
    %c0_69 = arith.constant 0 : index
    %c0_70 = arith.constant 0 : index
    %107 = vector.load %arg3[%c11, %c0_69, %c0_70] : memref<16x32x64xbf16, #tpu.memory_space<vmem>>, vector<1x32x64xbf16>
    %108 = vector.shape_cast %107 : vector<1x32x64xbf16> to vector<32x64xbf16>
    %cst_71 = arith.constant dense<0.000000e+00> : vector<32x64xf32>
    %109 = tpu.matmul %106, %108, %cst_71 {dimension_numbers = #tpu.dot_dimension_numbers<[1], [0], [0], [1], [0, 0, 1, 1], [], []>} : vector<32x32xbf16>, vector<32x64xbf16>, vector<32x64xf32> -> vector<32x64xf32>
    %110 = arith.addf %101, %109 : vector<32x64xf32>
    %c18_i32 = arith.constant 18 : i32
    %111 = arith.addi %1, %c18_i32 : i32
    %c0_72 = arith.constant 0 : index
    %c0_73 = arith.constant 0 : index
    %112 = arith.index_cast %111 : i32 to index
    %c0_74 = arith.constant 0 : index
    %113 = vector.load %arg2[%c0_72, %c0_73, %112, %c0_74] : memref<1x1x54x32xf32, #tpu.memory_space<vmem>>, vector<1x1x32x32xf32>
    %114 = vector.shape_cast %113 : vector<1x1x32x32xf32> to vector<32x32xf32>
    %115 = arith.truncf %114 : vector<32x32xf32> to vector<32x32xbf16>
    %c12 = arith.constant 12 : index
    %c0_75 = arith.constant 0 : index
    %c0_76 = arith.constant 0 : index
    %116 = vector.load %arg3[%c12, %c0_75, %c0_76] : memref<16x32x64xbf16, #tpu.memory_space<vmem>>, vector<1x32x64xbf16>
    %117 = vector.shape_cast %116 : vector<1x32x64xbf16> to vector<32x64xbf16>
    %cst_77 = arith.constant dense<0.000000e+00> : vector<32x64xf32>
    %118 = tpu.matmul %115, %117, %cst_77 {dimension_numbers = #tpu.dot_dimension_numbers<[1], [0], [0], [1], [0, 0, 1, 1], [], []>} : vector<32x32xbf16>, vector<32x64xbf16>, vector<32x64xf32> -> vector<32x64xf32>
    %119 = arith.addf %110, %118 : vector<32x64xf32>
    %c19_i32 = arith.constant 19 : i32
    %120 = arith.addi %1, %c19_i32 : i32
    %c0_78 = arith.constant 0 : index
    %c0_79 = arith.constant 0 : index
    %121 = arith.index_cast %120 : i32 to index
    %c0_80 = arith.constant 0 : index
    %122 = vector.load %arg2[%c0_78, %c0_79, %121, %c0_80] : memref<1x1x54x32xf32, #tpu.memory_space<vmem>>, vector<1x1x32x32xf32>
    %123 = vector.shape_cast %122 : vector<1x1x32x32xf32> to vector<32x32xf32>
    %124 = arith.truncf %123 : vector<32x32xf32> to vector<32x32xbf16>
    %c13 = arith.constant 13 : index
    %c0_81 = arith.constant 0 : index
    %c0_82 = arith.constant 0 : index
    %125 = vector.load %arg3[%c13, %c0_81, %c0_82] : memref<16x32x64xbf16, #tpu.memory_space<vmem>>, vector<1x32x64xbf16>
    %126 = vector.shape_cast %125 : vector<1x32x64xbf16> to vector<32x64xbf16>
    %cst_83 = arith.constant dense<0.000000e+00> : vector<32x64xf32>
    %127 = tpu.matmul %124, %126, %cst_83 {dimension_numbers = #tpu.dot_dimension_numbers<[1], [0], [0], [1], [0, 0, 1, 1], [], []>} : vector<32x32xbf16>, vector<32x64xbf16>, vector<32x64xf32> -> vector<32x64xf32>
    %128 = arith.addf %119, %127 : vector<32x64xf32>
    %c20_i32 = arith.constant 20 : i32
    %129 = arith.addi %1, %c20_i32 : i32
    %c0_84 = arith.constant 0 : index
    %c0_85 = arith.constant 0 : index
    %130 = arith.index_cast %129 : i32 to index
    %c0_86 = arith.constant 0 : index
    %131 = vector.load %arg2[%c0_84, %c0_85, %130, %c0_86] : memref<1x1x54x32xf32, #tpu.memory_space<vmem>>, vector<1x1x32x32xf32>
    %132 = vector.shape_cast %131 : vector<1x1x32x32xf32> to vector<32x32xf32>
    %133 = arith.truncf %132 : vector<32x32xf32> to vector<32x32xbf16>
    %c14 = arith.constant 14 : index
    %c0_87 = arith.constant 0 : index
    %c0_88 = arith.constant 0 : index
    %134 = vector.load %arg3[%c14, %c0_87, %c0_88] : memref<16x32x64xbf16, #tpu.memory_space<vmem>>, vector<1x32x64xbf16>
    %135 = vector.shape_cast %134 : vector<1x32x64xbf16> to vector<32x64xbf16>
    %cst_89 = arith.constant dense<0.000000e+00> : vector<32x64xf32>
    %136 = tpu.matmul %133, %135, %cst_89 {dimension_numbers = #tpu.dot_dimension_numbers<[1], [0], [0], [1], [0, 0, 1, 1], [], []>} : vector<32x32xbf16>, vector<32x64xbf16>, vector<32x64xf32> -> vector<32x64xf32>
    %137 = arith.addf %128, %136 : vector<32x64xf32>
    %c21_i32 = arith.constant 21 : i32
    %138 = arith.addi %1, %c21_i32 : i32
    %c0_90 = arith.constant 0 : index
    %c0_91 = arith.constant 0 : index
    %139 = arith.index_cast %138 : i32 to index
    %c0_92 = arith.constant 0 : index
    %140 = vector.load %arg2[%c0_90, %c0_91, %139, %c0_92] : memref<1x1x54x32xf32, #tpu.memory_space<vmem>>, vector<1x1x32x32xf32>
    %141 = vector.shape_cast %140 : vector<1x1x32x32xf32> to vector<32x32xf32>
    %142 = arith.truncf %141 : vector<32x32xf32> to vector<32x32xbf16>
    %c15 = arith.constant 15 : index
    %c0_93 = arith.constant 0 : index
    %c0_94 = arith.constant 0 : index
    %143 = vector.load %arg3[%c15, %c0_93, %c0_94] : memref<16x32x64xbf16, #tpu.memory_space<vmem>>, vector<1x32x64xbf16>
    %144 = vector.shape_cast %143 : vector<1x32x64xbf16> to vector<32x64xbf16>
    %cst_95 = arith.constant dense<0.000000e+00> : vector<32x64xf32>
    %145 = tpu.matmul %142, %144, %cst_95 {dimension_numbers = #tpu.dot_dimension_numbers<[1], [0], [0], [1], [0, 0, 1, 1], [], []>} : vector<32x32xbf16>, vector<32x64xbf16>, vector<32x64xf32> -> vector<32x64xf32>
    %146 = arith.addf %137, %145 : vector<32x64xf32>
    %c0_96 = arith.constant 0 : index
    %c0_97 = arith.constant 0 : index
    %147 = vector.load %arg4[%c0_96, %c0_97] : memref<1x64xf32, #tpu.memory_space<vmem>>, vector<1x64xf32>
    %148 = vector.broadcast %147 : vector<1x64xf32> to vector<32x64xf32>
    %149 = arith.addf %146, %148 : vector<32x64xf32>
    %c0_98 = arith.constant 0 : index
    %c0_99 = arith.constant 0 : index
    %c0_100 = arith.constant 0 : index
    %150 = vector.load %arg5[%c0_98, %c0_99, %c0_100] : memref<1x32x1xf32, #tpu.memory_space<vmem>>, vector<1x32x1xf32>
    %151 = vector.shape_cast %150 : vector<1x32x1xf32> to vector<32x1xf32>
    %152 = vector.broadcast %151 : vector<32x1xf32> to vector<32x64xf32>
    %153 = arith.mulf %149, %152 : vector<32x64xf32>
    %cst_101 = arith.constant dense<0.000000e+00> : vector<64xf32>
    %154 = vector.multi_reduction <add>, %153, %cst_101 [0] : vector<32x64xf32> to vector<64xf32>
    %155 = vector.shape_cast %154 : vector<64xf32> to vector<1x64xf32>
    %156 = arith.mulf %153, %149 : vector<32x64xf32>
    %cst_102 = arith.constant dense<0.000000e+00> : vector<64xf32>
    %157 = vector.multi_reduction <add>, %156, %cst_102 [0] : vector<32x64xf32> to vector<64xf32>
    %158 = vector.shape_cast %157 : vector<64xf32> to vector<1x64xf32>
    %159 = vector.shape_cast %155 : vector<1x64xf32> to vector<1x64xf32>
    %160 = vector.broadcast %159 : vector<1x64xf32> to vector<8x64xf32>
    %c0_103 = arith.constant 0 : index
    %c0_104 = arith.constant 0 : index
    %c0_105 = arith.constant 0 : index
    %c0_106 = arith.constant 0 : index
    %161 = vector.load %arg7[%c0_103, %c0_104, %c0_105, %c0_106] : memref<1x1x8x64xf32, #tpu.memory_space<vmem>>, vector<1x1x8x64xf32>
    %162 = vector.shape_cast %161 : vector<1x1x8x64xf32> to vector<8x64xf32>
    %163 = vector.shape_cast %160 : vector<8x64xf32> to vector<1x1x8x64xf32>
    tpu.vector_store %arg7[%c0_103, %c0_104, %c0_105, %c0_106], %163 {strides = array<i32>} : memref<1x1x8x64xf32, #tpu.memory_space<vmem>>, vector<1x1x8x64xf32>,
    %164 = vector.shape_cast %158 : vector<1x64xf32> to vector<1x64xf32>
    %165 = vector.broadcast %164 : vector<1x64xf32> to vector<8x64xf32>
    %c0_107 = arith.constant 0 : index
    %c0_108 = arith.constant 0 : index
    %c0_109 = arith.constant 0 : index
    %c0_110 = arith.constant 0 : index
    %166 = vector.load %arg8[%c0_107, %c0_108, %c0_109, %c0_110] : memref<1x1x8x64xf32, #tpu.memory_space<vmem>>, vector<1x1x8x64xf32>
    %167 = vector.shape_cast %166 : vector<1x1x8x64xf32> to vector<8x64xf32>
    %168 = vector.shape_cast %165 : vector<8x64xf32> to vector<1x1x8x64xf32>
    tpu.vector_store %arg8[%c0_107, %c0_108, %c0_109, %c0_110], %168 {strides = array<i32>} : memref<1x1x8x64xf32, #tpu.memory_space<vmem>>, vector<1x1x8x64xf32>,
    %169 = arith.truncf %149 : vector<32x64xf32> to vector<32x64xbf16>
    %c0_111 = arith.constant 0 : index
    %c0_112 = arith.constant 0 : index
    %c0_113 = arith.constant 0 : index
    %170 = vector.load %arg6[%c0_111, %c0_112, %c0_113] : memref<1x32x64xbf16, #tpu.memory_space<vmem>>, vector<1x32x64xbf16>
    %171 = vector.shape_cast %170 : vector<1x32x64xbf16> to vector<32x64xbf16>
    %172 = vector.shape_cast %169 : vector<32x64xbf16> to vector<1x32x64xbf16>
    tpu.vector_store %arg6[%c0_111, %c0_112, %c0_113], %172 {strides = array<i32>} : memref<1x32x64xbf16, #tpu.memory_space<vmem>>, vector<1x32x64xbf16>,
    return
  }
  func.func @transform_0(%arg0: i32, %arg1: i32) -> (i32, i32, i32, i32) {
    %c0_i32 = arith.constant 0 : i32
    %c0_i32_0 = arith.constant 0 : i32
    %c0_i32_1 = arith.constant 0 : i32
    %c0_i32_2 = arith.constant 0 : i32
    return %arg0, %c0_i32, %c0_i32_0, %c0_i32_1 : i32, i32, i32, i32
  }
  func.func @transform_1(%arg0: i32, %arg1: i32) -> (i32, i32, i32) {
    %c0_i32 = arith.constant 0 : i32
    %c0_i32_0 = arith.constant 0 : i32
    %c0_i32_1 = arith.constant 0 : i32
    %c0_i32_2 = arith.constant 0 : i32
    return %c0_i32, %c0_i32_0, %c0_i32_1 : i32, i32, i32
  }
  func.func @transform_2(%arg0: i32, %arg1: i32) -> (i32, i32) {
    %c0_i32 = arith.constant 0 : i32
    %c0_i32_0 = arith.constant 0 : i32
    %c0_i32_1 = arith.constant 0 : i32
    return %c0_i32, %c0_i32_0 : i32, i32
  }
  func.func @transform_3(%arg0: i32, %arg1: i32) -> (i32, i32, i32) {
    %c0_i32 = arith.constant 0 : i32
    %c0_i32_0 = arith.constant 0 : i32
    %c0_i32_1 = arith.constant 0 : i32
    return %arg1, %c0_i32, %c0_i32_0 : i32, i32, i32
  }
  func.func @transform_4(%arg0: i32, %arg1: i32) -> (i32, i32, i32) {
    %c0_i32 = arith.constant 0 : i32
    %c0_i32_0 = arith.constant 0 : i32
    return %arg0, %arg1, %c0_i32 : i32, i32, i32
  }
  func.func @transform_5(%arg0: i32, %arg1: i32) -> (i32, i32, i32, i32) {
    %c0_i32 = arith.constant 0 : i32
    %c0_i32_0 = arith.constant 0 : i32
    %c0_i32_1 = arith.constant 0 : i32
    return %arg0, %arg1, %c0_i32, %c0_i32_0 : i32, i32, i32, i32
  }
  func.func @transform_6(%arg0: i32, %arg1: i32) -> (i32, i32, i32, i32) {
    %c0_i32 = arith.constant 0 : i32
    %c0_i32_0 = arith.constant 0 : i32
    %c0_i32_1 = arith.constant 0 : i32
    return %arg0, %arg1, %c0_i32, %c0_i32_0 : i32, i32, i32, i32
  }
}

module attributes {stable_mosaic.version = 11 : i64} {
  func.func @_conv_kernel(%arg0: i32, %arg1: i32, %arg2: memref<1x1x32x64xbf16, #tpu.memory_space<vmem>>, %arg3: memref<1x64x16xbf16, #tpu.memory_space<vmem>>, %arg4: memref<1x16xf32, #tpu.memory_space<vmem>>, %arg5: memref<1x32x16xf32, #tpu.memory_space<vmem>>) attributes {dimension_semantics = [#tpu.dimension_semantics<parallel>, #tpu.dimension_semantics<parallel>], iteration_bounds = array<i64: 2, 1>, scalar_prefetch = 0 : i64, scratch_operands = 0 : i64, tpu.core_type = #tpu.core_type<tc>, window_params = [{transform_indices = @transform_0, window_bounds = array<i64: 1, 1, 32, 64>}, {pipeline_mode = #tpu.pipeline_mode<synchronous>, transform_indices = @transform_1, window_bounds = array<i64: 1, 64, 16>}, {pipeline_mode = #tpu.pipeline_mode<synchronous>, transform_indices = @transform_2, window_bounds = array<i64: 1, 16>}, {transform_indices = @transform_3, window_bounds = array<i64: 1, 32, 16>}]} {
    %c0 = arith.constant 0 : index
    %c0_0 = arith.constant 0 : index
    %c0_1 = arith.constant 0 : index
    %c0_2 = arith.constant 0 : index
    %0 = vector.load %arg2[%c0, %c0_0, %c0_1, %c0_2] : memref<1x1x32x64xbf16, #tpu.memory_space<vmem>>, vector<1x1x32x64xbf16>
    %1 = vector.shape_cast %0 : vector<1x1x32x64xbf16> to vector<32x64xbf16>
    %c0_3 = arith.constant 0 : index
    %c0_4 = arith.constant 0 : index
    %c0_5 = arith.constant 0 : index
    %2 = vector.load %arg3[%c0_3, %c0_4, %c0_5] : memref<1x64x16xbf16, #tpu.memory_space<vmem>>, vector<1x64x16xbf16>
    %3 = vector.shape_cast %2 : vector<1x64x16xbf16> to vector<64x16xbf16>
    %cst = arith.constant dense<0.000000e+00> : vector<32x16xf32>
    %4 = tpu.matmul %1, %3, %cst {dimension_numbers = #tpu.dot_dimension_numbers<[1], [0], [0], [1], [0, 0, 1, 1], [], []>} : vector<32x64xbf16>, vector<64x16xbf16>, vector<32x16xf32> -> vector<32x16xf32>
    %c0_6 = arith.constant 0 : index
    %c0_7 = arith.constant 0 : index
    %5 = vector.load %arg4[%c0_6, %c0_7] : memref<1x16xf32, #tpu.memory_space<vmem>>, vector<1x16xf32>
    %6 = vector.broadcast %5 : vector<1x16xf32> to vector<32x16xf32>
    %7 = arith.addf %4, %6 : vector<32x16xf32>
    %c0_8 = arith.constant 0 : index
    %c0_9 = arith.constant 0 : index
    %c0_10 = arith.constant 0 : index
    %8 = vector.load %arg5[%c0_8, %c0_9, %c0_10] : memref<1x32x16xf32, #tpu.memory_space<vmem>>, vector<1x32x16xf32>
    %9 = vector.shape_cast %8 : vector<1x32x16xf32> to vector<32x16xf32>
    %10 = vector.shape_cast %7 : vector<32x16xf32> to vector<1x32x16xf32>
    tpu.vector_store %arg5[%c0_8, %c0_9, %c0_10], %10 {strides = array<i32>} : memref<1x32x16xf32, #tpu.memory_space<vmem>>, vector<1x32x16xf32>,
    return
  }
  func.func @transform_0(%arg0: i32, %arg1: i32) -> (i32, i32, i32, i32) {
    %c0_i32 = arith.constant 0 : i32
    %c0_i32_0 = arith.constant 0 : i32
    %c0_i32_1 = arith.constant 0 : i32
    return %arg0, %c0_i32, %arg1, %c0_i32_0 : i32, i32, i32, i32
  }
  func.func @transform_1(%arg0: i32, %arg1: i32) -> (i32, i32, i32) {
    %c0_i32 = arith.constant 0 : i32
    %c0_i32_0 = arith.constant 0 : i32
    %c0_i32_1 = arith.constant 0 : i32
    %c0_i32_2 = arith.constant 0 : i32
    return %c0_i32, %c0_i32_0, %c0_i32_1 : i32, i32, i32
  }
  func.func @transform_2(%arg0: i32, %arg1: i32) -> (i32, i32) {
    %c0_i32 = arith.constant 0 : i32
    %c0_i32_0 = arith.constant 0 : i32
    %c0_i32_1 = arith.constant 0 : i32
    return %c0_i32, %c0_i32_0 : i32, i32
  }
  func.func @transform_3(%arg0: i32, %arg1: i32) -> (i32, i32, i32) {
    %c0_i32 = arith.constant 0 : i32
    %c0_i32_0 = arith.constant 0 : i32
    return %arg0, %arg1, %c0_i32 : i32, i32, i32
  }
}

</mosaic_0001>

<bundles_post_ra>
// kernel: discriminator_forward.5
= control target key start
LH: loop header
LB: loop body
LE: loop exit
PB: predicated region body
PF: predicated region fallthrough
CT: control target
= control target key end

     0   :  { %s1171_s12 = smov 0   ;;  %s1173_s13 = smov 0   ;;  %s1359_s0 = inlined_call_operand.vmem [shape: bf16[2,1,256,48], index: 0, kind: input, shape index: {}]   ;;  %s1360_s1 = inlined_call_operand.vmem [shape: bf16[1,48,8], index: 1, kind: input, shape index: {}]   ;;  %s1361_s2 = inlined_call_operand.vmem [shape: f32[1,8], index: 2, kind: input, shape index: {}]   ;;  %s1362_s3 = inlined_call_operand.vmem [shape: bf16[2,256,8], index: 3, kind: output, shape index: {}]  }
   0x1   :  { %s1175_s14 = smov 0  }
   0x2 LB: > { %s25_s15 = sadd.s32 1, %s1145_s13  ;;  %p912_p0 = scmp.ge.s32.totalorder %s1149_s14, 1  ;;  %s1149_s14 = sphi %s1175_s14, %s13_s14   ;;  %s1145_s13 = sphi %s1173_s13, %s1364_s13   ;;  %s1141_s12 = sphi %s1171_s12, %s1363_s12  }
   0x3   : > { %p27_p1 = scmp.ge.s32.totalorder %s25_s15, 2  ;;  %p158_p2 = scmp.lt.s32.totalorder %s1149_s14, 3 }
   0x5   : > { %s1366_s15 = smov (%p27_p1, %s25_s15), 0  ;;  %p159_p3 = pnand %p912_p0, %p158_p2 }
   0x6   : > { %p191_p4 = scmp.lt.s32.totalorder (!%p159_p3), %s1141_s12, 1 }
   0x7   : > { %162 = sbr.rel (%p159_p3) target bundleno = 265 (0x109), region = 32 }
   0xc   : > { %v1108_v0 = vld [vmem:[%s1360_s1 + $0x10] sm:$0xff]   ;;  %v1109_v1 = vld [vmem:[%s1360_s1 + $0x8] sm:$0xff]   ;;  %s1368_s12 = smov (!%p191_p4, %s1141_s12), 1  ;;  %v1110_v2 = vld [vmem:[%s1360_s1] sm:$0xff]   ;;  %vm354_vm0 = vcmask 392192   ;;  %vm788_vm3 = vcmask 60416  }
   0xd   : > { %1040 = vmatprep.subr.bf16.mxu0 %v1108_v0  ;;  %1078 = vmatprep.subr.bf16.mxu1 %v1108_v0  ;;  %s987_s22 = sshll.u32 %s1368_s12, 7  ;;  %v1243_v19 = vld [vmem:[%s1361_s2] ss:$0 sm:$0xff] }
   0xe   : > { %1041 = vmatpush3.bf16.msra.mxu0 %v1108_v0  ;;  %1081 = vmatpush3.bf16.msra.mxu1 %v1108_v0  ;;  %s1206_s25 = scalar_lea.vmem %s1359_s0, %s987_s22  ;;  %s1254_s30 = scalar_lea.vmem %s1362_s3, %s987_s22 }
   0xf   : > { %1042 = vmatprep.subr.bf16.mxu0 %v1109_v1  ;;  %1079 = vmatprep.subr.bf16.mxu1 %v1109_v1  ;;  %v1111_v3 = vld [vmem:[%s1206_s25] sm:$0xff]   ;;  %v1113_v5 = vld [vmem:[%s1206_s25 + $0x8] sm:$0xff]   ;;  %v1115_v7 = vld [vmem:[%s1206_s25 + $0x10] sm:$0xff]  }
  0x10   : > { %v1112_v4 = vld [vmem:[%s1206_s25 + $0x40] sm:$0xff]   ;;  %1046 = vmatprep.mubr.msk.bf16.mxu0 %vm354_vm0, %v1111_v3  ;;  %v1114_v6 = vld [vmem:[%s1206_s25 + $0x48] sm:$0xff]   ;;  %v1116_v8 = vld [vmem:[%s1206_s25 + $0x50] sm:$0xff]  }
  0x11   : > { %1062 = vmatprep.mubr.msk.bf16.mxu1 %vm354_vm0, %v1112_v4  ;;  %v1117_v9 = vld [vmem:[%s1206_s25 + $0x18] sm:$0xff]   ;;  %v1119_v11 = vld [vmem:[%s1206_s25 + $0x20] sm:$0xff]   ;;  %v1121_v13 = vld [vmem:[%s1206_s25 + $0x28] sm:$0xff]  }
  0x12   : > { %1043 = vmatpush3.bf16.msra.mxu0 %v1109_v1  ;;  %1082 = vmatpush3.bf16.msra.mxu1 %v1109_v1  ;;  %v1118_v10 = vld [vmem:[%s1206_s25 + $0x58] sm:$0xff]   ;;  %v1120_v12 = vld [vmem:[%s1206_s25 + $0x60] sm:$0xff]   ;;  %v1122_v14 = vld [vmem:[%s1206_s25 + $0x68] sm:$0xff]  }
  0x13   : > { %1044 = vmatprep.subr.bf16.mxu0 %v1110_v2  ;;  %1080 = vmatprep.subr.bf16.mxu1 %v1110_v2  ;;  %v1123_v15 = vld [vmem:[%s1206_s25 + $0x30] sm:$0xff]   ;;  %v1125_v17 = vld [vmem:[%s1206_s25 + $0x38] sm:$0xff]  }
  0x14   : > { %v1124_v16 = vld [vmem:[%s1206_s25 + $0x70] sm:$0xff]   ;;  %v1126_v18 = vld [vmem:[%s1206_s25 + $0x78] sm:$0xff]  }
  0x16   : > { %1045 = vmatpush3.bf16.msra.mxu0 %v1110_v2  ;;  %1083 = vmatpush3.bf16.msra.mxu1 %v1110_v2 }
  0x19   : > { %1047 = vmatmul.mubr.msk.bf16.vlgmr.msra.gmra.mxu0 %vm354_vm0, %v1113_v5  ;;  %1063 = vmatmul.mubr.msk.bf16.vlgmr.msra.gmra.mxu1 %vm354_vm0, %v1114_v6 }
  0x1a   : > { %1050 = vmatprep.mubr.msk.bf16.mxu0 %vm354_vm0, %v1115_v7  ;;  %1066 = vmatprep.mubr.msk.bf16.mxu1 %vm354_vm0, %v1116_v8 }
  0x21   : > { %1051 = vmatmul.mubr.msk.bf16.gmra.mxu0 %vm354_vm0, %v1117_v9  ;;  %1067 = vmatmul.mubr.msk.bf16.gmra.mxu1 %vm354_vm0, %v1118_v10 }
  0x22   : > { %1054 = vmatprep.mubr.msk.bf16.mxu0 %vm354_vm0, %v1119_v11  ;;  %1070 = vmatprep.mubr.msk.bf16.mxu1 %vm354_vm0, %v1120_v12 }
  0x29   : > { %1055 = vmatmul.mubr.msk.bf16.gmra.mxu0 %vm354_vm0, %v1121_v13  ;;  %1071 = vmatmul.mubr.msk.bf16.gmra.mxu1 %vm354_vm0, %v1122_v14 }
  0x2a   : > { %1058 = vmatprep.mubr.msk.bf16.mxu0 %vm354_vm0, %v1123_v15  ;;  %1074 = vmatprep.mubr.msk.bf16.mxu1 %vm354_vm0, %v1124_v16 }
  0x31   : > { %1059 = vmatmul.mubr.msk.bf16.gmra.mxu0 %vm354_vm0, %v1125_v17  ;;  %1075 = vmatmul.mubr.msk.bf16.gmra.mxu1 %vm354_vm0, %v1126_v18 }
  0xd9   : > { %v1048_v20 = vpop.f32.mrf.mxu0  ;;  %v1064_v21 = vpop.f32.mrf.mxu1 }
  0xda   : > { %v446_v22 = vadd.f32 %v1048_v20, %v1243_v19  ;;  %v510_v23 = vadd.f32 %v1064_v21, %v1243_v19 }
  0xdb   : > { %v437_v24 = vpop.f32.mrf.mxu0  ;;  %v501_v25 = vpop.f32.mrf.mxu1 }
  0xdc   : > { %vm566_vm1 = vcmp.ge.f32.partialorder %v446_v22, 0.0  ;;  %v598_v26 = vmul.f32 0.2, %v446_v22  ;;  %vm582_vm2 = vcmp.ge.f32.partialorder %v510_v23, 0.0  ;;  %v614_v27 = vmul.f32 0.2, %v510_v23 }
  0xdd   : > { %v438_v28 = vadd.f32 %v1243_v19, %v437_v24  ;;  %v502_v29 = vadd.f32 %v1243_v19, %v501_v25  ;;  %v1049_v30 = vpop.f32.mrf.mxu0  ;;  %v1065_v31 = vpop.f32.mrf.mxu1 }
  0xde   : > { %v630_v32 = vsel %vm566_vm1, %v446_v22, %v598_v26  ;;  %v646_v33 = vsel %vm582_vm2, %v510_v23, %v614_v27  ;;  %v449_v34 = vadd.f32 %v1049_v30, %v1243_v19  ;;  %v513_v35 = vadd.f32 %v1065_v31, %v1243_v19 }
  0xdf   : > { %v991_v36 = vpack.c.bf16 %v630_v32, %v630_v32  ;;  %v1007_v37 = vpack.c.bf16 %v646_v33, %v646_v33  ;;  %vm564_vm4 = vcmp.ge.f32.partialorder %v438_v28, 0.0  ;;  %v596_v38 = vmul.f32 0.2, %v438_v28  ;;  %v440_v39 = vpop.f32.mrf.mxu0  ;;  %v504_v40 = vpop.f32.mrf.mxu1 }
  0xe0   : > { %vm580_vm5 = vcmp.ge.f32.partialorder %v502_v29, 0.0  ;;  %v612_v41 = vmul.f32 0.2, %v502_v29  ;;  %vm567_vm6 = vcmp.ge.f32.partialorder %v449_v34, 0.0  ;;  %v599_v42 = vmul.f32 0.2, %v449_v34 }
  0xe1   : > { %791 = vst.msk [vmem:[%s1254_s30 + $0x8] sm:$0xf] %vm788_vm3, %v991_v36  ;;  %807 = vst.msk [vmem:[%s1254_s30 + $0x48] sm:$0xf] %vm788_vm3, %v1007_v37  ;;  %v628_v43 = vsel %vm564_vm4, %v438_v28, %v596_v38  ;;  %vm583_vm7 = vcmp.ge.f32.partialorder %v513_v35, 0.0  ;;  %v441_v45 = vadd.f32 %v1243_v19, %v440_v39  ;;  %v1052_v46 = vpop.f32.mrf.mxu0  ;;  %v1068_v47 = vpop.f32.mrf.mxu1  ;;  %v505_v51 = vadd.f32 %v1243_v19, %v504_v40 }
  0xe2   : > { %v615_v44 = vmul.f32 0.2, %v513_v35  ;;  %v989_v48 = vpack.c.bf16 %v628_v43, %v628_v43  ;;  %v644_v49 = vsel %vm580_vm5, %v502_v29, %v612_v41  ;;  %v631_v50 = vsel %vm567_vm6, %v449_v34, %v599_v42 }
  0xe3   : > { %v1005_v52 = vpack.c.bf16 %v644_v49, %v644_v49  ;;  %v992_v53 = vpack.c.bf16 %v631_v50, %v631_v50  ;;  %vm565_vm8 = vcmp.ge.f32.partialorder %v441_v45, 0.0  ;;  %v453_v55 = vpop.f32.mrf.mxu0  ;;  %v517_v56 = vpop.f32.mrf.mxu1  ;;  %v597_v58 = vmul.f32 0.2, %v441_v45 }
  0xe4   : > { %v647_v54 = vsel %vm583_vm7, %v513_v35, %v615_v44  ;;  %789 = vst.msk [vmem:[%s1254_s30] sm:$0xf] %vm788_vm3, %v989_v48  ;;  %vm581_vm9 = vcmp.ge.f32.partialorder %v505_v51, 0.0  ;;  %v613_v59 = vmul.f32 0.2, %v505_v51  ;;  %v462_v60 = vadd.f32 %v1052_v46, %v1243_v19 }
  0xe5   : > { %v1008_v57 = vpack.c.bf16 %v647_v54, %v647_v54  ;;  %805 = vst.msk [vmem:[%s1254_s30 + $0x40] sm:$0xf] %vm788_vm3, %v1005_v52  ;;  %792 = vst.msk [vmem:[%s1254_s30 + $0xc] sm:$0xf] %vm788_vm3, %v992_v53  ;;  %v526_v61 = vadd.f32 %v1068_v47, %v1243_v19  ;;  %v454_v62 = vadd.f32 %v1243_v19, %v453_v55  ;;  %v1053_v0 = vpop.f32.mrf.mxu0  ;;  %v1069_v1 = vpop.f32.mrf.mxu1 }
  0xe6   : > { %v518_v63 = vadd.f32 %v1243_v19, %v517_v56  ;;  %v629_v2 = vsel %vm565_vm8, %v441_v45, %v597_v58  ;;  %v645_v3 = vsel %vm581_vm9, %v505_v51, %v613_v59  ;;  %v465_v4 = vadd.f32 %v1053_v0, %v1243_v19 }
  0xe7   : > { %808 = vst.msk [vmem:[%s1254_s30 + $0x4c] sm:$0xf] %vm788_vm3, %v1008_v57  ;;  %v529_v5 = vadd.f32 %v1069_v1, %v1243_v19  ;;  %v990_v6 = vpack.c.bf16 %v629_v2, %v629_v2  ;;  %v1006_v7 = vpack.c.bf16 %v645_v3, %v645_v3  ;;  %vm570_vm10 = vcmp.ge.f32.partialorder %v462_v60, 0.0  ;;  %v456_v9 = vpop.f32.mrf.mxu0  ;;  %v520_v10 = vpop.f32.mrf.mxu1 }
  0xe8   : > { %v602_v8 = vmul.f32 0.2, %v462_v60  ;;  %vm586_vm11 = vcmp.ge.f32.partialorder %v526_v61, 0.0  ;;  %v618_v11 = vmul.f32 0.2, %v526_v61  ;;  %vm568_vm12 = vcmp.ge.f32.partialorder %v454_v62, 0.0 }
  0xe9   : > { %v600_v12 = vmul.f32 0.2, %v454_v62  ;;  %790 = vst.msk [vmem:[%s1254_s30 + $0x4] sm:$0xf] %vm788_vm3, %v990_v6  ;;  %806 = vst.msk [vmem:[%s1254_s30 + $0x44] sm:$0xf] %vm788_vm3, %v1006_v7  ;;  %v1056_v15 = vpop.f32.mrf.mxu0  ;;  %v1072_v16 = vpop.f32.mrf.mxu1  ;;  %v457_v30 = vadd.f32 %v1243_v19, %v456_v9  ;;  %v521_v32 = vadd.f32 %v1243_v19, %v520_v10 }
  0xea   : > { %v634_v13 = vsel %vm570_vm10, %v462_v60, %v602_v8  ;;  %vm584_vm13 = vcmp.ge.f32.partialorder %v518_v63, 0.0  ;;  %v616_v14 = vmul.f32 0.2, %v518_v63  ;;  %vm571_vm14 = vcmp.ge.f32.partialorder %v465_v4, 0.0 }
  0xeb   : > { %v995_v17 = vpack.c.bf16 %v634_v13, %v634_v13  ;;  %v650_v18 = vsel %vm586_vm11, %v526_v61, %v618_v11  ;;  %v632_v20 = vsel %vm568_vm12, %v454_v62, %v600_v12  ;;  %v603_v21 = vmul.f32 0.2, %v465_v4  ;;  %v469_v25 = vpop.f32.mrf.mxu0  ;;  %v533_v26 = vpop.f32.mrf.mxu1 }
  0xec   : > { %v1011_v22 = vpack.c.bf16 %v650_v18, %v650_v18  ;;  %v993_v23 = vpack.c.bf16 %v632_v20, %v632_v20  ;;  %v648_v24 = vsel %vm584_vm13, %v518_v63, %v616_v14  ;;  %vm587_vm15 = vcmp.ge.f32.partialorder %v529_v5, 0.0 }
  0xed   : > { %795 = vst.msk [vmem:[%s1254_s30 + $0x18] sm:$0xf] %vm788_vm3, %v995_v17  ;;  %v1009_v27 = vpack.c.bf16 %v648_v24, %v648_v24  ;;  %v635_v28 = vsel %vm571_vm14, %v465_v4, %v603_v21  ;;  %v619_v29 = vmul.f32 0.2, %v529_v5  ;;  %v478_v33 = vadd.f32 %v1056_v15, %v1243_v19  ;;  %v1057_v35 = vpop.f32.mrf.mxu0  ;;  %v1073_v36 = vpop.f32.mrf.mxu1 }
  0xee   : > { %811 = vst.msk [vmem:[%s1254_s30 + $0x58] sm:$0xf] %vm788_vm3, %v1011_v22  ;;  %793 = vst.msk [vmem:[%s1254_s30 + $0x10] sm:$0xf] %vm788_vm3, %v993_v23  ;;  %v996_v31 = vpack.c.bf16 %v635_v28, %v635_v28  ;;  %v542_v34 = vadd.f32 %v1072_v16, %v1243_v19  ;;  %vm569_vm0 = vcmp.ge.f32.partialorder %v457_v30, 0.0  ;;  %v470_v39 = vadd.f32 %v1243_v19, %v469_v25 }
  0xef   : > { %809 = vst.msk [vmem:[%s1254_s30 + $0x50] sm:$0xf] %vm788_vm3, %v1009_v27  ;;  %v651_v37 = vsel %vm587_vm15, %v529_v5, %v619_v29  ;;  %v601_v38 = vmul.f32 0.2, %v457_v30  ;;  %vm585_vm1 = vcmp.ge.f32.partialorder %v521_v32, 0.0  ;;  %vm574_vm2 = vcmp.ge.f32.partialorder %v478_v33, 0.0  ;;  %v472_v42 = vpop.f32.mrf.mxu0  ;;  %v536_v43 = vpop.f32.mrf.mxu1 }
  0xf0   : > { %796 = vst.msk [vmem:[%s1254_s30 + $0x1c] sm:$0xf] %vm788_vm3, %v996_v31  ;;  %v1012_v40 = vpack.c.bf16 %v651_v37, %v651_v37  ;;  %v617_v41 = vmul.f32 0.2, %v521_v32  ;;  %v606_v45 = vmul.f32 0.2, %v478_v33  ;;  %v534_v55 = vadd.f32 %v1243_v19, %v533_v26 }
  0xf1   : > { %v633_v44 = vsel %vm569_vm0, %v457_v30, %v601_v38  ;;  %vm590_vm4 = vcmp.ge.f32.partialorder %v542_v34, 0.0  ;;  %v622_v46 = vmul.f32 0.2, %v542_v34  ;;  %vm572_vm5 = vcmp.ge.f32.partialorder %v470_v39, 0.0  ;;  %v1060_v50 = vpop.f32.mrf.mxu0  ;;  %v1076_v51 = vpop.f32.mrf.mxu1 }
  0xf2   : > { %812 = vst.msk [vmem:[%s1254_s30 + $0x5c] sm:$0xf] %vm788_vm3, %v1012_v40  ;;  %v994_v47 = vpack.c.bf16 %v633_v44, %v633_v44  ;;  %v649_v48 = vsel %vm585_vm1, %v521_v32, %v617_v41  ;;  %v604_v49 = vmul.f32 0.2, %v470_v39  ;;  %v638_v53 = vsel %vm574_vm2, %v478_v33, %v606_v45 }
  0xf3   : > { %v1010_v52 = vpack.c.bf16 %v649_v48, %v649_v48  ;;  %v654_v54 = vsel %vm590_vm4, %v542_v34, %v622_v46  ;;  %v999_v56 = vpack.c.bf16 %v638_v53, %v638_v53  ;;  %v481_v59 = vadd.f32 %v1057_v35, %v1243_v19  ;;  %v485_v60 = vpop.f32.mrf.mxu0  ;;  %v549_v0 = vpop.f32.mrf.mxu1 }
  0xf4   : > { %794 = vst.msk [vmem:[%s1254_s30 + $0x14] sm:$0xf] %vm788_vm3, %v994_v47  ;;  %v1015_v57 = vpack.c.bf16 %v654_v54, %v654_v54  ;;  %v636_v58 = vsel %vm572_vm5, %v470_v39, %v604_v49  ;;  %vm588_vm6 = vcmp.ge.f32.partialorder %v534_v55, 0.0  ;;  %v620_v62 = vmul.f32 0.2, %v534_v55 }
  0xf5   : > { %810 = vst.msk [vmem:[%s1254_s30 + $0x54] sm:$0xf] %vm788_vm3, %v1010_v52  ;;  %v997_v61 = vpack.c.bf16 %v636_v58, %v636_v58  ;;  %v545_v63 = vadd.f32 %v1073_v36, %v1243_v19  ;;  %799 = vst.msk [vmem:[%s1254_s30 + $0x28] sm:$0xf] %vm788_vm3, %v999_v56  ;;  %vm575_vm7 = vcmp.ge.f32.partialorder %v481_v59, 0.0  ;;  %v473_v2 = vadd.f32 %v1243_v19, %v472_v42  ;;  %v1061_v10 = vpop.f32.mrf.mxu0  ;;  %v1077_v14 = vpop.f32.mrf.mxu1 }
  0xf6   : > { %815 = vst.msk [vmem:[%s1254_s30 + $0x68] sm:$0xf] %vm788_vm3, %v1015_v57  ;;  %v607_v1 = vmul.f32 0.2, %v481_v59  ;;  %v537_v3 = vadd.f32 %v1243_v19, %v536_v43  ;;  %v652_v4 = vsel %vm588_vm6, %v534_v55, %v620_v62  ;;  %v494_v6 = vadd.f32 %v1060_v50, %v1243_v19 }
  0xf7   : > { %797 = vst.msk [vmem:[%s1254_s30 + $0x20] sm:$0xf] %vm788_vm3, %v997_v61  ;;  %vm591_vm8 = vcmp.ge.f32.partialorder %v545_v63, 0.0  ;;  %v623_v5 = vmul.f32 0.2, %v545_v63  ;;  %v1013_v7 = vpack.c.bf16 %v652_v4, %v652_v4  ;;  %vm573_vm9 = vcmp.ge.f32.partialorder %v473_v2, 0.0  ;;  %v488_v27 = vpop.f32.mrf.mxu0  ;;  %v552_v30 = vpop.f32.mrf.mxu1 }
  0xf8   : > { %v639_v8 = vsel %vm575_vm7, %v481_v59, %v607_v1  ;;  %v605_v9 = vmul.f32 0.2, %v473_v2  ;;  %vm589_vm10 = vcmp.ge.f32.partialorder %v537_v3, 0.0  ;;  %v621_v13 = vmul.f32 0.2, %v537_v3 }
  0xf9   : > { %v1000_v11 = vpack.c.bf16 %v639_v8, %v639_v8  ;;  %v655_v12 = vsel %vm591_vm8, %v545_v63, %v623_v5  ;;  %813 = vst.msk [vmem:[%s1254_s30 + $0x60] sm:$0xf] %vm788_vm3, %v1013_v7  ;;  %vm578_vm11 = vcmp.ge.f32.partialorder %v494_v6, 0.0  ;;  %v610_v17 = vmul.f32 0.2, %v494_v6 }
  0xfa   : > { %v1016_v15 = vpack.c.bf16 %v655_v12, %v655_v12  ;;  %v637_v16 = vsel %vm573_vm9, %v473_v2, %v605_v9  ;;  %v653_v20 = vsel %vm589_vm10, %v537_v3, %v621_v13  ;;  %v558_v21 = vadd.f32 %v1076_v51, %v1243_v19 }
  0xfb   : > { %800 = vst.msk [vmem:[%s1254_s30 + $0x2c] sm:$0xf] %vm788_vm3, %v1000_v11  ;;  %v998_v18 = vpack.c.bf16 %v637_v16, %v637_v16  ;;  %v486_v22 = vadd.f32 %v1243_v19, %v485_v60  ;;  %v1014_v23 = vpack.c.bf16 %v653_v20, %v653_v20  ;;  %v642_v24 = vsel %vm578_vm11, %v494_v6, %v610_v17 }
  0xfc   : > { %816 = vst.msk [vmem:[%s1254_s30 + $0x6c] sm:$0xf] %vm788_vm3, %v1016_v15  ;;  %v550_v25 = vadd.f32 %v1243_v19, %v549_v0  ;;  %v497_v26 = vadd.f32 %v1061_v10, %v1243_v19  ;;  %v1003_v28 = vpack.c.bf16 %v642_v24, %v642_v24  ;;  %vm594_vm12 = vcmp.ge.f32.partialorder %v558_v21, 0.0 }
  0xfd   : > { %798 = vst.msk [vmem:[%s1254_s30 + $0x24] sm:$0xf] %vm788_vm3, %v998_v18  ;;  %v626_v29 = vmul.f32 0.2, %v558_v21  ;;  %vm576_vm13 = vcmp.ge.f32.partialorder %v486_v22, 0.0  ;;  %v561_v35 = vadd.f32 %v1077_v14, %v1243_v19  ;;  %v489_v36 = vadd.f32 %v1243_v19, %v488_v27 }
  0xfe   : > { %814 = vst.msk [vmem:[%s1254_s30 + $0x64] sm:$0xf] %vm788_vm3, %v1014_v23  ;;  %v608_v31 = vmul.f32 0.2, %v486_v22  ;;  %vm592_vm14 = vcmp.ge.f32.partialorder %v550_v25, 0.0  ;;  %vm579_vm15 = vcmp.ge.f32.partialorder %v497_v26, 0.0  ;;  %v553_v40 = vadd.f32 %v1243_v19, %v552_v30 }
  0xff   : > { %v624_v32 = vmul.f32 0.2, %v550_v25  ;;  %803 = vst.msk [vmem:[%s1254_s30 + $0x38] sm:$0xf] %vm788_vm3, %v1003_v28  ;;  %v658_v33 = vsel %vm594_vm12, %v558_v21, %v626_v29  ;;  %v611_v34 = vmul.f32 0.2, %v497_v26 }
 0x100   : > { %v1019_v37 = vpack.c.bf16 %v658_v33, %v658_v33  ;;  %v640_v38 = vsel %vm576_vm13, %v486_v22, %v608_v31  ;;  %vm595_vm0 = vcmp.ge.f32.partialorder %v561_v35, 0.0  ;;  %v627_v45 = vmul.f32 0.2, %v561_v35 }
 0x101   : > { %v656_v39 = vsel %vm592_vm14, %v550_v25, %v624_v32  ;;  %v1001_v41 = vpack.c.bf16 %v640_v38, %v640_v38  ;;  %v643_v43 = vsel %vm579_vm15, %v497_v26, %v611_v34  ;;  %vm577_vm1 = vcmp.ge.f32.partialorder %v489_v36, 0.0 }
 0x102   : > { %v1017_v42 = vpack.c.bf16 %v656_v39, %v656_v39  ;;  %819 = vst.msk [vmem:[%s1254_s30 + $0x78] sm:$0xf] %vm788_vm3, %v1019_v37  ;;  %v1004_v44 = vpack.c.bf16 %v643_v43, %v643_v43  ;;  %v609_v46 = vmul.f32 0.2, %v489_v36  ;;  %vm593_vm2 = vcmp.ge.f32.partialorder %v553_v40, 0.0 }
 0x103   : > { %801 = vst.msk [vmem:[%s1254_s30 + $0x30] sm:$0xf] %vm788_vm3, %v1001_v41  ;;  %v625_v47 = vmul.f32 0.2, %v553_v40  ;;  %v659_v19 = vsel %vm595_vm0, %v561_v35, %v627_v45 }
 0x104   : > { %817 = vst.msk [vmem:[%s1254_s30 + $0x70] sm:$0xf] %vm788_vm3, %v1017_v42  ;;  %804 = vst.msk [vmem:[%s1254_s30 + $0x3c] sm:$0xf] %vm788_vm3, %v1004_v44  ;;  %v641_v48 = vsel %vm577_vm1, %v489_v36, %v609_v46  ;;  %v1020_v49 = vpack.c.bf16 %v659_v19, %v659_v19 }
 0x105   : > { %v1002_v50 = vpack.c.bf16 %v641_v48, %v641_v48  ;;  %v657_v51 = vsel %vm593_vm2, %v553_v40, %v625_v47 }
 0x106   : > { %v1018_v52 = vpack.c.bf16 %v657_v51, %v657_v51  ;;  %820 = vst.msk [vmem:[%s1254_s30 + $0x7c] sm:$0xf] %vm788_vm3, %v1020_v49 }
 0x107   : > { %802 = vst.msk [vmem:[%s1254_s30 + $0x34] sm:$0xf] %vm788_vm3, %v1002_v50 }
 0x108   : > { %818 = vst.msk [vmem:[%s1254_s30 + $0x74] sm:$0xf] %vm788_vm3, %v1018_v52 }
 0x109 PF: > { %s13_s14 = sadd.s32 1, %s1149_s14   ;;  %s1363_s12 = smov %s1145_s13 }
 0x10a   : > { %p10_p5 = scmp.ge.s32.totalorder %s13_s14, 4   ;;  %s1364_s13 = smov %s1366_s15 }
 0x10c   :  { %12 = sbr.rel (!%p10_p5) target bundleno = 2 (0x2), region = 62 }

// kernel: discriminator_forward.6
= control target key start
LH: loop header
LB: loop body
LE: loop exit
PB: predicated region body
PF: predicated region fallthrough
CT: control target
= control target key end

     0   :  { %s1047_s21 = smov 0   ;;  %s1049_s22 = smov 0   ;;  %s1193_s0 = inlined_call_operand.vmem [shape: bf16[2,1,64,128], index: 0, kind: input, shape index: {}]   ;;  %s1194_s1 = inlined_call_operand.vmem [shape: bf16[1,128,16], index: 1, kind: input, shape index: {}]   ;;  %s1195_s2 = inlined_call_operand.vmem [shape: f32[1,16], index: 2, kind: input, shape index: {}]   ;;  %s1196_s3 = inlined_call_operand.vmem [shape: f32[1,64,1], index: 3, kind: input, shape index: {}]   ;;  %s1197_s4 = inlined_call_operand.vmem [shape: bf16[2,64,16], index: 4, kind: output, shape index: {0}]   ;;  %s1198_s5 = inlined_call_operand.vmem [shape: f32[2,1,8,16], index: 5, kind: output, shape index: {1}]   ;;  %s1199_s6 = inlined_call_operand.vmem [shape: f32[2,1,8,16], index: 6, kind: output, shape index: {2}]  }
   0x1   :  { %s1051_s23 = smov 0  }
   0x2 LB: > { %s29_s24 = sadd.s32 1, %s1005_s22  ;;  %p856_p0 = scmp.ge.s32.totalorder %s1009_s23, 1  ;;  %s1009_s23 = sphi %s1051_s23, %s17_s23   ;;  %s1005_s22 = sphi %s1049_s22, %s1201_s22   ;;  %s1001_s21 = sphi %s1047_s21, %s1200_s21  }
   0x3   : > { %p31_p1 = scmp.ge.s32.totalorder %s29_s24, 2  ;;  %p252_p2 = scmp.lt.s32.totalorder %s1009_s23, 3 }
   0x5   : > { %s1203_s24 = smov (%p31_p1, %s29_s24), 0  ;;  %p253_p3 = pnand %p856_p0, %p252_p2 }
   0x6   : > { %p310_p4 = scmp.lt.s32.totalorder (!%p253_p3), %s1001_s21, 1 }
   0x7   : > { %256 = sbr.rel (%p253_p3) target bundleno = 278 (0x116), region = 36 }
   0xc   : > { %v975_v0 = vld [vmem:[%s1194_s1 + $0x38] sm:$0xff]   ;;  %v976_v1 = vld [vmem:[%s1194_s1 + $0x30] sm:$0xff]   ;;  %s1205_s21 = smov (!%p310_p4, %s1001_s21), 1  ;;  %v977_v2 = vld [vmem:[%s1194_s1 + $0x28] sm:$0xff]   ;;  %v1011_v3 = vmov 0   ;;  %vm658_vm0 = vcmask 125952  }
   0xd   : > { %908 = vmatprep.subr.bf16.mxu0 %v975_v0  ;;  %932 = vmatprep.subr.bf16.mxu1 %v975_v0  ;;  %s886_s7 = sshll.u32 %s1205_s21, 5  ;;  %v978_v4 = vld [vmem:[%s1194_s1 + $0x20] sm:$0xff]   ;;  %v979_v7 = vld [vmem:[%s1194_s1 + $0x18] sm:$0xff]   ;;  %v519_v9 = vld [vmem:[%s1196_s3 + $0x10] sm:$0xff]  ;;  %vm573_vm1 = vcmask 130048  }
   0xe   : > { %909 = vmatpush3.bf16.msra.mxu0 %v975_v0  ;;  %940 = vmatpush3.bf16.msra.mxu1 %v975_v0  ;;  %s1082_s10 = scalar_lea.vmem %s1193_s0, %s886_s7  ;;  %v517_v8 = vld [vmem:[%s1196_s3] sm:$0xff]  ;;  %v518_v10 = vld [vmem:[%s1196_s3 + $0x8] sm:$0xff]  ;;  %v520_v11 = vld [vmem:[%s1196_s3 + $0x18] sm:$0xff] }
   0xf   : > { %910 = vmatprep.subr.bf16.mxu0 %v976_v1  ;;  %933 = vmatprep.subr.bf16.mxu1 %v976_v1  ;;  %v983_v5 = vld [vmem:[%s1082_s10] sm:$0xff]   ;;  %v984_v6 = vld [vmem:[%s1082_s10 + $0x10] sm:$0xff]   ;;  %v522_v14 = vld [vmem:[%s1196_s3 + $0x28] sm:$0xff] }
  0x10   : > { %973 = vset.pattern.permute.xlu0 %v1011_v3  ;;  %974 = vset.pattern.permute.xlu1 %v1011_v3  ;;  %v980_v12 = vld [vmem:[%s1194_s1 + $0x10] sm:$0xff]   ;;  %v521_v13 = vld [vmem:[%s1196_s3 + $0x20] sm:$0xff]  ;;  %v981_v15 = vld [vmem:[%s1194_s1 + $0x8] sm:$0xff]  }
  0x11   : > { %924 = vmatprep.mubr.bf16.mxu0 %v983_v5  ;;  %928 = vmatprep.mubr.bf16.mxu1 %v984_v6  ;;  %v523_v16 = vld [vmem:[%s1196_s3 + $0x30] sm:$0xff]  ;;  %v524_v17 = vld [vmem:[%s1196_s3 + $0x38] sm:$0xff]  ;;  %v982_v18 = vld [vmem:[%s1194_s1] sm:$0xff]  }
  0x12   : > { %911 = vmatpush3.bf16.msra.mxu0 %v976_v1  ;;  %941 = vmatpush3.bf16.msra.mxu1 %v976_v1  ;;  %v985_v19 = vld [vmem:[%s1082_s10 + $0x8] sm:$0xff]   ;;  %v986_v20 = vld [vmem:[%s1082_s10 + $0x18] sm:$0xff]   ;;  %v863_v23 = vld [vmem:[%s1195_s2] ss:$0 sm:$0xff]  ;;  %s1137_s10 = scalar_lea.vmem %s1197_s4, %s886_s7  ;;  %s861_s7 = sshll.u32 %s1205_s21, 3 }
  0x13   : > { %912 = vmatprep.subr.bf16.mxu0 %v977_v2  ;;  %934 = vmatprep.subr.bf16.mxu1 %v977_v2  ;;  %s340_s29 = scalar_lea.vmem %s1198_s5, %s861_s7  ;;  %s347_s9 = scalar_lea.vmem %s1199_s6, %s861_s7 }
  0x14   : > { %527 = vperm.xlu0 %973, %v517_v8   ;;  %537 = vperm.xlu1 %974, %v519_v9  }
  0x16   : > { %913 = vmatpush3.bf16.msra.mxu0 %v977_v2  ;;  %942 = vmatpush3.bf16.msra.mxu1 %v977_v2 }
  0x17   : > { %914 = vmatprep.subr.bf16.mxu0 %v978_v4  ;;  %935 = vmatprep.subr.bf16.mxu1 %v978_v4 }
  0x18   : > { %532 = vperm.xlu0 %973, %v518_v10   ;;  %542 = vperm.xlu1 %974, %v520_v11  }
  0x1a   : > { %915 = vmatpush3.bf16.msra.mxu0 %v978_v4  ;;  %943 = vmatpush3.bf16.msra.mxu1 %v978_v4 }
  0x1b   : > { %916 = vmatprep.subr.bf16.mxu0 %v979_v7  ;;  %936 = vmatprep.subr.bf16.mxu1 %v979_v7 }
  0x1c   : > { %547 = vperm.xlu0 %973, %v521_v13   ;;  %552 = vperm.xlu1 %974, %v522_v14  }
  0x1e   : > { %917 = vmatpush3.bf16.msra.mxu0 %v979_v7  ;;  %944 = vmatpush3.bf16.msra.mxu1 %v979_v7 }
  0x1f   : > { %918 = vmatprep.subr.bf16.mxu0 %v980_v12  ;;  %937 = vmatprep.subr.bf16.mxu1 %v980_v12 }
  0x20   : > { %557 = vperm.xlu0 %973, %v523_v16   ;;  %562 = vperm.xlu1 %974, %v524_v17  }
  0x22   : > { %919 = vmatpush3.bf16.msra.mxu0 %v980_v12  ;;  %945 = vmatpush3.bf16.msra.mxu1 %v980_v12 }
  0x23   : > { %920 = vmatprep.subr.bf16.mxu0 %v981_v15  ;;  %938 = vmatprep.subr.bf16.mxu1 %v981_v15 }
  0x26   : > { %921 = vmatpush3.bf16.msra.mxu0 %v981_v15  ;;  %946 = vmatpush3.bf16.msra.mxu1 %v981_v15 }
  0x27   : > { %922 = vmatprep.subr.bf16.mxu0 %v982_v18  ;;  %939 = vmatprep.subr.bf16.mxu1 %v982_v18 }
  0x2a   : > { %923 = vmatpush3.bf16.msra.mxu0 %v982_v18  ;;  %947 = vmatpush3.bf16.msra.mxu1 %v982_v18 }
  0x2d   : > { %925 = vmatmul.mubr.bf16.vlgmr.msra.gmra.mxu0 %v985_v19  ;;  %929 = vmatmul.mubr.bf16.vlgmr.msra.gmra.mxu1 %v986_v20 }
  0x8f   : > { %v528_v21 = vpop.permute.xlu0 %527  ;;  %v538_v22 = vpop.permute.xlu1 %537 }
  0x93   : > { %v533_v26 = vpop.permute.xlu0 %532  ;;  %v543_v31 = vpop.permute.xlu1 %542 }
  0x97   : > { %v548_v44 = vpop.permute.xlu0 %547  ;;  %v553_v49 = vpop.permute.xlu1 %552 }
  0x9b   : > { %v558_v63 = vpop.permute.xlu0 %557  ;;  %v563_v7 = vpop.permute.xlu1 %562 }
  0xed   : > { %v926_v24 = vpop.f32.mrf.mxu0  ;;  %v930_v25 = vpop.f32.mrf.mxu1 }
  0xee   : > { %v495_v27 = vadd.f32 %v926_v24, %v863_v23  ;;  %v1130_v28 = vadd.f32 %v930_v25, %v863_v23 }
  0xef   : > { %v486_v29 = vpop.f32.mrf.mxu0  ;;  %v502_v30 = vpop.f32.mrf.mxu1 }
  0xf0   : > { %v890_v32 = vpack.c.bf16 %v495_v27, %v495_v27  ;;  %v894_v33 = vpack.c.bf16 %v1130_v28, %v1130_v28  ;;  %v487_v34 = vadd.f32 %v863_v23, %v486_v29  ;;  %v503_v35 = vadd.f32 %v863_v23, %v502_v30 }
  0xf1   : > { %v927_v36 = vpop.f32.mrf.mxu0  ;;  %v931_v37 = vpop.f32.mrf.mxu1  ;;  %v567_v45 = vmul.f32 %v538_v22, %v495_v27  ;;  %v571_v10 = vmul.f32 %v558_v63, %v1130_v28 }
  0xf2   : > { %661 = vst.msk [vmem:[%s1137_s10 + $0x8] sm:$0xf] %vm658_vm0, %v890_v32  ;;  %665 = vst.msk [vmem:[%s1137_s10 + $0x18] sm:$0xf] %vm658_vm0, %v894_v33  ;;  %v888_v38 = vpack.c.bf16 %v487_v34, %v487_v34  ;;  %v892_v39 = vpack.c.bf16 %v503_v35, %v503_v35  ;;  %v565_v41 = vmul.f32 %v528_v21, %v487_v34 }
  0xf3   : > { %v489_v40 = vpop.f32.mrf.mxu0  ;;  %v498_v42 = vadd.f32 %v927_v36, %v863_v23  ;;  %v505_v43 = vpop.f32.mrf.mxu1  ;;  %v514_v46 = vadd.f32 %v931_v37, %v863_v23  ;;  %v597_v56 = vmul.f32 %v567_v45, %v495_v27  ;;  %v569_v59 = vmul.f32 %v548_v44, %v503_v35 }
  0xf4   : > { %659 = vst.msk [vmem:[%s1137_s10] sm:$0xf] %vm658_vm0, %v888_v38  ;;  %663 = vst.msk [vmem:[%s1137_s10 + $0x10] sm:$0xf] %vm658_vm0, %v892_v39  ;;  %v490_v48 = vadd.f32 %v863_v23, %v489_v40  ;;  %v506_v51 = vadd.f32 %v863_v23, %v505_v43  ;;  %v595_v52 = vmul.f32 %v565_v41, %v487_v34  ;;  %v574_v58 = vsel %vm573_vm1, %v565_v41, 0.0 }
  0xf5   : > { %v891_v47 = vpack.c.bf16 %v498_v42, %v498_v42  ;;  %v895_v50 = vpack.c.bf16 %v514_v46, %v514_v46  ;;  %v568_v53 = vmul.f32 %v543_v31, %v498_v42  ;;  %v577_v62 = vsel %vm573_vm1, %v567_v45, 0.0 }
  0xf6   : > { %v566_v54 = vmul.f32 %v533_v26, %v490_v48  ;;  %v889_v55 = vpack.c.bf16 %v490_v48, %v490_v48  ;;  %v893_v57 = vpack.c.bf16 %v506_v51, %v506_v51  ;;  %v603_v1 = vsel %vm573_vm1, %v595_v52, 0.0 }
  0xf7   : > { %662 = vst.msk [vmem:[%s1137_s10 + $0xc] sm:$0xf] %vm658_vm0, %v891_v47  ;;  %666 = vst.msk [vmem:[%s1137_s10 + $0x1c] sm:$0xf] %vm658_vm0, %v895_v50  ;;  %v598_v2 = vmul.f32 %v568_v53, %v498_v42  ;;  %v570_v4 = vmul.f32 %v553_v49, %v506_v51  ;;  %v606_v8 = vsel %vm573_vm1, %v597_v56, 0.0  ;;  %v599_v9 = vmul.f32 %v569_v59, %v503_v35 }
  0xf8   : > { %v575_v60 = vsel %vm573_vm1, %v566_v54, 0.0  ;;  %v596_v61 = vmul.f32 %v566_v54, %v490_v48  ;;  %660 = vst.msk [vmem:[%s1137_s10 + $0x4] sm:$0xf] %vm658_vm0, %v889_v55  ;;  %664 = vst.msk [vmem:[%s1137_s10 + $0x14] sm:$0xf] %vm658_vm0, %v893_v57  ;;  %v579_v11 = vsel %vm573_vm1, %v568_v53, 0.0  ;;  %v572_v17 = vmul.f32 %v563_v7, %v514_v46 }
  0xf9   : > { %v576_v0 = vadd.f32 %v575_v60, %v574_v58  ;;  %v581_v14 = vsel %vm573_vm1, %v569_v59, 0.0  ;;  %v608_v15 = vsel %vm573_vm1, %v598_v2, 0.0  ;;  %v600_v16 = vmul.f32 %v570_v4, %v506_v51 }
  0xfa   : > { %v604_v3 = vsel %vm573_vm1, %v596_v61, 0.0  ;;  %v610_v20 = vsel %vm573_vm1, %v599_v9, 0.0  ;;  %v601_v21 = vmul.f32 %v571_v10, %v1130_v28  ;;  %v583_v22 = vsel %vm573_vm1, %v570_v4, 0.0 }
  0xfb   : > { %v578_v5 = vadd.f32 %v577_v62, %v576_v0  ;;  %v605_v6 = vadd.f32 %v604_v3, %v603_v1  ;;  %v585_v25 = vsel %vm573_vm1, %v571_v10, 0.0  ;;  %v612_v26 = vsel %vm573_vm1, %v600_v16, 0.0 }
  0xfc   : > { %v602_v27 = vmul.f32 %v572_v17, %v514_v46  ;;  %v614_v31 = vsel %vm573_vm1, %v601_v21, 0.0  ;;  %v587_v32 = vsel %vm573_vm1, %v572_v17, 0.0 }
  0xfd   : > { %v607_v12 = vadd.f32 %v606_v8, %v605_v6  ;;  %v580_v13 = vadd.f32 %v579_v11, %v578_v5 }
  0xfe   : > { %v616_v28 = vsel %vm573_vm1, %v602_v27, 0.0 }
  0xff   : > { %v609_v18 = vadd.f32 %v608_v15, %v607_v12  ;;  %v582_v19 = vadd.f32 %v581_v14, %v580_v13 }
 0x101   : > { %v611_v23 = vadd.f32 %v610_v20, %v609_v18  ;;  %v584_v24 = vadd.f32 %v583_v22, %v582_v19 }
 0x103   : > { %v613_v29 = vadd.f32 %v612_v26, %v611_v23  ;;  %v586_v30 = vadd.f32 %v585_v25, %v584_v24 }
 0x105   : > { %v588_v33 = vadd.f32 %v587_v32, %v586_v30  ;;  %v615_v34 = vadd.f32 %v614_v31, %v613_v29 }
 0x107   : > { %v589_v35 = vrot.slane %v588_v33, 4  ;;  %v617_v36 = vadd.f32 %v616_v28, %v615_v34 }
 0x109   : > { %v590_v37 = vadd.f32 %v589_v35, %v588_v33  ;;  %v618_v38 = vrot.slane %v617_v36, 4 }
 0x10b   : > { %v591_v39 = vrot.slane %v590_v37, 2  ;;  %v619_v40 = vadd.f32 %v618_v38, %v617_v36 }
 0x10d   : > { %v592_v41 = vadd.f32 %v591_v39, %v590_v37  ;;  %v620_v42 = vrot.slane %v619_v40, 2 }
 0x10f   : > { %v593_v43 = vrot.slane %v592_v41, 1  ;;  %v621_v44 = vadd.f32 %v620_v42, %v619_v40 }
 0x111   : > { %v594_v45 = vadd.f32 %v593_v43, %v592_v41  ;;  %v622_v46 = vrot.slane %v621_v44, 1 }
 0x113   : > { %v623_v47 = vadd.f32 %v622_v46, %v621_v44  ;;  %624 = vst.msk [vmem:[%s340_s29] sm:$0xff] %vm573_vm1, %v594_v45 }
 0x115   : > { %625 = vst.msk [vmem:[%s347_s9] sm:$0xff] %vm573_vm1, %v623_v47 }
 0x116 PF: > { %s17_s23 = sadd.s32 1, %s1009_s23   ;;  %s1200_s21 = smov %s1005_s22 }
 0x117   : > { %p14_p5 = scmp.ge.s32.totalorder %s17_s23, 4   ;;  %s1201_s22 = smov %s1203_s24 }
 0x119   :  { %16 = sbr.rel (!%p14_p5) target bundleno = 2 (0x2), region = 93 }

// kernel: discriminator_forward.7
= control target key start
LH: loop header
LB: loop body
LE: loop exit
PB: predicated region body
PF: predicated region fallthrough
CT: control target
= control target key end

     0   :  { %s2268_s21 = smov 0   ;;  %s2270_s22 = smov 0   ;;  %s2487_s0 = inlined_call_operand.vmem [shape: f32[2,4,40,16], index: 0, kind: input, shape index: {}]   ;;  %s2488_s1 = inlined_call_operand.vmem [shape: bf16[16,16,32], index: 1, kind: input, shape index: {}]   ;;  %s2489_s2 = inlined_call_operand.vmem [shape: f32[1,32], index: 2, kind: input, shape index: {}]   ;;  %s2490_s3 = inlined_call_operand.vmem [shape: f32[1,32,1], index: 3, kind: input, shape index: {}]   ;;  %s2491_s4 = inlined_call_operand.vmem [shape: bf16[2,32,32], index: 4, kind: output, shape index: {0}]   ;;  %s2492_s5 = inlined_call_operand.vmem [shape: f32[2,1,8,32], index: 5, kind: output, shape index: {1}]   ;;  %s2493_s6 = inlined_call_operand.vmem [shape: f32[2,1,8,32], index: 6, kind: output, shape index: {2}]  }
   0x1   :  { %s2272_s23 = smov 0  }
   0x2 LB: > { %s29_s24 = sadd.s32 1, %s2226_s22  ;;  %p1864_p0 = scmp.ge.s32.totalorder %s2230_s23, 1  ;;  %s2230_s23 = sphi %s2272_s23, %s17_s23   ;;  %s2226_s22 = sphi %s2270_s22, %s2495_s22   ;;  %s2222_s21 = sphi %s2268_s21, %s2494_s21  }
   0x3   : > { %p31_p1 = scmp.ge.s32.totalorder %s29_s24, 2  ;;  %p245_p2 = scmp.lt.s32.totalorder %s2230_s23, 3 }
   0x5   : > { %s2497_s24 = smov (%p31_p1, %s29_s24), 0  ;;  %p246_p3 = pnand %p1864_p0, %p245_p2 }
   0x6   : > { %p298_p4 = scmp.lt.s32.totalorder (!%p246_p3), %s2222_s21, 1 }
   0x7   : > { %249 = sbr.rel (%p246_p3) target bundleno = 305 (0x131), region = 36 }
   0xc   : > { %v2192_v0 = vld [vmem:[%s2488_s1 + $0x8] sm:$0xff]   ;;  %v2193_v1 = vld [vmem:[%s2488_s1] sm:$0xff]   ;;  %s2499_s21 = smov (!%p298_p4, %s2222_s21), 1  ;;  %v2194_v2 = vld [vmem:[%s2488_s1 + $0x10] sm:$0xff]   ;;  %v2232_v4 = vmov 0   ;;  %vm360_vm0 = vcmask 130048  }
   0xd   : > { %2068 = vmatprep.subr.bf16.mxu0 %v2192_v0  ;;  %2074 = vmatprep.subr.bf16.mxu1 %v2193_v1  ;;  %v2195_v3 = vld [vmem:[%s2488_s1 + $0x18] sm:$0xff]   ;;  %s2164_s9 = smul.u32 160, %s2499_s21  ;;  %v2196_v12 = vld [vmem:[%s2488_s1 + $0x20] sm:$0xff]   ;;  %v2197_v24 = vld [vmem:[%s2488_s1 + $0x28] sm:$0xff]   ;;  %s2015_s7 = sshll.u32 %s2499_s21, 4  ;;  %vm1629_vm1 = vcmask 257024  }
   0xe   : > { %2069 = vmatpush3.bf16.msra.mxu0 %v2192_v0  ;;  %2075 = vmatpush3.bf16.msra.mxu1 %v2193_v1  ;;  %v2198_v37 = vld [vmem:[%s2488_s1 + $0x30] sm:$0xff]   ;;  %v2199_v38 = vld [vmem:[%s2488_s1 + $0x38] sm:$0xff]   ;;  %v2200_v51 = vld [vmem:[%s2488_s1 + $0x40] sm:$0xff]   ;;  %s316_s10 = scalar_lea.vmem %s2491_s4, %s2015_s7  ;;  %vm1580_vm2 = vcmask 261120   ;;  %s1868_s11 = sshll.u32 %s2499_s21, 3 }
   0xf   : > { %2080 = vmatprep.subr.bf16.mxu0 %v2194_v2  ;;  %2086 = vmatprep.subr.bf16.mxu1 %v2195_v3  ;;  %s2304_s12 = scalar_lea.vmem %s2487_s0, %s2164_s9  ;;  %v2201_v52 = vld [vmem:[%s2488_s1 + $0x48] sm:$0xff]   ;;  %v2202_v1 = vld [vmem:[%s2488_s1 + $0x50] sm:$0xff]   ;;  %s324_s15 = scalar_lea.vmem %s2492_s5, %s1868_s11 }
  0x10   : > { %2190 = vset.pattern.permute.xlu0 %v2232_v4  ;;  %2191 = vset.pattern.permute.xlu1 %v2232_v4  ;;  %v1870_v5 = vld [vmem:[%s2304_s12 + $0x28] sm:$0xff]  ;;  %v1871_v6 = vld [vmem:[%s2304_s12 + $0x30] sm:$0xff]  ;;  %v335_v7 = vld [vmem:[%s2304_s12] sm:$0xff]  ;;  %s331_s18 = scalar_lea.vmem %s2493_s6, %s1868_s11 }
  0x11   : > { %v349_v8 = vpack.c.bf16 %v1871_v6, %v1870_v5  ;;  %v336_v9 = vld [vmem:[%s2304_s12 + $0x8] sm:$0xff]  ;;  %v1872_v10 = vld [vmem:[%s2304_s12 + $0x38] sm:$0xff]  ;;  %v1873_v11 = vld [vmem:[%s2304_s12 + $0x40] sm:$0xff] }
  0x12   : > { %v339_v13 = vpack.c.bf16 %v336_v9, %v335_v7  ;;  %v350_v14 = vpack.c.bf16 %v1873_v11, %v1872_v10  ;;  %v337_v15 = vld [vmem:[%s2304_s12 + $0x10] sm:$0xff]  ;;  %v338_v16 = vld [vmem:[%s2304_s12 + $0x18] sm:$0xff]  ;;  %v1882_v17 = vld [vmem:[%s2304_s12 + $0x1] sm:$0xff] }
  0x13   : > { %2070 = vmatprep.mubr.msk.bf16.mxu0 %vm360_vm0, %v349_v8  ;;  %v340_v18 = vpack.c.bf16 %v338_v16, %v337_v15  ;;  %v1883_v19 = vld [vmem:[%s2304_s12 + $0x9] sm:$0xff]  ;;  %v1892_v21 = vld [vmem:[%s2304_s12 + $0x31] sm:$0xff]  ;;  %v1885_v26 = vld [vmem:[%s2304_s12 + $0x19] sm:$0xff] }
  0x14   : > { %v1891_v20 = vld [vmem:[%s2304_s12 + $0x29] sm:$0xff]  ;;  %2076 = vmatprep.mubr.msk.bf16.mxu1 %vm360_vm0, %v339_v13  ;;  %2071 = vmatmul.mubr.msk.bf16.vlgmr.msra.gmra.mxu0 %vm360_vm0, %v350_v14  ;;  %v483_v22 = vpack.c.bf16 %v1883_v19, %v1882_v17  ;;  %v1884_v25 = vld [vmem:[%s2304_s12 + $0x11] sm:$0xff]  ;;  %v1893_v27 = vld [vmem:[%s2304_s12 + $0x39] sm:$0xff] }
  0x15   : > { %v559_v23 = vpack.c.bf16 %v1892_v21, %v1891_v20  ;;  %2077 = vmatmul.mubr.msk.bf16.vlgmr.msra.gmra.mxu1 %vm360_vm0, %v340_v18  ;;  %2081 = vmatpush3.bf16.msra.mxu0 %v2194_v2  ;;  %v1894_v28 = vld [vmem:[%s2304_s12 + $0x41] sm:$0xff]  ;;  %v1900_v29 = vld [vmem:[%s2304_s12 + $0x50] sm:$0xff]  ;;  %v1901_v30 = vld [vmem:[%s2304_s12 + $0x58] sm:$0xff]  ;;  %v484_v32 = vpack.c.bf16 %v1885_v26, %v1884_v25 }
  0x16   : > { %2087 = vmatpush3.bf16.msra.mxu1 %v2195_v3  ;;  %2082 = vmatprep.mubr.msk.bf16.mxu0 %vm360_vm0, %v483_v22  ;;  %v1909_v31 = vld [vmem:[%s2304_s12 + $0x78] sm:$0xff]  ;;  %v1910_v33 = vld [vmem:[%s2304_s12 + $0x80] sm:$0xff]  ;;  %v560_v34 = vpack.c.bf16 %v1894_v28, %v1893_v27  ;;  %v635_v35 = vpack.c.bf16 %v1901_v30, %v1900_v29  ;;  %v1903_v40 = vld [vmem:[%s2304_s12 + $0x68] sm:$0xff] }
  0x17   : > { %2088 = vmatprep.mubr.msk.bf16.mxu1 %vm360_vm0, %v559_v23  ;;  %2092 = vmatprep.subr.bf16.mxu0 %v2196_v12  ;;  %v711_v36 = vpack.c.bf16 %v1910_v33, %v1909_v31  ;;  %v1902_v39 = vld [vmem:[%s2304_s12 + $0x60] sm:$0xff]  ;;  %v1911_v41 = vld [vmem:[%s2304_s12 + $0x88] sm:$0xff]  ;;  %v1912_v42 = vld [vmem:[%s2304_s12 + $0x90] sm:$0xff] }
  0x18   : > { %2098 = vmatprep.subr.bf16.mxu1 %v2197_v24  ;;  %v1918_v43 = vld [vmem:[%s2304_s12 + $0x51] sm:$0xff]  ;;  %v1919_v44 = vld [vmem:[%s2304_s12 + $0x59] sm:$0xff]  ;;  %v636_v45 = vpack.c.bf16 %v1903_v40, %v1902_v39  ;;  %v1928_v47 = vld [vmem:[%s2304_s12 + $0x81] sm:$0xff]  ;;  %v712_v48 = vpack.c.bf16 %v1912_v42, %v1911_v41 }
  0x19   : > { %v1927_v46 = vld [vmem:[%s2304_s12 + $0x79] sm:$0xff]  ;;  %v787_v49 = vpack.c.bf16 %v1919_v44, %v1918_v43  ;;  %v1920_v53 = vld [vmem:[%s2304_s12 + $0x61] sm:$0xff]  ;;  %v1921_v54 = vld [vmem:[%s2304_s12 + $0x69] sm:$0xff] }
  0x1a   : > { %v863_v50 = vpack.c.bf16 %v1928_v47, %v1927_v46  ;;  %v1929_v55 = vld [vmem:[%s2304_s12 + $0x89] sm:$0xff]  ;;  %v1930_v56 = vld [vmem:[%s2304_s12 + $0x91] sm:$0xff]  ;;  %v788_v60 = vpack.c.bf16 %v1921_v54, %v1920_v53  ;;  %v1939_v4 = vld [vmem:[%s2304_s12 + $0x1d] sm:$0xff] }
  0x1b   : > { %v1936_v57 = vld [vmem:[%s2304_s12 + $0x5] sm:$0xff]  ;;  %v1937_v58 = vld [vmem:[%s2304_s12 + $0xd] sm:$0xff]  ;;  %v1946_v61 = vld [vmem:[%s2304_s12 + $0x35] sm:$0xff]  ;;  %v864_v62 = vpack.c.bf16 %v1930_v56, %v1929_v55 }
  0x1c   : > { %2083 = vmatmul.mubr.msk.bf16.vlgmr.msra.gmra.mxu0 %vm360_vm0, %v484_v32  ;;  %v1945_v59 = vld [vmem:[%s2304_s12 + $0x2d] sm:$0xff]  ;;  %v939_v63 = vpack.c.bf16 %v1937_v58, %v1936_v57  ;;  %v2203_v2 = vld [vmem:[%s2488_s1 + $0x58] sm:$0xff]   ;;  %v1948_v6 = vld [vmem:[%s2304_s12 + $0x45] sm:$0xff] }
  0x1d   : > { %2089 = vmatmul.mubr.msk.bf16.vlgmr.msra.gmra.mxu1 %vm360_vm0, %v560_v34  ;;  %2093 = vmatpush3.bf16.msra.mxu0 %v2196_v12  ;;  %v1015_v0 = vpack.c.bf16 %v1946_v61, %v1945_v59  ;;  %v1938_v3 = vld [vmem:[%s2304_s12 + $0x15] sm:$0xff]  ;;  %v1947_v5 = vld [vmem:[%s2304_s12 + $0x3d] sm:$0xff]  ;;  %v1954_v9 = vld [vmem:[%s2304_s12 + $0x6] sm:$0xff] }
  0x1e   : > { %2099 = vmatpush3.bf16.msra.mxu1 %v2197_v24  ;;  %2094 = vmatprep.mubr.msk.bf16.mxu0 %vm360_vm0, %v635_v35  ;;  %v1552_v7 = vld [vmem:[%s2490_s3] sm:$0xff]  ;;  %v1554_v8 = vld [vmem:[%s2490_s3 + $0x10] sm:$0xff]  ;;  %v940_v11 = vpack.c.bf16 %v1939_v4, %v1938_v3  ;;  %v1016_v14 = vpack.c.bf16 %v1948_v6, %v1947_v5  ;;  %v1553_v15 = vld [vmem:[%s2490_s3 + $0x8] sm:$0xff] }
  0x1f   : > { %2100 = vmatprep.mubr.msk.bf16.mxu1 %vm360_vm0, %v711_v36  ;;  %2104 = vmatprep.subr.bf16.mxu0 %v2198_v37  ;;  %v1955_v10 = vld [vmem:[%s2304_s12 + $0xe] sm:$0xff]  ;;  %v1964_v13 = vld [vmem:[%s2304_s12 + $0x36] sm:$0xff]  ;;  %v2204_v18 = vld [vmem:[%s2488_s1 + $0x60] sm:$0xff]  }
  0x20   : > { %2110 = vmatprep.subr.bf16.mxu1 %v2199_v38  ;;  %v1963_v12 = vld [vmem:[%s2304_s12 + $0x2e] sm:$0xff]  ;;  %1558 = vperm.xlu0 %2190, %v1552_v7   ;;  %v1091_v16 = vpack.c.bf16 %v1955_v10, %v1954_v9  ;;  %v1956_v20 = vld [vmem:[%s2304_s12 + $0x16] sm:$0xff]  ;;  %v1957_v21 = vld [vmem:[%s2304_s12 + $0x1e] sm:$0xff] }
  0x21   : > { %1568 = vperm.xlu1 %2191, %v1554_v8   ;;  %v1167_v17 = vpack.c.bf16 %v1964_v13, %v1963_v12  ;;  %v2205_v19 = vld [vmem:[%s2488_s1 + $0x68] sm:$0xff]   ;;  %v1555_v22 = vld [vmem:[%s2490_s3 + $0x18] sm:$0xff]  ;;  %v1092_v27 = vpack.c.bf16 %v1957_v21, %v1956_v20  ;;  %v2206_v33 = vld [vmem:[%s2488_s1 + $0x70] sm:$0xff]  }
  0x22   : > { %v1965_v23 = vld [vmem:[%s2304_s12 + $0x3e] sm:$0xff]  ;;  %v1966_v24 = vld [vmem:[%s2304_s12 + $0x46] sm:$0xff]  ;;  %v1972_v25 = vld [vmem:[%s2304_s12 + $0x55] sm:$0xff] }
  0x23   : > { %v1973_v26 = vld [vmem:[%s2304_s12 + $0x5d] sm:$0xff]  ;;  %v1982_v29 = vld [vmem:[%s2304_s12 + $0x85] sm:$0xff]  ;;  %v1168_v30 = vpack.c.bf16 %v1966_v24, %v1965_v23  ;;  %v1975_v36 = vld [vmem:[%s2304_s12 + $0x6d] sm:$0xff] }
  0x24   : > { %2095 = vmatmul.mubr.msk.bf16.vlgmr.msra.gmra.mxu0 %vm360_vm0, %v636_v45  ;;  %1563 = vperm.xlu0 %2190, %v1553_v15   ;;  %v1981_v28 = vld [vmem:[%s2304_s12 + $0x7d] sm:$0xff]  ;;  %v1243_v31 = vpack.c.bf16 %v1973_v26, %v1972_v25  ;;  %v1974_v35 = vld [vmem:[%s2304_s12 + $0x65] sm:$0xff] }
  0x25   : > { %2101 = vmatmul.mubr.msk.bf16.vlgmr.msra.gmra.mxu1 %vm360_vm0, %v712_v48  ;;  %2105 = vmatpush3.bf16.msra.mxu0 %v2198_v37  ;;  %v1319_v32 = vpack.c.bf16 %v1982_v29, %v1981_v28  ;;  %v2207_v34 = vld [vmem:[%s2488_s1 + $0x78] sm:$0xff]   ;;  %v1983_v37 = vld [vmem:[%s2304_s12 + $0x8d] sm:$0xff]  ;;  %v1244_v41 = vpack.c.bf16 %v1975_v36, %v1974_v35 }
  0x26   : > { %2111 = vmatpush3.bf16.msra.mxu1 %v2199_v38  ;;  %2106 = vmatprep.mubr.msk.bf16.mxu0 %vm360_vm0, %v787_v49  ;;  %v1984_v38 = vld [vmem:[%s2304_s12 + $0x95] sm:$0xff]  ;;  %v1991_v40 = vld [vmem:[%s2304_s12 + $0x5e] sm:$0xff]  ;;  %v2000_v43 = vld [vmem:[%s2304_s12 + $0x86] sm:$0xff] }
  0x27   : > { %2112 = vmatprep.mubr.msk.bf16.mxu1 %vm360_vm0, %v863_v50  ;;  %2116 = vmatprep.subr.bf16.mxu0 %v2200_v51  ;;  %v1990_v39 = vld [vmem:[%s2304_s12 + $0x56] sm:$0xff]  ;;  %v1999_v42 = vld [vmem:[%s2304_s12 + $0x7e] sm:$0xff]  ;;  %v1320_v44 = vpack.c.bf16 %v1984_v38, %v1983_v37  ;;  %v1992_v47 = vld [vmem:[%s2304_s12 + $0x66] sm:$0xff] }
  0x28   : > { %2122 = vmatprep.subr.bf16.mxu1 %v2201_v52  ;;  %1573 = vperm.xlu1 %2191, %v1555_v22   ;;  %v1395_v45 = vpack.c.bf16 %v1991_v40, %v1990_v39  ;;  %v1471_v46 = vpack.c.bf16 %v2000_v43, %v1999_v42  ;;  %v1993_v48 = vld [vmem:[%s2304_s12 + $0x6e] sm:$0xff]  ;;  %v2002_v50 = vld [vmem:[%s2304_s12 + $0x96] sm:$0xff] }
  0x29   : > { %v2001_v49 = vld [vmem:[%s2304_s12 + $0x8e] sm:$0xff] }
  0x2c   : > { %2107 = vmatmul.mubr.msk.bf16.vlgmr.msra.gmra.mxu0 %vm360_vm0, %v788_v60 }
  0x2d   : > { %2113 = vmatmul.mubr.msk.bf16.vlgmr.msra.gmra.mxu1 %vm360_vm0, %v864_v62  ;;  %2117 = vmatpush3.bf16.msra.mxu0 %v2200_v51  ;;  %v1396_v51 = vpack.c.bf16 %v1993_v48, %v1992_v47 }
  0x2e   : > { %2123 = vmatpush3.bf16.msra.mxu1 %v2201_v52  ;;  %2118 = vmatprep.mubr.msk.bf16.mxu0 %vm360_vm0, %v939_v63  ;;  %v1472_v52 = vpack.c.bf16 %v2002_v50, %v2001_v49 }
  0x2f   : > { %2124 = vmatprep.mubr.msk.bf16.mxu1 %vm360_vm0, %v1015_v0  ;;  %2128 = vmatprep.subr.bf16.mxu0 %v2202_v1 }
  0x30   : > { %2134 = vmatprep.subr.bf16.mxu1 %v2203_v2 }
  0x34   : > { %2119 = vmatmul.mubr.msk.bf16.vlgmr.msra.gmra.mxu0 %vm360_vm0, %v940_v11 }
  0x35   : > { %2125 = vmatmul.mubr.msk.bf16.vlgmr.msra.gmra.mxu1 %vm360_vm0, %v1016_v14  ;;  %2129 = vmatpush3.bf16.msra.mxu0 %v2202_v1 }
  0x36   : > { %2135 = vmatpush3.bf16.msra.mxu1 %v2203_v2  ;;  %2130 = vmatprep.mubr.msk.bf16.mxu0 %vm360_vm0, %v1091_v16 }
  0x37   : > { %2136 = vmatprep.mubr.msk.bf16.mxu1 %vm360_vm0, %v1167_v17  ;;  %2140 = vmatprep.subr.bf16.mxu0 %v2204_v18 }
  0x38   : > { %2146 = vmatprep.subr.bf16.mxu1 %v2205_v19 }
  0x3c   : > { %2131 = vmatmul.mubr.msk.bf16.vlgmr.msra.gmra.mxu0 %vm360_vm0, %v1092_v27 }
  0x3d   : > { %2137 = vmatmul.mubr.msk.bf16.vlgmr.msra.gmra.mxu1 %vm360_vm0, %v1168_v30  ;;  %2141 = vmatpush3.bf16.msra.mxu0 %v2204_v18 }
  0x3e   : > { %2147 = vmatpush3.bf16.msra.mxu1 %v2205_v19  ;;  %2142 = vmatprep.mubr.msk.bf16.mxu0 %vm360_vm0, %v1243_v31 }
  0x3f   : > { %2148 = vmatprep.mubr.msk.bf16.mxu1 %vm360_vm0, %v1319_v32  ;;  %2152 = vmatprep.subr.bf16.mxu0 %v2206_v33 }
  0x40   : > { %2158 = vmatprep.subr.bf16.mxu1 %v2207_v34 }
  0x44   : > { %2143 = vmatmul.mubr.msk.bf16.vlgmr.msra.gmra.mxu0 %vm360_vm0, %v1244_v41 }
  0x45   : > { %2149 = vmatmul.mubr.msk.bf16.vlgmr.msra.gmra.mxu1 %vm360_vm0, %v1320_v44  ;;  %2153 = vmatpush3.bf16.msra.mxu0 %v2206_v33 }
  0x46   : > { %2159 = vmatpush3.bf16.msra.mxu1 %v2207_v34  ;;  %2154 = vmatprep.mubr.msk.bf16.mxu0 %vm360_vm0, %v1395_v45 }
  0x47   : > { %2160 = vmatprep.mubr.msk.bf16.mxu1 %vm360_vm0, %v1471_v46 }
  0x4c   : > { %2155 = vmatmul.mubr.msk.bf16.vlgmr.msra.gmra.mxu0 %vm360_vm0, %v1396_v51 }
  0x4d   : > { %2161 = vmatmul.mubr.msk.bf16.vlgmr.msra.gmra.mxu1 %vm360_vm0, %v1472_v52 }
  0xd4   : > { %v2072_v53 = vpop.f32.mrf.mxu0 }
  0xd5   : > { %v2078_v54 = vpop.f32.mrf.mxu1 }
  0xd6   : > { %v401_v55 = vpop.f32.mrf.mxu0  ;;  %v471_v8 = vadd.f32 %v2078_v54, %v2072_v53 }
  0xd7   : > { %v462_v56 = vpop.f32.mrf.mxu1 }
  0xd8   : > { %v2073_v57 = vpop.f32.mrf.mxu0  ;;  %v463_v11 = vadd.f32 %v462_v56, %v401_v55 }
  0xd9   : > { %v2079_v58 = vpop.f32.mrf.mxu1 }
  0xda   : > { %v404_v59 = vpop.f32.mrf.mxu0  ;;  %v474_v15 = vadd.f32 %v2079_v58, %v2073_v57 }
  0xdb   : > { %v465_v60 = vpop.f32.mrf.mxu1 }
  0xdc   : > { %v2084_v61 = vpop.f32.mrf.mxu0  ;;  %v466_v22 = vadd.f32 %v465_v60, %v404_v59 }
  0xdd   : > { %v2090_v62 = vpop.f32.mrf.mxu1  ;;  %v551_v12 = vadd.f32 %v2084_v61, %v471_v8 }
  0xde   : > { %v534_v63 = vpop.f32.mrf.mxu0 }
  0xdf   : > { %v610_v0 = vpop.f32.mrf.mxu1  ;;  %v549_v16 = vadd.f32 %v534_v63, %v463_v11  ;;  %v627_v19 = vadd.f32 %v2090_v62, %v551_v12 }
  0xe0   : > { %v2085_v1 = vpop.f32.mrf.mxu0 }
  0xe1   : > { %v2091_v2 = vpop.f32.mrf.mxu1  ;;  %v552_v20 = vadd.f32 %v2085_v1, %v474_v15  ;;  %v625_v24 = vadd.f32 %v610_v0, %v549_v16 }
  0xe2   : > { %v537_v3 = vpop.f32.mrf.mxu0 }
  0xe3   : > { %v613_v4 = vpop.f32.mrf.mxu1  ;;  %v550_v27 = vadd.f32 %v537_v3, %v466_v22  ;;  %v628_v29 = vadd.f32 %v2091_v2, %v552_v20 }
  0xe4   : > { %v2096_v5 = vpop.f32.mrf.mxu0 }
  0xe5   : > { %v2102_v6 = vpop.f32.mrf.mxu1  ;;  %v703_v25 = vadd.f32 %v2096_v5, %v627_v19  ;;  %v626_v36 = vadd.f32 %v613_v4, %v550_v27 }
  0xe6   : > { %v686_v7 = vpop.f32.mrf.mxu0 }
  0xe7   : > { %v762_v9 = vpop.f32.mrf.mxu1  ;;  %v701_v30 = vadd.f32 %v686_v7, %v625_v24  ;;  %v779_v33 = vadd.f32 %v2102_v6, %v703_v25 }
  0xe8   : > { %v2097_v10 = vpop.f32.mrf.mxu0 }
  0xe9   : > { %v2103_v13 = vpop.f32.mrf.mxu1  ;;  %v704_v34 = vadd.f32 %v2097_v10, %v628_v29  ;;  %v777_v38 = vadd.f32 %v762_v9, %v701_v30 }
  0xea   : > { %v689_v14 = vpop.f32.mrf.mxu0 }
  0xeb   : > { %v765_v17 = vpop.f32.mrf.mxu1  ;;  %v702_v41 = vadd.f32 %v689_v14, %v626_v36  ;;  %v780_v43 = vadd.f32 %v2103_v13, %v704_v34  ;;  %v2008_v34 = vld [vmem:[%s2489_s2] ss:$0 sm:$0xff] }
  0xec   : > { %v2108_v18 = vpop.f32.mrf.mxu0 }
  0xed   : > { %v2114_v21 = vpop.f32.mrf.mxu1  ;;  %v855_v39 = vadd.f32 %v2108_v18, %v779_v33  ;;  %v778_v50 = vadd.f32 %v765_v17, %v702_v41 }
  0xee   : > { %v838_v23 = vpop.f32.mrf.mxu0 }
  0xef   : > { %v914_v26 = vpop.f32.mrf.mxu1  ;;  %v853_v44 = vadd.f32 %v838_v23, %v777_v38  ;;  %v931_v47 = vadd.f32 %v2114_v21, %v855_v39 }
  0xf0   : > { %v2109_v28 = vpop.f32.mrf.mxu0 }
  0xf1   : > { %v2115_v31 = vpop.f32.mrf.mxu1  ;;  %v856_v48 = vadd.f32 %v2109_v28, %v780_v43  ;;  %v929_v52 = vadd.f32 %v914_v26, %v853_v44 }
  0xf2   : > { %v841_v32 = vpop.f32.mrf.mxu0 }
  0xf3   : > { %v917_v35 = vpop.f32.mrf.mxu1  ;;  %v854_v55 = vadd.f32 %v841_v32, %v778_v50  ;;  %v932_v57 = vadd.f32 %v2115_v31, %v856_v48  ;;  %v1559_v50 = vpop.permute.xlu0 %1558 }
  0xf4   : > { %v2120_v37 = vpop.f32.mrf.mxu0 }
  0xf5   : > { %v2126_v40 = vpop.f32.mrf.mxu1  ;;  %v1007_v53 = vadd.f32 %v2120_v37, %v931_v47  ;;  %v930_v0 = vadd.f32 %v917_v35, %v854_v55 }
  0xf6   : > { %v990_v42 = vpop.f32.mrf.mxu0 }
  0xf7   : > { %v1066_v45 = vpop.f32.mrf.mxu1  ;;  %v1005_v58 = vadd.f32 %v990_v42, %v929_v52  ;;  %v1083_v61 = vadd.f32 %v2126_v40, %v1007_v53 }
  0xf8   : > { %v2121_v46 = vpop.f32.mrf.mxu0 }
  0xf9   : > { %v2127_v49 = vpop.f32.mrf.mxu1  ;;  %v1008_v62 = vadd.f32 %v2121_v46, %v932_v57  ;;  %v1081_v2 = vadd.f32 %v1066_v45, %v1005_v58  ;;  %v1569_v45 = vpop.permute.xlu1 %1568 }
  0xfa   : > { %v993_v51 = vpop.f32.mrf.mxu0 }
  0xfb   : > { %v1069_v54 = vpop.f32.mrf.mxu1  ;;  %v1006_v5 = vadd.f32 %v993_v51, %v930_v0  ;;  %v1084_v7 = vadd.f32 %v2127_v49, %v1008_v62  ;;  %v1564_v62 = vpop.permute.xlu0 %1563 }
  0xfc   : > { %v2132_v56 = vpop.f32.mrf.mxu0 }
  0xfd   : > { %v2138_v59 = vpop.f32.mrf.mxu1  ;;  %v1159_v3 = vadd.f32 %v2132_v56, %v1083_v61  ;;  %v1082_v14 = vadd.f32 %v1069_v54, %v1006_v5 }
  0xfe   : > { %v1142_v60 = vpop.f32.mrf.mxu0 }
  0xff   : > { %v1218_v63 = vpop.f32.mrf.mxu1  ;;  %v1157_v8 = vadd.f32 %v1142_v60, %v1081_v2  ;;  %v1235_v11 = vadd.f32 %v2138_v59, %v1159_v3  ;;  %v1574_v59 = vpop.permute.xlu1 %1573 }
 0x100   : > { %v2133_v1 = vpop.f32.mrf.mxu0 }
 0x101   : > { %v2139_v4 = vpop.f32.mrf.mxu1  ;;  %v1160_v12 = vadd.f32 %v2133_v1, %v1084_v7  ;;  %v1233_v16 = vadd.f32 %v1218_v63, %v1157_v8 }
 0x102   : > { %v1145_v6 = vpop.f32.mrf.mxu0 }
 0x103   : > { %v1221_v9 = vpop.f32.mrf.mxu1  ;;  %v1158_v19 = vadd.f32 %v1145_v6, %v1082_v14  ;;  %v1236_v21 = vadd.f32 %v2139_v4, %v1160_v12 }
 0x104   : > { %v2144_v10 = vpop.f32.mrf.mxu0 }
 0x105   : > { %v2150_v13 = vpop.f32.mrf.mxu1  ;;  %v1311_v17 = vadd.f32 %v2144_v10, %v1235_v11  ;;  %v1234_v28 = vadd.f32 %v1221_v9, %v1158_v19 }
 0x106   : > { %v1294_v15 = vpop.f32.mrf.mxu0 }
 0x107   : > { %v1370_v18 = vpop.f32.mrf.mxu1  ;;  %v1309_v22 = vadd.f32 %v1294_v15, %v1233_v16  ;;  %v1387_v25 = vadd.f32 %v2150_v13, %v1311_v17 }
 0x108   : > { %v2145_v20 = vpop.f32.mrf.mxu0 }
 0x109   : > { %v2151_v23 = vpop.f32.mrf.mxu1  ;;  %v1312_v26 = vadd.f32 %v2145_v20, %v1236_v21  ;;  %v1385_v30 = vadd.f32 %v1370_v18, %v1309_v22 }
 0x10a   : > { %v1297_v24 = vpop.f32.mrf.mxu0 }
 0x10b   : > { %v1373_v27 = vpop.f32.mrf.mxu1  ;;  %v1310_v33 = vadd.f32 %v1297_v24, %v1234_v28  ;;  %v1388_v36 = vadd.f32 %v2151_v23, %v1312_v26 }
 0x10c   : > { %v2156_v29 = vpop.f32.mrf.mxu0 }
 0x10d   : > { %v1463_v31 = vadd.f32 %v2156_v29, %v1387_v25  ;;  %v2162_v32 = vpop.f32.mrf.mxu1  ;;  %v1386_v46 = vadd.f32 %v1373_v27, %v1310_v33 }
 0x10e   : > { %v1446_v35 = vpop.f32.mrf.mxu0 }
 0x10f   : > { %v1539_v37 = vadd.f32 %v2162_v32, %v1463_v31  ;;  %v1461_v38 = vadd.f32 %v1446_v35, %v1385_v30  ;;  %v1522_v39 = vpop.f32.mrf.mxu1 }
 0x110   : > { %v2157_v40 = vpop.f32.mrf.mxu0 }
 0x111   : > { %v1550_v41 = vadd.f32 %v2008_v34, %v1539_v37  ;;  %v1537_v42 = vadd.f32 %v1522_v39, %v1461_v38  ;;  %v1464_v43 = vadd.f32 %v2157_v40, %v1388_v36  ;;  %v2163_v44 = vpop.f32.mrf.mxu1 }
 0x112   : > { %v1449_v47 = vpop.f32.mrf.mxu0 }
 0x113   : > { %v2018_v48 = vpack.c.bf16 %v1550_v41, %v1550_v41  ;;  %v1548_v49 = vadd.f32 %v2008_v34, %v1537_v42  ;;  %v1540_v51 = vadd.f32 %v2163_v44, %v1464_v43  ;;  %v1462_v52 = vadd.f32 %v1449_v47, %v1386_v46  ;;  %v1525_v55 = vpop.f32.mrf.mxu1 }
 0x114   : > { %v1578_v60 = vmul.f32 %v1569_v45, %v1550_v41 }
 0x115   : > { %1632 = vst.msk [vmem:[%s316_s10 + $0x8] sm:$0xf] %vm1629_vm1, %v2018_v48  ;;  %v2016_v53 = vpack.c.bf16 %v1548_v49, %v1548_v49  ;;  %v1551_v54 = vadd.f32 %v2008_v34, %v1540_v51  ;;  %v1576_v56 = vmul.f32 %v1559_v50, %v1548_v49  ;;  %v1538_v57 = vadd.f32 %v1525_v55, %v1462_v52 }
 0x116   : > { %v1596_v4 = vmul.f32 %v1578_v60, %v1550_v41  ;;  %v1584_v9 = vsel %vm1580_vm2, %v1578_v60, 0.0 }
 0x117   : > { %1630 = vst.msk [vmem:[%s316_s10] sm:$0xf] %vm1629_vm1, %v2016_v53  ;;  %v2019_v58 = vpack.c.bf16 %v1551_v54, %v1551_v54  ;;  %v1549_v61 = vadd.f32 %v2008_v34, %v1538_v57  ;;  %v1594_v63 = vmul.f32 %v1576_v56, %v1548_v49  ;;  %v1579_v2 = vmul.f32 %v1574_v59, %v1551_v54 }
 0x118   : > { %v1581_v3 = vsel %vm1580_vm2, %v1576_v56, 0.0  ;;  %v1601_v14 = vsel %vm1580_vm2, %v1596_v4, 0.0 }
 0x119   : > { %1633 = vst.msk [vmem:[%s316_s10 + $0xc] sm:$0xf] %vm1629_vm1, %v2019_v58  ;;  %v2017_v0 = vpack.c.bf16 %v1549_v61, %v1549_v61  ;;  %v1577_v1 = vmul.f32 %v1564_v62, %v1549_v61  ;;  %v1598_v8 = vsel %vm1580_vm2, %v1594_v63, 0.0  ;;  %v1597_v11 = vmul.f32 %v1579_v2, %v1551_v54 }
 0x11a   : > { %v1586_v15 = vsel %vm1580_vm2, %v1579_v2, 0.0 }
 0x11b   : > { %1631 = vst.msk [vmem:[%s316_s10 + $0x4] sm:$0xf] %vm1629_vm1, %v2017_v0  ;;  %v1582_v5 = vsel %vm1580_vm2, %v1577_v1, 0.0  ;;  %v1595_v6 = vmul.f32 %v1577_v1, %v1549_v61  ;;  %v1603_v18 = vsel %vm1580_vm2, %v1597_v11, 0.0 }
 0x11c   : > { %v1583_v7 = vadd.f32 %v1582_v5, %v1581_v3 }
 0x11d   : > { %v1599_v10 = vsel %vm1580_vm2, %v1595_v6, 0.0 }
 0x11e   : > { %v1600_v12 = vadd.f32 %v1599_v10, %v1598_v8  ;;  %v1585_v13 = vadd.f32 %v1584_v9, %v1583_v7 }
 0x120   : > { %v1587_v16 = vadd.f32 %v1586_v15, %v1585_v13  ;;  %v1602_v17 = vadd.f32 %v1601_v14, %v1600_v12 }
 0x122   : > { %v1588_v19 = vrot.slane %v1587_v16, 4  ;;  %v1604_v20 = vadd.f32 %v1603_v18, %v1602_v17 }
 0x124   : > { %v1589_v21 = vadd.f32 %v1588_v19, %v1587_v16  ;;  %v1605_v22 = vrot.slane %v1604_v20, 4 }
 0x126   : > { %v1590_v23 = vrot.slane %v1589_v21, 2  ;;  %v1606_v24 = vadd.f32 %v1605_v22, %v1604_v20 }
 0x128   : > { %v1591_v25 = vadd.f32 %v1590_v23, %v1589_v21  ;;  %v1607_v26 = vrot.slane %v1606_v24, 2 }
 0x12a   : > { %v1592_v27 = vrot.slane %v1591_v25, 1  ;;  %v1608_v28 = vadd.f32 %v1607_v26, %v1606_v24 }
 0x12c   : > { %v1593_v29 = vadd.f32 %v1592_v27, %v1591_v25  ;;  %v1609_v30 = vrot.slane %v1608_v28, 1 }
 0x12e   : > { %v1610_v31 = vadd.f32 %v1609_v30, %v1608_v28  ;;  %1611 = vst.msk [vmem:[%s324_s15] sm:$0xff] %vm1580_vm2, %v1593_v29 }
 0x130   : > { %1612 = vst.msk [vmem:[%s331_s18] sm:$0xff] %vm1580_vm2, %v1610_v31 }
 0x131 PF: > { %s17_s23 = sadd.s32 1, %s2230_s23   ;;  %s2494_s21 = smov %s2226_s22 }
 0x132   : > { %p14_p5 = scmp.ge.s32.totalorder %s17_s23, 4   ;;  %s2495_s22 = smov %s2497_s24 }
 0x134   :  { %16 = sbr.rel (!%p14_p5) target bundleno = 2 (0x2), region = 124 }

// kernel: discriminator_forward.8
= control target key start
LH: loop header
LB: loop body
LE: loop exit
PB: predicated region body
PF: predicated region fallthrough
CT: control target
= control target key end

     0   :  { %s2506_s21 = smov 0   ;;  %s2508_s22 = smov 0   ;;  %s2831_s0 = inlined_call_operand.vmem [shape: f32[2,1,54,32], index: 0, kind: input, shape index: {}]   ;;  %s2832_s1 = inlined_call_operand.vmem [shape: bf16[16,32,64], index: 1, kind: input, shape index: {}]   ;;  %s2833_s2 = inlined_call_operand.vmem [shape: f32[1,64], index: 2, kind: input, shape index: {}]   ;;  %s2834_s3 = inlined_call_operand.vmem [shape: f32[1,32,1], index: 3, kind: input, shape index: {}]   ;;  %s2835_s4 = inlined_call_operand.vmem [shape: bf16[2,32,64], index: 4, kind: output, shape index: {0}]   ;;  %s2836_s5 = inlined_call_operand.vmem [shape: f32[2,1,8,64], index: 5, kind: output, shape index: {1}]   ;;  %s2837_s6 = inlined_call_operand.vmem [shape: f32[2,1,8,64], index: 6, kind: output, shape index: {2}]  }
   0x1   :  { %s2510_s23 = smov 0  }
   0x2 LB: > { %s29_s24 = sadd.s32 1, %s2464_s22  ;;  %p1992_p0 = scmp.ge.s32.totalorder %s2468_s23, 1  ;;  %s2468_s23 = sphi %s2510_s23, %s17_s23   ;;  %s2464_s22 = sphi %s2508_s22, %s2839_s22   ;;  %s2460_s21 = sphi %s2506_s21, %s2838_s21  }
   0x3   : > { %p31_p1 = scmp.ge.s32.totalorder %s29_s24, 2  ;;  %p245_p2 = scmp.lt.s32.totalorder %s2468_s23, 3 }
   0x5   : > { %s2841_s24 = smov (%p31_p1, %s29_s24), 0  ;;  %p246_p3 = pnand %p1992_p0, %p245_p2 }
   0x6   : > { %p298_p4 = scmp.lt.s32.totalorder (!%p246_p3), %s2460_s21, 1 }
   0x7   : > { %249 = sbr.rel (%p246_p3) target bundleno = 306 (0x132), region = 36 }
   0xc   : > { %v2414_v0 = vld [vmem:[%s2832_s1 + $0x18] sm:$0xff]   ;;  %v2415_v1 = vld [vmem:[%s2832_s1 + $0x8] sm:$0xff]   ;;  %v2416_v2 = vld [vmem:[%s2832_s1 + $0x10] sm:$0xff]   ;;  %s2843_s21 = smov (!%p298_p4, %s2460_s21), 1  ;;  %v2470_v6 = vmov 0   ;;  %vm370_vm0 = vcmask 261120  }
   0xd   : > { %2258 = vmatprep.subr.bf16.mxu0 %v2414_v0  ;;  %2266 = vmatprep.subr.bf16.mxu1 %v2415_v1  ;;  %v2417_v3 = vld [vmem:[%s2832_s1] sm:$0xff]   ;;  %s2386_s9 = smul.u32 56, %s2843_s21  ;;  %v2418_v4 = vld [vmem:[%s2832_s1 + $0x28] sm:$0xff]   ;;  %v2419_v5 = vld [vmem:[%s2832_s1 + $0x38] sm:$0xff]   ;;  %s2189_s25 = sshll.u32 %s2843_s21, 4  ;;  %vm1757_vm1 = vcmask 519168  }
   0xe   : > { %2259 = vmatpush3.bf16.msra.mxu0 %v2414_v0  ;;  %2267 = vmatpush3.bf16.msra.mxu1 %v2415_v1  ;;  %v2420_v10 = vld [vmem:[%s2832_s1 + $0x20] sm:$0xff]   ;;  %v2421_v20 = vld [vmem:[%s2832_s1 + $0x30] sm:$0xff]   ;;  %v2422_v31 = vld [vmem:[%s2832_s1 + $0x48] sm:$0xff]   ;;  %s316_s28 = scalar_lea.vmem %s2835_s4, %s2189_s25  ;;  %vm1708_vm2 = vcmask 523264   ;;  %s1996_s29 = sshll.u32 %s2843_s21, 3 }
   0xf   : > { %2260 = vmatprep.subr.bf16.mxu0 %v2416_v2  ;;  %2268 = vmatprep.subr.bf16.mxu1 %v2417_v3  ;;  %s2548_s16 = scalar_lea.vmem %s2831_s0, %s2386_s9  ;;  %v2423_v33 = vld [vmem:[%s2832_s1 + $0x58] sm:$0xff]   ;;  %v2424_v35 = vld [vmem:[%s2832_s1 + $0x40] sm:$0xff]   ;;  %v2425_v38 = vld [vmem:[%s2832_s1 + $0x50] sm:$0xff]   ;;  %s324_s8 = scalar_lea.vmem %s2836_s5, %s1996_s29 }
  0x10   : > { %2412 = vset.pattern.permute.xlu0 %v2470_v6  ;;  %2413 = vset.pattern.permute.xlu1 %v2470_v6  ;;  %v1998_v7 = vld [vmem:[%s2548_s16 + $0x1] sm:$0xff]  ;;  %v2552_v8 = vld [vmem:[%s2548_s16 + $0x9] sm:$0xff]  ;;  %v2563_v13 = vld [vmem:[%s2548_s16 + $0x11] sm:$0xff]  ;;  %s331_s11 = scalar_lea.vmem %s2837_s6, %s1996_s29 }
  0x11   : > { %v335_v9 = vld [vmem:[%s2548_s16] sm:$0xff]  ;;  %v351_v11 = vpack.c.bf16 %v2552_v8, %v1998_v7  ;;  %v2560_v12 = vld [vmem:[%s2548_s16 + $0x8] sm:$0xff]  ;;  %v2572_v17 = vld [vmem:[%s2548_s16 + $0x10] sm:$0xff]  ;;  %v919_v54 = vpack.c.bf16 %v2563_v13, %v2552_v8 }
  0x12   : > { %2261 = vmatpush3.bf16.msra.mxu0 %v2416_v2  ;;  %2269 = vmatpush3.bf16.msra.mxu1 %v2417_v3  ;;  %v2566_v14 = vld [vmem:[%s2548_s16 + $0x19] sm:$0xff]  ;;  %v339_v15 = vpack.c.bf16 %v2560_v12, %v335_v9  ;;  %v2014_v21 = vld [vmem:[%s2548_s16 + $0x2] sm:$0xff]  ;;  %v2015_v22 = vld [vmem:[%s2548_s16 + $0xa] sm:$0xff]  ;;  %v835_v53 = vpack.c.bf16 %v2572_v17, %v2560_v12 }
  0x13   : > { %2274 = vmatprep.subr.bf16.mxu0 %v2418_v4  ;;  %v352_v16 = vpack.c.bf16 %v2566_v14, %v2563_v13  ;;  %v2575_v18 = vld [vmem:[%s2548_s16 + $0x18] sm:$0xff]  ;;  %2282 = vmatprep.subr.bf16.mxu1 %v2419_v5  ;;  %v2026_v23 = vld [vmem:[%s2548_s16 + $0x3] sm:$0xff]  ;;  %v2027_v24 = vld [vmem:[%s2548_s16 + $0xb] sm:$0xff]  ;;  %v499_v25 = vpack.c.bf16 %v2015_v22, %v2014_v21 }
  0x14   : > { %2262 = vmatprep.mubr.msk.bf16.mxu0 %vm370_vm0, %v351_v11  ;;  %v340_v19 = vpack.c.bf16 %v2575_v18, %v2572_v17  ;;  %2270 = vmatprep.mubr.msk.bf16.mxu1 %vm370_vm0, %v339_v15  ;;  %v583_v26 = vpack.c.bf16 %v2027_v24, %v2026_v23  ;;  %v2016_v27 = vld [vmem:[%s2548_s16 + $0x12] sm:$0xff]  ;;  %v2017_v28 = vld [vmem:[%s2548_s16 + $0x1a] sm:$0xff]  ;;  %v2038_v36 = vld [vmem:[%s2548_s16 + $0x6] sm:$0xff] }
  0x15   : > { %2263 = vmatmul.mubr.msk.bf16.vlgmr.msra.gmra.mxu0 %vm370_vm0, %v352_v16  ;;  %v2028_v29 = vld [vmem:[%s2548_s16 + $0x13] sm:$0xff]  ;;  %v2029_v30 = vld [vmem:[%s2548_s16 + $0x1b] sm:$0xff]  ;;  %v2599_v32 = vpack.c.bf16 %v2017_v28, %v2016_v27  ;;  %v2050_v40 = vld [vmem:[%s2548_s16 + $0x7] sm:$0xff] }
  0x16   : > { %2271 = vmatmul.mubr.msk.bf16.vlgmr.msra.gmra.mxu1 %vm370_vm0, %v340_v19  ;;  %2275 = vmatpush3.bf16.msra.mxu0 %v2418_v4  ;;  %v2604_v34 = vpack.c.bf16 %v2029_v30, %v2028_v29  ;;  %v2611_v37 = vld [vmem:[%s2548_s16 + $0xe] sm:$0xff]  ;;  %v2625_v43 = vld [vmem:[%s2548_s16 + $0x16] sm:$0xff]  ;;  %v2628_v44 = vld [vmem:[%s2548_s16 + $0x1e] sm:$0xff] }
  0x17   : > { %2283 = vmatpush3.bf16.msra.mxu1 %v2419_v5  ;;  %2276 = vmatprep.subr.bf16.mxu0 %v2420_v10  ;;  %v667_v39 = vpack.c.bf16 %v2611_v37, %v2038_v36  ;;  %v2619_v41 = vld [vmem:[%s2548_s16 + $0xf] sm:$0xff]  ;;  %v2631_v45 = vld [vmem:[%s2548_s16 + $0x17] sm:$0xff]  ;;  %v2636_v46 = vld [vmem:[%s2548_s16 + $0x1f] sm:$0xff]  ;;  %v668_v49 = vpack.c.bf16 %v2628_v44, %v2625_v43  ;;  %v1171_v15 = vpack.c.bf16 %v2625_v43, %v2611_v37 }
  0x18   : > { %2284 = vmatprep.subr.bf16.mxu1 %v2421_v20  ;;  %2278 = vmatprep.mubr.msk.bf16.mxu0 %vm370_vm0, %v499_v25  ;;  %v751_v42 = vpack.c.bf16 %v2619_v41, %v2050_v40  ;;  %v2426_v47 = vld [vmem:[%s2832_s1 + $0x68] sm:$0xff]   ;;  %v2427_v48 = vld [vmem:[%s2832_s1 + $0x78] sm:$0xff]   ;;  %v752_v50 = vpack.c.bf16 %v2636_v46, %v2631_v45  ;;  %v2428_v51 = vld [vmem:[%s2832_s1 + $0x60] sm:$0xff]   ;;  %v1255_v16 = vpack.c.bf16 %v2631_v45, %v2619_v41 }
  0x19   : > { %2286 = vmatprep.mubr.msk.bf16.mxu1 %vm370_vm0, %v583_v26  ;;  %v2429_v52 = vld [vmem:[%s2832_s1 + $0x70] sm:$0xff]   ;;  %v2065_v55 = vld [vmem:[%s2548_s16 + $0x20] sm:$0xff]  ;;  %v2430_v57 = vld [vmem:[%s2832_s1 + $0x88] sm:$0xff]  }
  0x1a   : > { %2277 = vmatpush3.bf16.msra.mxu0 %v2420_v10  ;;  %v2077_v56 = vld [vmem:[%s2548_s16 + $0x21] sm:$0xff]  ;;  %v2431_v58 = vld [vmem:[%s2832_s1 + $0x98] sm:$0xff]   ;;  %v2086_v59 = vld [vmem:[%s2548_s16 + $0xc] sm:$0xff]  ;;  %v836_v61 = vpack.c.bf16 %v2065_v55, %v2575_v18 }
  0x1b   : > { %2285 = vmatpush3.bf16.msra.mxu1 %v2421_v20  ;;  %2290 = vmatprep.subr.bf16.mxu0 %v2422_v31  ;;  %v2673_v60 = vld [vmem:[%s2548_s16 + $0x14] sm:$0xff]  ;;  %v920_v63 = vpack.c.bf16 %v2077_v56, %v2566_v14  ;;  %v2432_v1 = vld [vmem:[%s2832_s1 + $0x80] sm:$0xff]   ;;  %v2434_v9 = vld [vmem:[%s2832_s1 + $0xa8] sm:$0xff]  }
  0x1c   : > { %2298 = vmatprep.subr.bf16.mxu1 %v2423_v33  ;;  %v2098_v62 = vld [vmem:[%s2548_s16 + $0xd] sm:$0xff]  ;;  %v2680_v0 = vld [vmem:[%s2548_s16 + $0x15] sm:$0xff]  ;;  %v1003_v3 = vpack.c.bf16 %v2673_v60, %v2086_v59  ;;  %v2695_v6 = vld [vmem:[%s2548_s16 + $0x24] sm:$0xff] }
  0x1d   : > { %2279 = vmatmul.mubr.msk.bf16.vlgmr.msra.gmra.mxu0 %vm370_vm0, %v2599_v32  ;;  %v2433_v2 = vld [vmem:[%s2832_s1 + $0x90] sm:$0xff]   ;;  %v1087_v4 = vpack.c.bf16 %v2680_v0, %v2098_v62  ;;  %v2692_v5 = vld [vmem:[%s2548_s16 + $0x1c] sm:$0xff]  ;;  %v2702_v8 = vld [vmem:[%s2548_s16 + $0x25] sm:$0xff] }
  0x1e   : > { %2287 = vmatmul.mubr.msk.bf16.vlgmr.msra.gmra.mxu1 %vm370_vm0, %v2604_v34  ;;  %2291 = vmatpush3.bf16.msra.mxu0 %v2422_v31  ;;  %v2698_v7 = vld [vmem:[%s2548_s16 + $0x1d] sm:$0xff]  ;;  %v1004_v11 = vpack.c.bf16 %v2695_v6, %v2692_v5  ;;  %v2437_v14 = vld [vmem:[%s2832_s1 + $0xb0] sm:$0xff]   ;;  %v2113_v17 = vld [vmem:[%s2548_s16 + $0x26] sm:$0xff]  ;;  %v1507_v40 = vpack.c.bf16 %v2692_v5, %v2673_v60 }
  0x1f   : > { %2299 = vmatpush3.bf16.msra.mxu1 %v2423_v33  ;;  %2292 = vmatprep.subr.bf16.mxu0 %v2424_v35  ;;  %v2435_v10 = vld [vmem:[%s2832_s1 + $0xb8] sm:$0xff]   ;;  %v1088_v12 = vpack.c.bf16 %v2702_v8, %v2698_v7  ;;  %v2436_v13 = vld [vmem:[%s2832_s1 + $0xa0] sm:$0xff]   ;;  %v2438_v19 = vld [vmem:[%s2832_s1 + $0xc8] sm:$0xff]   ;;  %v1172_v23 = vpack.c.bf16 %v2113_v17, %v2628_v44 }
  0x20   : > { %2300 = vmatprep.subr.bf16.mxu1 %v2425_v38  ;;  %2294 = vmatprep.mubr.msk.bf16.mxu0 %vm370_vm0, %v667_v39  ;;  %v2125_v18 = vld [vmem:[%s2548_s16 + $0x27] sm:$0xff]  ;;  %v2439_v20 = vld [vmem:[%s2832_s1 + $0xd8] sm:$0xff]   ;;  %v1682_v22 = vld [vmem:[%s2834_s3 + $0x10] sm:$0xff] }
  0x21   : > { %2302 = vmatprep.mubr.msk.bf16.mxu1 %vm370_vm0, %v751_v42  ;;  %v1680_v21 = vld [vmem:[%s2834_s3] sm:$0xff]  ;;  %v1256_v24 = vpack.c.bf16 %v2125_v18, %v2636_v46  ;;  %1696 = vperm.xlu1 %2413, %v1682_v22   ;;  %v1681_v25 = vld [vmem:[%s2834_s3 + $0x8] sm:$0xff]  ;;  %v2441_v27 = vld [vmem:[%s2832_s1 + $0xd0] sm:$0xff]  }
  0x22   : > { %2293 = vmatpush3.bf16.msra.mxu0 %v2424_v35  ;;  %1686 = vperm.xlu0 %2412, %v1680_v21   ;;  %v2440_v26 = vld [vmem:[%s2832_s1 + $0xc0] sm:$0xff]   ;;  %v2137_v29 = vld [vmem:[%s2548_s16 + $0x2a] sm:$0xff]  ;;  %v1683_v30 = vld [vmem:[%s2834_s3 + $0x18] sm:$0xff] }
  0x23   : > { %2301 = vmatpush3.bf16.msra.mxu1 %v2425_v38  ;;  %2306 = vmatprep.subr.bf16.mxu0 %v2426_v47  ;;  %v2136_v28 = vld [vmem:[%s2548_s16 + $0x22] sm:$0xff]  ;;  %v2149_v33 = vld [vmem:[%s2548_s16 + $0x2b] sm:$0xff]  ;;  %v2443_v36 = vld [vmem:[%s2832_s1 + $0xf8] sm:$0xff]  }
  0x24   : > { %2314 = vmatprep.subr.bf16.mxu1 %v2427_v48  ;;  %v2148_v31 = vld [vmem:[%s2548_s16 + $0x23] sm:$0xff]  ;;  %v1340_v37 = vpack.c.bf16 %v2137_v29, %v2136_v28  ;;  %v2161_v41 = vld [vmem:[%s2548_s16 + $0x2c] sm:$0xff] }
  0x25   : > { %2295 = vmatmul.mubr.msk.bf16.vlgmr.msra.gmra.mxu0 %vm370_vm0, %v668_v49  ;;  %v2442_v35 = vld [vmem:[%s2832_s1 + $0xe8] sm:$0xff]   ;;  %1701 = vperm.xlu1 %2413, %v1683_v30   ;;  %v1424_v38 = vpack.c.bf16 %v2149_v33, %v2148_v31  ;;  %v2444_v39 = vld [vmem:[%s2832_s1 + $0xe0] sm:$0xff]   ;;  %v1508_v43 = vpack.c.bf16 %v2161_v41, %v2695_v6 }
  0x26   : > { %2303 = vmatmul.mubr.msk.bf16.vlgmr.msra.gmra.mxu1 %vm370_vm0, %v752_v50  ;;  %2307 = vmatpush3.bf16.msra.mxu0 %v2426_v47  ;;  %v2173_v42 = vld [vmem:[%s2548_s16 + $0x2d] sm:$0xff] }
  0x27   : > { %2315 = vmatpush3.bf16.msra.mxu1 %v2427_v48  ;;  %2308 = vmatprep.subr.bf16.mxu0 %v2428_v51  ;;  %v1592_v44 = vpack.c.bf16 %v2173_v42, %v2702_v8 }
  0x28   : > { %2316 = vmatprep.subr.bf16.mxu1 %v2429_v52  ;;  %2310 = vmatprep.mubr.msk.bf16.mxu0 %vm370_vm0, %v835_v53 }
  0x29   : > { %2318 = vmatprep.mubr.msk.bf16.mxu1 %vm370_vm0, %v919_v54  ;;  %1691 = vperm.xlu0 %2412, %v1681_v25  }
  0x2a   : > { %2309 = vmatpush3.bf16.msra.mxu0 %v2428_v51 }
  0x2b   : > { %2317 = vmatpush3.bf16.msra.mxu1 %v2429_v52  ;;  %2322 = vmatprep.subr.bf16.mxu0 %v2430_v57 }
  0x2c   : > { %2330 = vmatprep.subr.bf16.mxu1 %v2431_v58 }
  0x2d   : > { %2311 = vmatmul.mubr.msk.bf16.vlgmr.msra.gmra.mxu0 %vm370_vm0, %v836_v61 }
  0x2e   : > { %2319 = vmatmul.mubr.msk.bf16.vlgmr.msra.gmra.mxu1 %vm370_vm0, %v920_v63  ;;  %2323 = vmatpush3.bf16.msra.mxu0 %v2430_v57 }
  0x2f   : > { %2331 = vmatpush3.bf16.msra.mxu1 %v2431_v58  ;;  %2324 = vmatprep.subr.bf16.mxu0 %v2432_v1 }
  0x30   : > { %2332 = vmatprep.subr.bf16.mxu1 %v2433_v2  ;;  %2326 = vmatprep.mubr.msk.bf16.mxu0 %vm370_vm0, %v1003_v3 }
  0x31   : > { %2334 = vmatprep.mubr.msk.bf16.mxu1 %vm370_vm0, %v1087_v4 }
  0x32   : > { %2325 = vmatpush3.bf16.msra.mxu0 %v2432_v1 }
  0x33   : > { %2333 = vmatpush3.bf16.msra.mxu1 %v2433_v2  ;;  %2338 = vmatprep.subr.bf16.mxu0 %v2434_v9 }
  0x34   : > { %2346 = vmatprep.subr.bf16.mxu1 %v2435_v10 }
  0x35   : > { %2327 = vmatmul.mubr.msk.bf16.vlgmr.msra.gmra.mxu0 %vm370_vm0, %v1004_v11 }
  0x36   : > { %2335 = vmatmul.mubr.msk.bf16.vlgmr.msra.gmra.mxu1 %vm370_vm0, %v1088_v12  ;;  %2339 = vmatpush3.bf16.msra.mxu0 %v2434_v9 }
  0x37   : > { %2347 = vmatpush3.bf16.msra.mxu1 %v2435_v10  ;;  %2340 = vmatprep.subr.bf16.mxu0 %v2436_v13 }
  0x38   : > { %2348 = vmatprep.subr.bf16.mxu1 %v2437_v14  ;;  %2342 = vmatprep.mubr.msk.bf16.mxu0 %vm370_vm0, %v1171_v15 }
  0x39   : > { %2350 = vmatprep.mubr.msk.bf16.mxu1 %vm370_vm0, %v1255_v16 }
  0x3a   : > { %2341 = vmatpush3.bf16.msra.mxu0 %v2436_v13 }
  0x3b   : > { %2349 = vmatpush3.bf16.msra.mxu1 %v2437_v14  ;;  %2354 = vmatprep.subr.bf16.mxu0 %v2438_v19 }
  0x3c   : > { %2362 = vmatprep.subr.bf16.mxu1 %v2439_v20 }
  0x3d   : > { %2343 = vmatmul.mubr.msk.bf16.vlgmr.msra.gmra.mxu0 %vm370_vm0, %v1172_v23 }
  0x3e   : > { %2351 = vmatmul.mubr.msk.bf16.vlgmr.msra.gmra.mxu1 %vm370_vm0, %v1256_v24  ;;  %2355 = vmatpush3.bf16.msra.mxu0 %v2438_v19 }
  0x3f   : > { %2363 = vmatpush3.bf16.msra.mxu1 %v2439_v20  ;;  %2356 = vmatprep.subr.bf16.mxu0 %v2440_v26 }
  0x40   : > { %2364 = vmatprep.subr.bf16.mxu1 %v2441_v27  ;;  %2358 = vmatprep.mubr.msk.bf16.mxu0 %vm370_vm0, %v2599_v32  ;;  %v2445_v32 = vld [vmem:[%s2832_s1 + $0xf0] sm:$0xff]  }
  0x41   : > { %2366 = vmatprep.mubr.msk.bf16.mxu1 %vm370_vm0, %v2604_v34  ;;  %v1591_v34 = vpack.c.bf16 %v2698_v7, %v2680_v0 }
  0x42   : > { %2357 = vmatpush3.bf16.msra.mxu0 %v2440_v26 }
  0x43   : > { %2365 = vmatpush3.bf16.msra.mxu1 %v2441_v27  ;;  %2370 = vmatprep.subr.bf16.mxu0 %v2442_v35 }
  0x44   : > { %2378 = vmatprep.subr.bf16.mxu1 %v2443_v36 }
  0x45   : > { %2359 = vmatmul.mubr.msk.bf16.vlgmr.msra.gmra.mxu0 %vm370_vm0, %v1340_v37 }
  0x46   : > { %2367 = vmatmul.mubr.msk.bf16.vlgmr.msra.gmra.mxu1 %vm370_vm0, %v1424_v38  ;;  %2371 = vmatpush3.bf16.msra.mxu0 %v2442_v35 }
  0x47   : > { %2379 = vmatpush3.bf16.msra.mxu1 %v2443_v36  ;;  %2372 = vmatprep.subr.bf16.mxu0 %v2444_v39 }
  0x48   : > { %2380 = vmatprep.subr.bf16.mxu1 %v2445_v32  ;;  %2374 = vmatprep.mubr.msk.bf16.mxu0 %vm370_vm0, %v1507_v40 }
  0x49   : > { %2382 = vmatprep.mubr.msk.bf16.mxu1 %vm370_vm0, %v1591_v34 }
  0x4a   : > { %2373 = vmatpush3.bf16.msra.mxu0 %v2444_v39 }
  0x4b   : > { %2381 = vmatpush3.bf16.msra.mxu1 %v2445_v32 }
  0x4d   : > { %2375 = vmatmul.mubr.msk.bf16.vlgmr.msra.gmra.mxu0 %vm370_vm0, %v1508_v43 }
  0x4e   : > { %2383 = vmatmul.mubr.msk.bf16.vlgmr.msra.gmra.mxu1 %vm370_vm0, %v1592_v44 }
  0xd5   : > { %v2264_v45 = vpop.f32.mrf.mxu0 }
  0xd6   : > { %v2272_v46 = vpop.f32.mrf.mxu1 }
  0xd7   : > { %v411_v47 = vpop.f32.mrf.mxu0  ;;  %v487_v0 = vadd.f32 %v2272_v46, %v2264_v45 }
  0xd8   : > { %v478_v48 = vpop.f32.mrf.mxu1 }
  0xd9   : > { %v2265_v49 = vpop.f32.mrf.mxu0  ;;  %v479_v3 = vadd.f32 %v478_v48, %v411_v47 }
  0xda   : > { %v2273_v50 = vpop.f32.mrf.mxu1 }
  0xdb   : > { %v414_v51 = vpop.f32.mrf.mxu0  ;;  %v490_v7 = vadd.f32 %v2273_v50, %v2265_v49 }
  0xdc   : > { %v481_v52 = vpop.f32.mrf.mxu1 }
  0xdd   : > { %v2280_v53 = vpop.f32.mrf.mxu0  ;;  %v482_v14 = vadd.f32 %v481_v52, %v414_v51 }
  0xde   : > { %v2288_v54 = vpop.f32.mrf.mxu1  ;;  %v575_v4 = vadd.f32 %v2280_v53, %v487_v0 }
  0xdf   : > { %v558_v55 = vpop.f32.mrf.mxu0 }
  0xe0   : > { %v642_v56 = vpop.f32.mrf.mxu1  ;;  %v573_v8 = vadd.f32 %v558_v55, %v479_v3  ;;  %v659_v11 = vadd.f32 %v2288_v54, %v575_v4 }
  0xe1   : > { %v2281_v57 = vpop.f32.mrf.mxu0 }
  0xe2   : > { %v2289_v58 = vpop.f32.mrf.mxu1  ;;  %v576_v12 = vadd.f32 %v2281_v57, %v490_v7  ;;  %v657_v16 = vadd.f32 %v642_v56, %v573_v8 }
  0xe3   : > { %v561_v59 = vpop.f32.mrf.mxu0 }
  0xe4   : > { %v645_v60 = vpop.f32.mrf.mxu1  ;;  %v574_v19 = vadd.f32 %v561_v59, %v482_v14  ;;  %v660_v21 = vadd.f32 %v2289_v58, %v576_v12 }
  0xe5   : > { %v2296_v61 = vpop.f32.mrf.mxu0 }
  0xe6   : > { %v2304_v62 = vpop.f32.mrf.mxu1  ;;  %v743_v17 = vadd.f32 %v2296_v61, %v659_v11  ;;  %v658_v28 = vadd.f32 %v645_v60, %v574_v19 }
  0xe7   : > { %v726_v63 = vpop.f32.mrf.mxu0 }
  0xe8   : > { %v810_v1 = vpop.f32.mrf.mxu1  ;;  %v741_v22 = vadd.f32 %v726_v63, %v657_v16  ;;  %v827_v25 = vadd.f32 %v2304_v62, %v743_v17 }
  0xe9   : > { %v2297_v2 = vpop.f32.mrf.mxu0 }
  0xea   : > { %v2305_v5 = vpop.f32.mrf.mxu1  ;;  %v744_v26 = vadd.f32 %v2297_v2, %v660_v21  ;;  %v825_v30 = vadd.f32 %v810_v1, %v741_v22 }
  0xeb   : > { %v729_v6 = vpop.f32.mrf.mxu0 }
  0xec   : > { %v813_v9 = vpop.f32.mrf.mxu1  ;;  %v742_v35 = vadd.f32 %v729_v6, %v658_v28  ;;  %v828_v37 = vadd.f32 %v2305_v5, %v744_v26  ;;  %v2182_v26 = vld [vmem:[%s2833_s2] ss:$0 sm:$0xff] }
  0xed   : > { %v2312_v10 = vpop.f32.mrf.mxu0 }
  0xee   : > { %v2320_v13 = vpop.f32.mrf.mxu1  ;;  %v911_v31 = vadd.f32 %v2312_v10, %v827_v25  ;;  %v826_v42 = vadd.f32 %v813_v9, %v742_v35 }
  0xef   : > { %v894_v15 = vpop.f32.mrf.mxu0 }
  0xf0   : > { %v978_v18 = vpop.f32.mrf.mxu1  ;;  %v909_v38 = vadd.f32 %v894_v15, %v825_v30  ;;  %v995_v40 = vadd.f32 %v2320_v13, %v911_v31 }
  0xf1   : > { %v2313_v20 = vpop.f32.mrf.mxu0 }
  0xf2   : > { %v2321_v23 = vpop.f32.mrf.mxu1  ;;  %v912_v34 = vadd.f32 %v2313_v20, %v828_v37  ;;  %v993_v44 = vadd.f32 %v978_v18, %v909_v38 }
  0xf3   : > { %v897_v24 = vpop.f32.mrf.mxu0 }
  0xf4   : > { %v981_v27 = vpop.f32.mrf.mxu1  ;;  %v910_v47 = vadd.f32 %v897_v24, %v826_v42  ;;  %v996_v49 = vadd.f32 %v2321_v23, %v912_v34 }
  0xf5   : > { %v2328_v29 = vpop.f32.mrf.mxu0 }
  0xf6   : > { %v2336_v33 = vpop.f32.mrf.mxu1  ;;  %v1079_v45 = vadd.f32 %v2328_v29, %v995_v40  ;;  %v994_v56 = vadd.f32 %v981_v27, %v910_v47 }
  0xf7   : > { %v1062_v36 = vpop.f32.mrf.mxu0 }
  0xf8   : > { %v1146_v39 = vpop.f32.mrf.mxu1  ;;  %v1077_v50 = vadd.f32 %v1062_v36, %v993_v44  ;;  %v1163_v53 = vadd.f32 %v2336_v33, %v1079_v45 }
  0xf9   : > { %v2329_v32 = vpop.f32.mrf.mxu0 }
  0xfa   : > { %v2337_v41 = vpop.f32.mrf.mxu1  ;;  %v1080_v54 = vadd.f32 %v2329_v32, %v996_v49  ;;  %v1161_v58 = vadd.f32 %v1146_v39, %v1077_v50  ;;  %v1697_v39 = vpop.permute.xlu1 %1696 }
  0xfb   : > { %v1065_v43 = vpop.f32.mrf.mxu0 }
  0xfc   : > { %v1149_v46 = vpop.f32.mrf.mxu1  ;;  %v1078_v61 = vadd.f32 %v1065_v43, %v994_v56  ;;  %v1164_v63 = vadd.f32 %v2337_v41, %v1080_v54  ;;  %v1687_v43 = vpop.permute.xlu0 %1686 }
  0xfd   : > { %v2344_v48 = vpop.f32.mrf.mxu0 }
  0xfe   : > { %v2352_v51 = vpop.f32.mrf.mxu1  ;;  %v1247_v59 = vadd.f32 %v2344_v48, %v1163_v53  ;;  %v1162_v6 = vadd.f32 %v1149_v46, %v1078_v61 }
  0xff   : > { %v1230_v52 = vpop.f32.mrf.mxu0 }
 0x100   : > { %v1314_v55 = vpop.f32.mrf.mxu1  ;;  %v1245_v0 = vadd.f32 %v1230_v52, %v1161_v58  ;;  %v1331_v3 = vadd.f32 %v2352_v51, %v1247_v59  ;;  %v1702_v51 = vpop.permute.xlu1 %1701 }
 0x101   : > { %v2345_v57 = vpop.f32.mrf.mxu0  ;;  %v1692_v54 = vpop.permute.xlu0 %1691 }
 0x102   : > { %v2353_v60 = vpop.f32.mrf.mxu1  ;;  %v1248_v4 = vadd.f32 %v2345_v57, %v1164_v63  ;;  %v1329_v8 = vadd.f32 %v1314_v55, %v1245_v0 }
 0x103   : > { %v1233_v62 = vpop.f32.mrf.mxu0 }
 0x104   : > { %v1317_v1 = vpop.f32.mrf.mxu1  ;;  %v1246_v11 = vadd.f32 %v1233_v62, %v1162_v6  ;;  %v1332_v13 = vadd.f32 %v2353_v60, %v1248_v4 }
 0x105   : > { %v2360_v2 = vpop.f32.mrf.mxu0 }
 0x106   : > { %v2368_v5 = vpop.f32.mrf.mxu1  ;;  %v1415_v9 = vadd.f32 %v2360_v2, %v1331_v3  ;;  %v1330_v20 = vadd.f32 %v1317_v1, %v1246_v11 }
 0x107   : > { %v1398_v7 = vpop.f32.mrf.mxu0 }
 0x108   : > { %v1482_v10 = vpop.f32.mrf.mxu1  ;;  %v1413_v14 = vadd.f32 %v1398_v7, %v1329_v8  ;;  %v1499_v17 = vadd.f32 %v2368_v5, %v1415_v9 }
 0x109   : > { %v2361_v12 = vpop.f32.mrf.mxu0 }
 0x10a   : > { %v2369_v15 = vpop.f32.mrf.mxu1  ;;  %v1416_v18 = vadd.f32 %v2361_v12, %v1332_v13  ;;  %v1497_v22 = vadd.f32 %v1482_v10, %v1413_v14 }
 0x10b   : > { %v1401_v16 = vpop.f32.mrf.mxu0 }
 0x10c   : > { %v1485_v19 = vpop.f32.mrf.mxu1  ;;  %v1414_v25 = vadd.f32 %v1401_v16, %v1330_v20  ;;  %v1500_v28 = vadd.f32 %v2369_v15, %v1416_v18 }
 0x10d   : > { %v2376_v21 = vpop.f32.mrf.mxu0 }
 0x10e   : > { %v1583_v23 = vadd.f32 %v2376_v21, %v1499_v17  ;;  %v2384_v24 = vpop.f32.mrf.mxu1  ;;  %v1498_v32 = vadd.f32 %v1485_v19, %v1414_v25 }
 0x10f   : > { %v1566_v27 = vpop.f32.mrf.mxu0 }
 0x110   : > { %v1667_v29 = vadd.f32 %v2384_v24, %v1583_v23  ;;  %v1581_v30 = vadd.f32 %v1566_v27, %v1497_v22  ;;  %v1650_v31 = vpop.f32.mrf.mxu1 }
 0x111   : > { %v2377_v33 = vpop.f32.mrf.mxu0 }
 0x112   : > { %v1678_v35 = vadd.f32 %v2182_v26, %v1667_v29  ;;  %v1665_v36 = vadd.f32 %v1650_v31, %v1581_v30  ;;  %v1584_v37 = vadd.f32 %v2377_v33, %v1500_v28  ;;  %v2385_v38 = vpop.f32.mrf.mxu1 }
 0x113   : > { %v1569_v40 = vpop.f32.mrf.mxu0 }
 0x114   : > { %v2192_v34 = vpack.c.bf16 %v1678_v35, %v1678_v35  ;;  %v1676_v41 = vadd.f32 %v2182_v26, %v1665_v36  ;;  %v1668_v42 = vadd.f32 %v2385_v38, %v1584_v37  ;;  %v1582_v44 = vadd.f32 %v1569_v40, %v1498_v32  ;;  %v1653_v47 = vpop.f32.mrf.mxu1 }
 0x115   : > { %v1706_v52 = vmul.f32 %v1697_v39, %v1678_v35 }
 0x116   : > { %1760 = vst.msk [vmem:[%s316_s28 + $0x8] sm:$0xf] %vm1757_vm1, %v2192_v34  ;;  %v2190_v45 = vpack.c.bf16 %v1676_v41, %v1676_v41  ;;  %v1679_v46 = vadd.f32 %v2182_v26, %v1668_v42  ;;  %v1704_v48 = vmul.f32 %v1687_v43, %v1676_v41  ;;  %v1666_v49 = vadd.f32 %v1653_v47, %v1582_v44 }
 0x117   : > { %v1724_v60 = vmul.f32 %v1706_v52, %v1678_v35  ;;  %v1712_v1 = vsel %vm1708_vm2, %v1706_v52, 0.0 }
 0x118   : > { %1758 = vst.msk [vmem:[%s316_s28] sm:$0xf] %vm1757_vm1, %v2190_v45  ;;  %v2193_v50 = vpack.c.bf16 %v1679_v46, %v1679_v46  ;;  %v1677_v53 = vadd.f32 %v2182_v26, %v1666_v49  ;;  %v1722_v55 = vmul.f32 %v1704_v48, %v1676_v41  ;;  %v1707_v58 = vmul.f32 %v1702_v51, %v1679_v46 }
 0x119   : > { %v1709_v59 = vsel %vm1708_vm2, %v1704_v48, 0.0  ;;  %v1729_v6 = vsel %vm1708_vm2, %v1724_v60, 0.0 }
 0x11a   : > { %1761 = vst.msk [vmem:[%s316_s28 + $0xc] sm:$0xf] %vm1757_vm1, %v2193_v50  ;;  %v2191_v56 = vpack.c.bf16 %v1677_v53, %v1677_v53  ;;  %v1705_v57 = vmul.f32 %v1692_v54, %v1677_v53  ;;  %v1726_v0 = vsel %vm1708_vm2, %v1722_v55, 0.0  ;;  %v1725_v3 = vmul.f32 %v1707_v58, %v1679_v46 }
 0x11b   : > { %v1714_v7 = vsel %vm1708_vm2, %v1707_v58, 0.0 }
 0x11c   : > { %1759 = vst.msk [vmem:[%s316_s28 + $0x4] sm:$0xf] %vm1757_vm1, %v2191_v56  ;;  %v1710_v61 = vsel %vm1708_vm2, %v1705_v57, 0.0  ;;  %v1723_v62 = vmul.f32 %v1705_v57, %v1677_v53  ;;  %v1731_v10 = vsel %vm1708_vm2, %v1725_v3, 0.0 }
 0x11d   : > { %v1711_v63 = vadd.f32 %v1710_v61, %v1709_v59 }
 0x11e   : > { %v1727_v2 = vsel %vm1708_vm2, %v1723_v62, 0.0 }
 0x11f   : > { %v1728_v4 = vadd.f32 %v1727_v2, %v1726_v0  ;;  %v1713_v5 = vadd.f32 %v1712_v1, %v1711_v63 }
 0x121   : > { %v1715_v8 = vadd.f32 %v1714_v7, %v1713_v5  ;;  %v1730_v9 = vadd.f32 %v1729_v6, %v1728_v4 }
 0x123   : > { %v1716_v11 = vrot.slane %v1715_v8, 4  ;;  %v1732_v12 = vadd.f32 %v1731_v10, %v1730_v9 }
 0x125   : > { %v1717_v13 = vadd.f32 %v1716_v11, %v1715_v8  ;;  %v1733_v14 = vrot.slane %v1732_v12, 4 }
 0x127   : > { %v1718_v15 = vrot.slane %v1717_v13, 2  ;;  %v1734_v16 = vadd.f32 %v1733_v14, %v1732_v12 }
 0x129   : > { %v1719_v17 = vadd.f32 %v1718_v15, %v1717_v13  ;;  %v1735_v18 = vrot.slane %v1734_v16, 2 }
 0x12b   : > { %v1720_v19 = vrot.slane %v1719_v17, 1  ;;  %v1736_v20 = vadd.f32 %v1735_v18, %v1734_v16 }
 0x12d   : > { %v1721_v21 = vadd.f32 %v1720_v19, %v1719_v17  ;;  %v1737_v22 = vrot.slane %v1736_v20, 1 }
 0x12f   : > { %v1738_v23 = vadd.f32 %v1737_v22, %v1736_v20  ;;  %1739 = vst.msk [vmem:[%s324_s8] sm:$0xff] %vm1708_vm2, %v1721_v21 }
 0x131   : > { %1740 = vst.msk [vmem:[%s331_s11] sm:$0xff] %vm1708_vm2, %v1738_v23 }
 0x132 PF: > { %s17_s23 = sadd.s32 1, %s2468_s23   ;;  %s2838_s21 = smov %s2464_s22 }
 0x133   : > { %p14_p5 = scmp.ge.s32.totalorder %s17_s23, 4   ;;  %s2839_s22 = smov %s2841_s24 }
 0x135   :  { %16 = sbr.rel (!%p14_p5) target bundleno = 2 (0x2), region = 124 }

// kernel: discriminator_forward.9
= control target key start
LH: loop header
LB: loop body
LE: loop exit
PB: predicated region body
PF: predicated region fallthrough
CT: control target
= control target key end

     0   :  { %s526_s12 = smov 0   ;;  %s528_s13 = smov 0   ;;  %s574_s0 = inlined_call_operand.vmem [shape: bf16[2,1,32,64], index: 0, kind: input, shape index: {}]   ;;  %s575_s1 = inlined_call_operand.vmem [shape: bf16[1,64,16], index: 1, kind: input, shape index: {}]   ;;  %s576_s2 = inlined_call_operand.vmem [shape: f32[1,16], index: 2, kind: input, shape index: {}]   ;;  %s577_s3 = inlined_call_operand.vmem [shape: f32[2,32,16], index: 3, kind: output, shape index: {}]  }
   0x1   :  { %s530_s14 = smov 0  }
   0x2 LB: > { %s25_s15 = sadd.s32 1, %s500_s13  ;;  %p416_p0 = scmp.ge.s32.totalorder %s504_s14, 1  ;;  %s504_s14 = sphi %s530_s14, %s13_s14   ;;  %s500_s13 = sphi %s528_s13, %s579_s13   ;;  %s496_s12 = sphi %s526_s12, %s578_s12  }
   0x3   : > { %p27_p1 = scmp.ge.s32.totalorder %s25_s15, 2  ;;  %p158_p2 = scmp.lt.s32.totalorder %s504_s14, 3 }
   0x5   : > { %s581_s15 = smov (%p27_p1, %s25_s15), 0  ;;  %p159_p3 = pnand %p416_p0, %p158_p2 }
   0x6   : > { %p191_p4 = scmp.lt.s32.totalorder (!%p159_p3), %s496_s12, 1 }
   0x7   : > { %162 = sbr.rel (%p159_p3) target bundleno = 231 (0xe7), region = 32 }
   0xc   : > { %v476_v0 = vld [vmem:[%s575_s1 + $0x18] sm:$0xff]   ;;  %v477_v1 = vld [vmem:[%s575_s1 + $0x10] sm:$0xff]   ;;  %s583_s12 = smov (!%p191_p4, %s496_s12), 1  ;;  %v478_v2 = vld [vmem:[%s575_s1 + $0x8] sm:$0xff]   ;;  %vm264_vm0 = vcmask 523264   ;;  %vm320_vm1 = vcmask 130048  }
   0xd   : > { %440 = vmatprep.subr.bf16.mxu0 %v476_v0  ;;  %s432_s22 = sshll.u32 %s583_s12, 4  ;;  %v479_v4 = vld [vmem:[%s575_s1] sm:$0xff]   ;;  %s433_s28 = sshll.u32 %s583_s12, 5 }
   0xe   : > { %441 = vmatpush3.bf16.msra.mxu0 %v476_v0  ;;  %s198_s25 = scalar_lea.vmem %s574_s0, %s432_s22  ;;  %v421_v6 = vld [vmem:[%s576_s2] ss:$0 sm:$0xff]  ;;  %s208_s6 = scalar_lea.vmem %s577_s3, %s433_s28 }
   0xf   : > { %442 = vmatprep.subr.bf16.mxu0 %v477_v1  ;;  %v480_v3 = vld [vmem:[%s198_s25] sm:$0xff]   ;;  %v481_v5 = vld [vmem:[%s198_s25 + $0x8] sm:$0xff]  }
  0x10   : > { %448 = vmatprep.mubr.msk.bf16.mxu0 %vm264_vm0, %v480_v3 }
  0x12   : > { %443 = vmatpush3.bf16.msra.mxu0 %v477_v1 }
  0x13   : > { %444 = vmatprep.subr.bf16.mxu0 %v478_v2 }
  0x16   : > { %445 = vmatpush3.bf16.msra.mxu0 %v478_v2 }
  0x17   : > { %446 = vmatprep.subr.bf16.mxu0 %v479_v4 }
  0x1a   : > { %447 = vmatpush3.bf16.msra.mxu0 %v479_v4 }
  0x1d   : > { %449 = vmatmul.mubr.msk.bf16.vlgmr.msra.gmra.mxu0 %vm264_vm0, %v481_v5 }
  0xdd   : > { %v450_v7 = vpop.f32.mrf.mxu0 }
  0xde   : > { %v314_v8 = vadd.f32 %v450_v7, %v421_v6 }
  0xdf   : > { %v305_v9 = vpop.f32.mrf.mxu0 }
  0xe0   : > { %323 = vst.msk [vmem:[%s208_s6 + $0x10] sm:$0xff] %vm320_vm1, %v314_v8  ;;  %v306_v10 = vadd.f32 %v421_v6, %v305_v9 }
  0xe1   : > { %v451_v11 = vpop.f32.mrf.mxu0 }
  0xe2   : > { %321 = vst.msk [vmem:[%s208_s6] sm:$0xff] %vm320_vm1, %v306_v10  ;;  %v317_v12 = vadd.f32 %v451_v11, %v421_v6 }
  0xe3   : > { %v308_v13 = vpop.f32.mrf.mxu0 }
  0xe4   : > { %324 = vst.msk [vmem:[%s208_s6 + $0x18] sm:$0xff] %vm320_vm1, %v317_v12  ;;  %v309_v14 = vadd.f32 %v421_v6, %v308_v13 }
  0xe6   : > { %322 = vst.msk [vmem:[%s208_s6 + $0x8] sm:$0xff] %vm320_vm1, %v309_v14 }
  0xe7 PF: > { %s13_s14 = sadd.s32 1, %s504_s14   ;;  %s578_s12 = smov %s500_s13 }
  0xe8   : > { %p10_p5 = scmp.ge.s32.totalorder %s13_s14, 4   ;;  %s579_s13 = smov %s581_s15 }
  0xea   :  { %12 = sbr.rel (!%p10_p5) target bundleno = 2 (0x2), region = 62 }

</bundles_post_ra>
